<compile_context>
chip_gen: v6e
topology: v6e:2x2x1
jax: 0.10.0
libtpu: 0.0.40
codegen_flags: <defaults>
</compile_context>

<pallas_src>
import jax
import jax.numpy as jnp
from jax.experimental import pallas as pl
from jax.experimental.pallas import tpu as pltpu

LANE = 128
MM_DTYPE = jnp.bfloat16   # MXU input dtype (f32 accumulate). Set jnp.float32 for bit-exact f32.


def _round_up(x, m):
    return ((x + m - 1) // m) * m


def _double_conv_kernel(x_ref, w1_ref, b1_ref, w2_ref, b2_ref, o_ref,
                        xpad_ref, ypad_ref):
    """Fully fused DoubleConv, one image per grid step.

    x_ref:    (1, H, W, Cin)           input image tile (f32)
    w1_ref:   (9*Cin, Cmid_p)          conv1 weights, BN1 scale folded, tap-major
    b1_ref:   (1, Cmid_p)              folded BN1 bias (f32)
    w2_ref:   (9*Cmid_p, Cout_p)       conv2 weights, BN2 scale folded
    b2_ref:   (1, Cout_p)              folded BN2 bias (f32)
    o_ref:    (1, H, W, Cout_p)        output (f32, lane-dense channels)
    xpad_ref: VMEM (H+2, W+2, Cin)     zero-bordered staging for conv1
    ypad_ref: VMEM (H+2, W+2, Cmid_p)  zero-bordered intermediate activation
    """
    H, W = o_ref.shape[1], o_ref.shape[2]
    Cin = x_ref.shape[3]
    Cmid = ypad_ref.shape[2]
    Cout = o_ref.shape[3]

    # Build the zero border in VMEM (replaces the wrapper-side jnp.pad).
    # Zeroed every step (cheap VMEM memset) so it is correct even when the
    # grid axis is partitioned across TensorCores (per-core scratch).
    xpad_ref[...] = jnp.zeros_like(xpad_ref)
    ypad_ref[...] = jnp.zeros_like(ypad_ref)
    xpad_ref[1:H + 1, 1:W + 1, :] = x_ref[0].astype(xpad_ref.dtype)

    def conv3x3_bn_relu(src_ref, w_ref, b_ref, cin):
        # im2col: one (H*W, 9*cin) patch matrix -> ONE MXU matmul.
        taps = [src_ref[kh:kh + H, kw:kw + W, :]
                for kh in range(3) for kw in range(3)]        # kh-major order
        patch = jnp.concatenate(taps, axis=-1).reshape(H * W, 9 * cin)
        acc = jnp.dot(patch, w_ref[...],
                      preferred_element_type=jnp.float32)     # f32 accumulate
        return jnp.maximum(acc + b_ref[...], 0.0)             # f32 bias + ReLU

    # conv1 + BN1 + ReLU -> intermediate stays in VMEM (bf16), never hits HBM.
    y1 = conv3x3_bn_relu(xpad_ref, w1_ref, b1_ref, Cin)        # (H*W, Cmid_p)
    ypad_ref[1:H + 1, 1:W + 1, :] = (
        y1.reshape(H, W, Cmid).astype(ypad_ref.dtype))

    # conv2 + BN2 + ReLU -> lane-dense output store.
    y2 = conv3x3_bn_relu(ypad_ref, w2_ref, b2_ref, Cmid)       # (H*W, Cout_p)
    o_ref[0] = y2.reshape(H, W, Cout).astype(o_ref.dtype)


def double_conv_nhwc(x_nhwc, packed):
    """Fused DoubleConv on NHWC input.

    Returns (N, H, W, Cout_pad) f32; channels beyond the real Cout are zero.
    """
    N, H, W, Cin = x_nhwc.shape
    w1, b1, w2, b2 = packed["w1"], packed["b1"], packed["w2"], packed["b2"]
    Cmid_p = w1.shape[1]
    Cout_p = w2.shape[1]

    return pl.pallas_call(
        _double_conv_kernel,
        out_shape=jax.ShapeDtypeStruct((N, H, W, Cout_p), jnp.float32),
        grid_spec=pltpu.PrefetchScalarGridSpec(
            num_scalar_prefetch=0,
            grid=(N,),
            in_specs=[
                pl.BlockSpec((1, H, W, Cin), lambda n: (n, 0, 0, 0)),
                pl.BlockSpec((9 * Cin, Cmid_p), lambda n: (0, 0)),
                pl.BlockSpec((1, Cmid_p), lambda n: (0, 0)),
                pl.BlockSpec((9 * Cmid_p, Cout_p), lambda n: (0, 0)),
                pl.BlockSpec((1, Cout_p), lambda n: (0, 0)),
            ],
            out_specs=pl.BlockSpec((1, H, W, Cout_p), lambda n: (n, 0, 0, 0)),
            scratch_shapes=[
                pltpu.VMEM((H + 2, W + 2, Cin), MM_DTYPE),
                pltpu.VMEM((H + 2, W + 2, Cmid_p), MM_DTYPE),
            ],
        ),
        compiler_params=pltpu.CompilerParams(
            dimension_semantics=("parallel",),
            vmem_limit_bytes=32 * 1024 * 1024,
        ),
    )(x_nhwc, w1, b1, w2, b2)


def double_conv(x_nchw, packed, out_channels):
    """PyTorch-convention (NCHW) entry point.

    NOTE: in a full NHWC model the boundary transposes (full HBM read+write
    each) and the channel-padding slice should be dropped -- call
    double_conv_nhwc directly and keep activations NHWC / lane-padded.
    """
    x = jnp.transpose(x_nchw, (0, 2, 3, 1))          # NCHW -> NHWC
    y = double_conv_nhwc(x, packed)
    y = y[..., :out_channels]                        # drop lane-padding channels
    return jnp.transpose(y, (0, 3, 1, 2))            # NHWC -> NCHW


def fold_and_pack_params(params, in_channels, mid_channels, out_channels,
                         eps=1e-5, mm_dtype=MM_DTYPE):
    """Fold BN scale into the conv weights, flatten to the im2col layout
    (9*Cin, Cout) and zero-pad output channels to a lane-dense multiple of 128.
    Done once, outside the hot path."""
    cmid_p = _round_up(mid_channels, LANE)
    cout_p = _round_up(out_channels, LANE)

    def fold(w_oihw, gamma, beta, mean, var):
        scale = gamma / jnp.sqrt(var + eps)                   # (Cout,)
        bias = beta - mean * scale                            # (Cout,)
        # (Cout, Cin, 3, 3) -> (3, 3, Cin, Cout), fold BN scale into Cout.
        w = jnp.transpose(w_oihw, (2, 3, 1, 0)) * scale
        return w, bias

    w1, b1 = fold(params["w1"], params["bn1_gamma"], params["bn1_beta"],
                  params["bn1_mean"], params["bn1_var"])
    w2, b2 = fold(params["w2"], params["bn2_gamma"], params["bn2_beta"],
                  params["bn2_mean"], params["bn2_var"])

    # conv1: (3,3,Cin,Cmid) -> (9*Cin, Cmid_p).
    w1_mat = jnp.zeros((9 * in_channels, cmid_p), mm_dtype)
    w1_mat = w1_mat.at[:, :mid_channels].set(
        w1.reshape(9 * in_channels, mid_channels).astype(mm_dtype))
    b1_vec = jnp.zeros((1, cmid_p), jnp.float32).at[0, :mid_channels].set(b1)

    # conv2: (3,3,Cmid,Cout) -> (9*Cmid_p, Cout_p) with zero rows/cols for pad.
    w2_full = jnp.zeros((9, cmid_p, cout_p), mm_dtype)
    w2_full = w2_full.at[:, :mid_channels, :out_channels].set(
        w2.reshape(9, mid_channels, out_channels).astype(mm_dtype))
    w2_mat = w2_full.reshape(9 * cmid_p, cout_p)
    b2_vec = jnp.zeros((1, cout_p), jnp.float32).at[0, :out_channels].set(b2)

    return {"w1": w1_mat, "b1": b1_vec, "w2": w2_mat, "b2": b2_vec}


def init_params(key, in_channels, out_channels, mid_channels=None):
    if not mid_channels:
        mid_channels = out_channels
    k1, k2, k3, k4 = jax.random.split(key, 4)
    return {
        # PyTorch Conv2d layout: (Cout, Cin, 3, 3), bias=False.
        "w1": 0.1 * jax.random.normal(k1, (mid_channels, in_channels, 3, 3),
                                      jnp.float32),
        "bn1_gamma": jnp.linspace(0.8, 1.2, mid_channels, dtype=jnp.float32),
        "bn1_beta": jnp.linspace(-0.1, 0.1, mid_channels, dtype=jnp.float32),
        "bn1_mean": 0.05 * jax.random.normal(k3, (mid_channels,), jnp.float32),
        "bn1_var": jnp.linspace(0.9, 1.1, mid_channels, dtype=jnp.float32),
        "w2": 0.1 * jax.random.normal(k2, (out_channels, mid_channels, 3, 3),
                                      jnp.float32),
        "bn2_gamma": jnp.linspace(0.9, 1.1, out_channels, dtype=jnp.float32),
        "bn2_beta": jnp.linspace(-0.05, 0.05, out_channels, dtype=jnp.float32),
        "bn2_mean": 0.05 * jax.random.normal(k4, (out_channels,), jnp.float32),
        "bn2_var": jnp.linspace(0.95, 1.05, out_channels, dtype=jnp.float32),
    }


def reference_double_conv(x_nchw, packed, out_channels, mm_dtype=MM_DTYPE):
    """Pure-JAX reference with the same folded/padded/bf16 parameters."""
    x = jnp.transpose(x_nchw, (0, 2, 3, 1))

    def conv_bn_relu(inp, w_mat, b_vec):
        n, h, w_, c = inp.shape
        cp = w_mat.shape[1]
        wk = w_mat.reshape(3, 3, c, cp)
        xp = jnp.pad(inp.astype(mm_dtype), ((0, 0), (1, 1), (1, 1), (0, 0)))
        acc = jnp.zeros((n, h, w_, cp), jnp.float32)
        for kh in range(3):
            for kw in range(3):
                acc = acc + jnp.einsum(
                    "nhwc,cd->nhwd", xp[:, kh:kh + h, kw:kw + w_, :],
                    wk[kh, kw], preferred_element_type=jnp.float32)
        return jnp.maximum(acc + b_vec[0], 0.0)

    y1 = conv_bn_relu(x, packed["w1"], packed["b1"])
    y2 = conv_bn_relu(y1, packed["w2"], packed["b2"])
    return jnp.transpose(y2[..., :out_channels], (0, 3, 1, 2))


if __name__ == "__main__":
    key = jax.random.PRNGKey(0)
    kx, kp = jax.random.split(key)

    N, Cin, H, W = 2, 4, 16, 16
    Cmid, Cout = 8, 8
    x = jax.random.normal(kx, (N, Cin, H, W), jnp.float32)

    params = init_params(kp, Cin, Cout, Cmid)
    packed = fold_and_pack_params(params, Cin, Cmid, Cout)

    fwd = jax.jit(lambda xx: double_conv(xx, packed, Cout))
    out = fwd(x)
    jax.block_until_ready(out)
    assert out.shape == (N, Cout, H, W), out.shape

    ref = reference_double_conv(x, packed, Cout)
    err = float(jnp.max(jnp.abs(out - ref)))
    assert err < 1e-2, f"max abs err vs reference: {err}"

    print("KERNEL_OK")
</pallas_src>

<mosaic_0001>
module attributes {stable_mosaic.version = 11 : i64} {
  func.func @_double_conv_kernel(%arg0: i32, %arg1: memref<1x16x16x4xf32, #tpu.memory_space<vmem>>, %arg2: memref<36x128xbf16, #tpu.memory_space<vmem>>, %arg3: memref<1x128xf32, #tpu.memory_space<vmem>>, %arg4: memref<1152x128xbf16, #tpu.memory_space<vmem>>, %arg5: memref<1x128xf32, #tpu.memory_space<vmem>>, %arg6: memref<1x16x16x128xf32, #tpu.memory_space<vmem>>, %arg7: memref<18x18x4xbf16, #tpu.memory_space<vmem>>, %arg8: memref<18x18x128xbf16, #tpu.memory_space<vmem>>) attributes {dimension_semantics = [#tpu.dimension_semantics<parallel>], iteration_bounds = array<i64: 2>, scalar_prefetch = 0 : i64, scratch_operands = 2 : i64, tpu.core_type = #tpu.core_type<tc>, window_params = [{transform_indices = @transform_0, window_bounds = array<i64: 1, 16, 16, 4>}, {pipeline_mode = #tpu.pipeline_mode<synchronous>, transform_indices = @transform_1, window_bounds = array<i64: 36, 128>}, {pipeline_mode = #tpu.pipeline_mode<synchronous>, transform_indices = @transform_2, window_bounds = array<i64: 1, 128>}, {pipeline_mode = #tpu.pipeline_mode<synchronous>, transform_indices = @transform_3, window_bounds = array<i64: 1152, 128>}, {pipeline_mode = #tpu.pipeline_mode<synchronous>, transform_indices = @transform_4, window_bounds = array<i64: 1, 128>}, {transform_indices = @transform_5, window_bounds = array<i64: 1, 16, 16, 128>}]} {
    %cst = arith.constant 0.000000e+00 : bf16
    %0 = vector.broadcast %cst : bf16 to vector<18x18x4xbf16>
    %c0 = arith.constant 0 : index
    %c0_0 = arith.constant 0 : index
    %c0_1 = arith.constant 0 : index
    %1 = vector.load %arg7[%c0, %c0_0, %c0_1] : memref<18x18x4xbf16, #tpu.memory_space<vmem>>, vector<18x18x4xbf16>
    tpu.vector_store %arg7[%c0, %c0_0, %c0_1], %0 {strides = array<i32>} : memref<18x18x4xbf16, #tpu.memory_space<vmem>>, vector<18x18x4xbf16>,
    %cst_2 = arith.constant 0.000000e+00 : bf16
    %2 = vector.broadcast %cst_2 : bf16 to vector<18x18x128xbf16>
    %c0_3 = arith.constant 0 : index
    %c0_4 = arith.constant 0 : index
    %c0_5 = arith.constant 0 : index
    %3 = vector.load %arg8[%c0_3, %c0_4, %c0_5] : memref<18x18x128xbf16, #tpu.memory_space<vmem>>, vector<18x18x128xbf16>
    tpu.vector_store %arg8[%c0_3, %c0_4, %c0_5], %2 {strides = array<i32>} : memref<18x18x128xbf16, #tpu.memory_space<vmem>>, vector<18x18x128xbf16>,
    %c0_6 = arith.constant 0 : index
    %c0_7 = arith.constant 0 : index
    %c0_8 = arith.constant 0 : index
    %c0_9 = arith.constant 0 : index
    %4 = vector.load %arg1[%c0_6, %c0_7, %c0_8, %c0_9] : memref<1x16x16x4xf32, #tpu.memory_space<vmem>>, vector<1x16x16x4xf32>
    %5 = vector.shape_cast %4 : vector<1x16x16x4xf32> to vector<16x16x4xf32>
    %6 = arith.truncf %5 : vector<16x16x4xf32> to vector<16x16x4xbf16>
    %c1 = arith.constant 1 : index
    %c1_10 = arith.constant 1 : index
    %c0_11 = arith.constant 0 : index
    %7 = vector.load %arg7[%c1, %c1_10, %c0_11] : memref<18x18x4xbf16, #tpu.memory_space<vmem>>, vector<16x16x4xbf16>
    tpu.vector_store %arg7[%c1, %c1_10, %c0_11], %6 {strides = array<i32>} : memref<18x18x4xbf16, #tpu.memory_space<vmem>>, vector<16x16x4xbf16>,
    %c0_12 = arith.constant 0 : index
    %c0_13 = arith.constant 0 : index
    %c0_14 = arith.constant 0 : index
    %8 = vector.load %arg7[%c0_12, %c0_13, %c0_14] : memref<18x18x4xbf16, #tpu.memory_space<vmem>>, vector<16x16x4xbf16>
    %c0_15 = arith.constant 0 : index
    %c1_16 = arith.constant 1 : index
    %c0_17 = arith.constant 0 : index
    %9 = vector.load %arg7[%c0_15, %c1_16, %c0_17] : memref<18x18x4xbf16, #tpu.memory_space<vmem>>, vector<16x16x4xbf16>
    %c0_18 = arith.constant 0 : index
    %c2 = arith.constant 2 : index
    %c0_19 = arith.constant 0 : index
    %10 = vector.load %arg7[%c0_18, %c2, %c0_19] : memref<18x18x4xbf16, #tpu.memory_space<vmem>>, vector<16x16x4xbf16>
    %c1_20 = arith.constant 1 : index
    %c0_21 = arith.constant 0 : index
    %c0_22 = arith.constant 0 : index
    %11 = vector.load %arg7[%c1_20, %c0_21, %c0_22] : memref<18x18x4xbf16, #tpu.memory_space<vmem>>, vector<16x16x4xbf16>
    %c1_23 = arith.constant 1 : index
    %c1_24 = arith.constant 1 : index
    %c0_25 = arith.constant 0 : index
    %12 = vector.load %arg7[%c1_23, %c1_24, %c0_25] : memref<18x18x4xbf16, #tpu.memory_space<vmem>>, vector<16x16x4xbf16>
    %c1_26 = arith.constant 1 : index
    %c2_27 = arith.constant 2 : index
    %c0_28 = arith.constant 0 : index
    %13 = vector.load %arg7[%c1_26, %c2_27, %c0_28] : memref<18x18x4xbf16, #tpu.memory_space<vmem>>, vector<16x16x4xbf16>
    %c2_29 = arith.constant 2 : index
    %c0_30 = arith.constant 0 : index
    %c0_31 = arith.constant 0 : index
    %14 = vector.load %arg7[%c2_29, %c0_30, %c0_31] : memref<18x18x4xbf16, #tpu.memory_space<vmem>>, vector<16x16x4xbf16>
    %c2_32 = arith.constant 2 : index
    %c1_33 = arith.constant 1 : index
    %c0_34 = arith.constant 0 : index
    %15 = vector.load %arg7[%c2_32, %c1_33, %c0_34] : memref<18x18x4xbf16, #tpu.memory_space<vmem>>, vector<16x16x4xbf16>
    %c2_35 = arith.constant 2 : index
    %c2_36 = arith.constant 2 : index
    %c0_37 = arith.constant 0 : index
    %16 = vector.load %arg7[%c2_35, %c2_36, %c0_37] : memref<18x18x4xbf16, #tpu.memory_space<vmem>>, vector<16x16x4xbf16>
    %17 = tpu.concatenate %8, %9, %10, %11, %12, %13, %14, %15, %16 in 2 : vector<16x16x4xbf16>, vector<16x16x4xbf16>, vector<16x16x4xbf16>, vector<16x16x4xbf16>, vector<16x16x4xbf16>, vector<16x16x4xbf16>, vector<16x16x4xbf16>, vector<16x16x4xbf16>, vector<16x16x4xbf16> -> vector<16x16x36xbf16>
    %18 = vector.shape_cast %17 : vector<16x16x36xbf16> to vector<256x36xbf16>
    %c0_38 = arith.constant 0 : index
    %c0_39 = arith.constant 0 : index
    %19 = vector.load %arg2[%c0_38, %c0_39] : memref<36x128xbf16, #tpu.memory_space<vmem>>, vector<36x128xbf16>
    %cst_40 = arith.constant dense<0.000000e+00> : vector<256x128xf32>
    %20 = tpu.matmul %18, %19, %cst_40 {dimension_numbers = #tpu.dot_dimension_numbers<[1], [0], [0], [1], [0, 0, 1, 1], [], []>} : vector<256x36xbf16>, vector<36x128xbf16>, vector<256x128xf32> -> vector<256x128xf32>
    %c0_41 = arith.constant 0 : index
    %c0_42 = arith.constant 0 : index
    %21 = vector.load %arg3[%c0_41, %c0_42] : memref<1x128xf32, #tpu.memory_space<vmem>>, vector<1x128xf32>
    %22 = vector.broadcast %21 : vector<1x128xf32> to vector<256x128xf32>
    %23 = arith.addf %20, %22 : vector<256x128xf32>
    %cst_43 = arith.constant 0.000000e+00 : f32
    %24 = vector.broadcast %cst_43 : f32 to vector<256x128xf32>
    %25 = arith.maximumf %23, %24 : vector<256x128xf32>
    %26 = vector.shape_cast %25 : vector<256x128xf32> to vector<16x16x128xf32>
    %27 = arith.truncf %26 : vector<16x16x128xf32> to vector<16x16x128xbf16>
    %c1_44 = arith.constant 1 : index
    %c1_45 = arith.constant 1 : index
    %c0_46 = arith.constant 0 : index
    %28 = vector.load %arg8[%c1_44, %c1_45, %c0_46] : memref<18x18x128xbf16, #tpu.memory_space<vmem>>, vector<16x16x128xbf16>
    tpu.vector_store %arg8[%c1_44, %c1_45, %c0_46], %27 {strides = array<i32>} : memref<18x18x128xbf16, #tpu.memory_space<vmem>>, vector<16x16x128xbf16>,
    %c0_47 = arith.constant 0 : index
    %c0_48 = arith.constant 0 : index
    %c0_49 = arith.constant 0 : index
    %29 = vector.load %arg8[%c0_47, %c0_48, %c0_49] : memref<18x18x128xbf16, #tpu.memory_space<vmem>>, vector<16x16x128xbf16>
    %c0_50 = arith.constant 0 : index
    %c1_51 = arith.constant 1 : index
    %c0_52 = arith.constant 0 : index
    %30 = vector.load %arg8[%c0_50, %c1_51, %c0_52] : memref<18x18x128xbf16, #tpu.memory_space<vmem>>, vector<16x16x128xbf16>
    %c0_53 = arith.constant 0 : index
    %c2_54 = arith.constant 2 : index
    %c0_55 = arith.constant 0 : index
    %31 = vector.load %arg8[%c0_53, %c2_54, %c0_55] : memref<18x18x128xbf16, #tpu.memory_space<vmem>>, vector<16x16x128xbf16>
    %c1_56 = arith.constant 1 : index
    %c0_57 = arith.constant 0 : index
    %c0_58 = arith.constant 0 : index
    %32 = vector.load %arg8[%c1_56, %c0_57, %c0_58] : memref<18x18x128xbf16, #tpu.memory_space<vmem>>, vector<16x16x128xbf16>
    %c1_59 = arith.constant 1 : index
    %c1_60 = arith.constant 1 : index
    %c0_61 = arith.constant 0 : index
    %33 = vector.load %arg8[%c1_59, %c1_60, %c0_61] : memref<18x18x128xbf16, #tpu.memory_space<vmem>>, vector<16x16x128xbf16>
    %c1_62 = arith.constant 1 : index
    %c2_63 = arith.constant 2 : index
    %c0_64 = arith.constant 0 : index
    %34 = vector.load %arg8[%c1_62, %c2_63, %c0_64] : memref<18x18x128xbf16, #tpu.memory_space<vmem>>, vector<16x16x128xbf16>
    %c2_65 = arith.constant 2 : index
    %c0_66 = arith.constant 0 : index
    %c0_67 = arith.constant 0 : index
    %35 = vector.load %arg8[%c2_65, %c0_66, %c0_67] : memref<18x18x128xbf16, #tpu.memory_space<vmem>>, vector<16x16x128xbf16>
    %c2_68 = arith.constant 2 : index
    %c1_69 = arith.constant 1 : index
    %c0_70 = arith.constant 0 : index
    %36 = vector.load %arg8[%c2_68, %c1_69, %c0_70] : memref<18x18x128xbf16, #tpu.memory_space<vmem>>, vector<16x16x128xbf16>
    %c2_71 = arith.constant 2 : index
    %c2_72 = arith.constant 2 : index
    %c0_73 = arith.constant 0 : index
    %37 = vector.load %arg8[%c2_71, %c2_72, %c0_73] : memref<18x18x128xbf16, #tpu.memory_space<vmem>>, vector<16x16x128xbf16>
    %38 = tpu.concatenate %29, %30, %31, %32, %33, %34, %35, %36, %37 in 2 : vector<16x16x128xbf16>, vector<16x16x128xbf16>, vector<16x16x128xbf16>, vector<16x16x128xbf16>, vector<16x16x128xbf16>, vector<16x16x128xbf16>, vector<16x16x128xbf16>, vector<16x16x128xbf16>, vector<16x16x128xbf16> -> vector<16x16x1152xbf16>
    %39 = vector.shape_cast %38 : vector<16x16x1152xbf16> to vector<256x1152xbf16>
    %c0_74 = arith.constant 0 : index
    %c0_75 = arith.constant 0 : index
    %40 = vector.load %arg4[%c0_74, %c0_75] : memref<1152x128xbf16, #tpu.memory_space<vmem>>, vector<1152x128xbf16>
    %cst_76 = arith.constant dense<0.000000e+00> : vector<256x128xf32>
    %41 = tpu.matmul %39, %40, %cst_76 {dimension_numbers = #tpu.dot_dimension_numbers<[1], [0], [0], [1], [0, 0, 1, 1], [], []>} : vector<256x1152xbf16>, vector<1152x128xbf16>, vector<256x128xf32> -> vector<256x128xf32>
    %c0_77 = arith.constant 0 : index
    %c0_78 = arith.constant 0 : index
    %42 = vector.load %arg5[%c0_77, %c0_78] : memref<1x128xf32, #tpu.memory_space<vmem>>, vector<1x128xf32>
    %43 = vector.broadcast %42 : vector<1x128xf32> to vector<256x128xf32>
    %44 = arith.addf %41, %43 : vector<256x128xf32>
    %cst_79 = arith.constant 0.000000e+00 : f32
    %45 = vector.broadcast %cst_79 : f32 to vector<256x128xf32>
    %46 = arith.maximumf %44, %45 : vector<256x128xf32>
    %47 = vector.shape_cast %46 : vector<256x128xf32> to vector<16x16x128xf32>
    %c0_80 = arith.constant 0 : index
    %c0_81 = arith.constant 0 : index
    %c0_82 = arith.constant 0 : index
    %c0_83 = arith.constant 0 : index
    %48 = vector.load %arg6[%c0_80, %c0_81, %c0_82, %c0_83] : memref<1x16x16x128xf32, #tpu.memory_space<vmem>>, vector<1x16x16x128xf32>
    %49 = vector.shape_cast %48 : vector<1x16x16x128xf32> to vector<16x16x128xf32>
    %50 = vector.shape_cast %47 : vector<16x16x128xf32> to vector<1x16x16x128xf32>
    tpu.vector_store %arg6[%c0_80, %c0_81, %c0_82, %c0_83], %50 {strides = array<i32>} : memref<1x16x16x128xf32, #tpu.memory_space<vmem>>, vector<1x16x16x128xf32>,
    return
  }
  func.func @transform_0(%arg0: i32) -> (i32, i32, i32, i32) {
    %c0_i32 = arith.constant 0 : i32
    %c0_i32_0 = arith.constant 0 : i32
    %c0_i32_1 = arith.constant 0 : i32
    %c0_i32_2 = arith.constant 0 : i32
    return %arg0, %c0_i32, %c0_i32_0, %c0_i32_1 : i32, i32, i32, i32
  }
  func.func @transform_1(%arg0: i32) -> (i32, i32) {
    %c0_i32 = arith.constant 0 : i32
    %c0_i32_0 = arith.constant 0 : i32
    %c0_i32_1 = arith.constant 0 : i32
    return %c0_i32, %c0_i32_0 : i32, i32
  }
  func.func @transform_2(%arg0: i32) -> (i32, i32) {
    %c0_i32 = arith.constant 0 : i32
    %c0_i32_0 = arith.constant 0 : i32
    %c0_i32_1 = arith.constant 0 : i32
    return %c0_i32, %c0_i32_0 : i32, i32
  }
  func.func @transform_3(%arg0: i32) -> (i32, i32) {
    %c0_i32 = arith.constant 0 : i32
    %c0_i32_0 = arith.constant 0 : i32
    %c0_i32_1 = arith.constant 0 : i32
    return %c0_i32, %c0_i32_0 : i32, i32
  }
  func.func @transform_4(%arg0: i32) -> (i32, i32) {
    %c0_i32 = arith.constant 0 : i32
    %c0_i32_0 = arith.constant 0 : i32
    %c0_i32_1 = arith.constant 0 : i32
    return %c0_i32, %c0_i32_0 : i32, i32
  }
  func.func @transform_5(%arg0: i32) -> (i32, i32, i32, i32) {
    %c0_i32 = arith.constant 0 : i32
    %c0_i32_0 = arith.constant 0 : i32
    %c0_i32_1 = arith.constant 0 : i32
    %c0_i32_2 = arith.constant 0 : i32
    return %arg0, %c0_i32, %c0_i32_0, %c0_i32_1 : i32, i32, i32, i32
  }
}

</mosaic_0001>

<bundles_post_ra>
// kernel: _lambda_.1
= control target key start
LH: loop header
LB: loop body
LE: loop exit
PB: predicated region body
PF: predicated region fallthrough
CT: control target
= control target key end

     0   :  { %s8334_s18 = smov 0   ;;  %s11084_s0 = inlined_call_operand.vmem [shape: f32[2,16,16,4], index: 0, kind: input, shape index: {}]   ;;  %s11085_s1 = inlined_call_operand.vmem [shape: bf16[36,128], index: 1, kind: input, shape index: {}]   ;;  %s11086_s2 = inlined_call_operand.vmem [shape: f32[1,128], index: 2, kind: input, shape index: {}]   ;;  %s11087_s3 = inlined_call_operand.vmem [shape: bf16[1152,128], index: 3, kind: input, shape index: {}]   ;;  %s11088_s4 = inlined_call_operand.vmem [shape: f32[1,128], index: 4, kind: input, shape index: {}]   ;;  %s11089_s5 = inlined_call_operand.vmem [shape: f32[2,16,16,128], index: 5, kind: output, shape index: {}]  }
   0x1 LB: > { %s6750_s19 = sadd.s32 4294967295, %s8293_s18   ;;  %p6754_p0 = scmp.ge.s32.totalorder %s8293_s18, 1  ;;  %s8293_s18 = sphi %s8334_s18, %s15_s18  }
   0x2   : > { %p187_p1 = scmp.lt.s32.totalorder %s8293_s18, 3 }
   0x4   : > { %p188_p2 = pnand %p6754_p0, %p187_p1 }
   0x6   : > { %191 = sbr.rel (%p188_p2) target bundleno = 1065 (0x429), region = 40 }
   0xb   : > { %vm226_vm0 = vcmask 27648   ;;  %vm229_vm1 = vcmask 24576   ;;  %v8295_v0 = vmov 0   ;;  %p215_p3 = scmp.lt.s32.totalorder %s6750_s19, 1  ;;  %vm11090_vm2 = vsmask.f32 256 }
   0xc   : > { %227 = vst.msk [vmem:[#allocation2] sm:$0xf] %vm226_vm0, %v8295_v0  ;;  %228 = vst.msk [vmem:[#allocation2 + $0x4] sm:$0xf] %vm226_vm0, %v8295_v0  ;;  %vm465_vm3 = vsmask.f32 4368 }
   0xd   : > { %230 = vst.msk [vmem:[#allocation2 + $0x8] sm:$0x1] %vm229_vm1, %v8295_v0  ;;  %233 = vst.msk [vmem:[#allocation2 + $0x14] sm:$0x1] %vm229_vm1, %v8295_v0  ;;  %s11141_s19 = smov (!%p215_p3, %s6750_s19), 1  ;;  %vm1499_vm6 = vcmask 1046528  }
   0xe   : > { %231 = vst.msk [vmem:[#allocation2 + $0xc] sm:$0xf] %vm226_vm0, %v8295_v0  ;;  %232 = vst.msk [vmem:[#allocation2 + $0x10] sm:$0xf] %vm226_vm0, %v8295_v0  ;;  %s7206_s20 = sshll.u32 %s11141_s19, 8  ;;  %s8296_s24 = smov 8  }
   0xf   : > { %234 = vst.msk [vmem:[#allocation2 + $0x18] sm:$0xf] %vm226_vm0, %v8295_v0  ;;  %235 = vst.msk [vmem:[#allocation2 + $0x1c] sm:$0xf] %vm226_vm0, %v8295_v0  ;;  %s8516_s23 = scalar_lea.vmem %s11084_s0, %s7206_s20  ;;  %vm1226_vm4 = vsmask.f32 7424 }
  0x10   : > { %236 = vst.msk [vmem:[#allocation2 + $0x20] sm:$0x1] %vm229_vm1, %v8295_v0  ;;  %239 = vst.msk [vmem:[#allocation2 + $0x2c] sm:$0x1] %vm229_vm1, %v8295_v0  ;;  %v338_v1 = vld [vmem:[%s8516_s23 + $0x10] sm:$0xff]  ;;  %v339_v2 = vld [vmem:[%s8516_s23 + $0x18] sm:$0xff] }
  0x11   : > { %237 = vst.msk [vmem:[#allocation2 + $0x24] sm:$0xf] %vm226_vm0, %v8295_v0  ;;  %238 = vst.msk [vmem:[#allocation2 + $0x28] sm:$0xf] %vm226_vm0, %v8295_v0  ;;  %vm789_vm5 = vsmask.f32 7938  ;;  %v7210_v6 = vpack.c.bf16 %v338_v1, %v338_v1  ;;  %v7211_v7 = vpack.c.bf16 %v339_v2, %v339_v2 }
  0x12   : > { %240 = vst.msk [vmem:[#allocation2 + $0x30] sm:$0xf] %vm226_vm0, %v8295_v0  ;;  %241 = vst.msk [vmem:[#allocation2 + $0x34] sm:$0xf] %vm226_vm0, %v8295_v0  ;;  %v336_v3 = vld [vmem:[%s8516_s23] sm:$0xff]  ;;  %v337_v16 = vld [vmem:[%s8516_s23 + $0x8] sm:$0xff] }
  0x13   : > { %242 = vst.msk [vmem:[#allocation2 + $0x38] sm:$0x1] %vm229_vm1, %v8295_v0  ;;  %245 = vst.msk [vmem:[#allocation2 + $0x44] sm:$0x1] %vm229_vm1, %v8295_v0  ;;  %v906_v4 = vld [vmem:[#allocation2 + $0x4] sm:$0xf]  ;;  %v7208_v11 = vpack.c.bf16 %v336_v3, %v336_v3  ;;  %v7209_v30 = vpack.c.bf16 %v337_v16, %v337_v16 }
  0x14   : > { %243 = vst.msk [vmem:[#allocation2 + $0x3c] sm:$0xf] %vm226_vm0, %v8295_v0  ;;  %244 = vst.msk [vmem:[#allocation2 + $0x40] sm:$0xf] %vm226_vm0, %v8295_v0  ;;  %v953_v5 = vld [vmem:[#allocation2] sm:$0xe] }
  0x15   : > { %246 = vst.msk [vmem:[#allocation2 + $0x48] sm:$0xf] %vm226_vm0, %v8295_v0  ;;  %247 = vst.msk [vmem:[#allocation2 + $0x4c] sm:$0xf] %vm226_vm0, %v8295_v0  ;;  %v6823_v9 = vcombine.low %v953_v5, %v906_v4  ;;  %v905_v10 = vld [vmem:[#allocation2] sm:$0xf] }
  0x16   : > { %248 = vst.msk [vmem:[#allocation2 + $0x50] sm:$0x1] %vm229_vm1, %v8295_v0  ;;  %251 = vst.msk [vmem:[#allocation2 + $0x5c] sm:$0x1] %vm229_vm1, %v8295_v0  ;;  %v8521_v12 = vcombine.low %v905_v10, %v906_v4  ;;  %v485_v13 = vshrl.u32 %v7210_v6, 16  ;;  %v488_v14 = vshll.u32 %v7210_v6, 16 }
  0x17   : > { %249 = vst.msk [vmem:[#allocation2 + $0x54] sm:$0xf] %vm226_vm0, %v8295_v0  ;;  %250 = vst.msk [vmem:[#allocation2 + $0x58] sm:$0xf] %vm226_vm0, %v8295_v0  ;;  %v493_v15 = vshrl.u32 %v7211_v7, 16  ;;  %v1500_v17 = vrot.slane %v6823_v9, 1 }
  0x18   : > { %252 = vst.msk [vmem:[#allocation2 + $0x60] sm:$0xf] %vm226_vm0, %v8295_v0  ;;  %253 = vst.msk [vmem:[#allocation2 + $0x64] sm:$0xf] %vm226_vm0, %v8295_v0  ;;  %v496_v20 = vshll.u32 %v7211_v7, 16  ;;  %v1228_v21 = vshrl.u32 %v8521_v12, 16 }
  0x19   : > { %254 = vst.msk [vmem:[#allocation2 + $0x68] sm:$0x1] %vm229_vm1, %v8295_v0  ;;  %257 = vst.msk [vmem:[#allocation2 + $0x74] sm:$0x1] %vm229_vm1, %v8295_v0  ;;  %v1230_v22 = vshll.u32 %v8521_v12, 16  ;;  %v487_v24 = vrot.slane %v485_v13, 7 }
  0x1a   : > { %255 = vst.msk [vmem:[#allocation2 + $0x6c] sm:$0xf] %vm226_vm0, %v8295_v0  ;;  %256 = vst.msk [vmem:[#allocation2 + $0x70] sm:$0xf] %vm226_vm0, %v8295_v0  ;;  %v495_v25 = vrot.slane %v493_v15, 7  ;;  %v468_v31 = vshrl.u32 %v7208_v11, 16 }
  0x1b   : > { %258 = vst.msk [vmem:[#allocation2 + $0x78] sm:$0xf] %vm226_vm0, %v8295_v0  ;;  %259 = vst.msk [vmem:[#allocation2 + $0x7c] sm:$0xf] %vm226_vm0, %v8295_v0  ;;  %v800_v29 = vld [vmem:[#allocation2 + $0x18] sm:$0xf]  ;;  %v490_v34 = vor.u32 %v488_v14, %v487_v24 }
  0x1c   : > { %260 = vst.msk [vmem:[#allocation2 + $0x80] sm:$0x1] %vm229_vm1, %v8295_v0  ;;  %263 = vst.msk [vmem:[#allocation2 + $0x8c] sm:$0x1] %vm229_vm1, %v8295_v0  ;;  %v340_v32 = vld [vmem:[%s8516_s23 + $0x20] sm:$0xff]  ;;  %v1232_v33 = vrot.slane %v1230_v22, 1  ;;  %v498_v36 = vor.u32 %v496_v20, %v495_v25 }
  0x1d   : > { %261 = vst.msk [vmem:[#allocation2 + $0x84] sm:$0xf] %vm226_vm0, %v8295_v0  ;;  %262 = vst.msk [vmem:[#allocation2 + $0x88] sm:$0xf] %vm226_vm0, %v8295_v0  ;;  %v491_v35 = vrot.slane %v487_v24, 4  ;;  %v341_v37 = vld [vmem:[%s8516_s23 + $0x28] sm:$0xff]  ;;  %v7212_v46 = vpack.c.bf16 %v340_v32, %v340_v32 }
  0x1e   : > { %264 = vst.msk [vmem:[#allocation2 + $0x90] sm:$0xf] %vm226_vm0, %v8295_v0  ;;  %265 = vst.msk [vmem:[#allocation2 + $0x94] sm:$0xf] %vm226_vm0, %v8295_v0  ;;  %v470_v38 = vrot.slane %v468_v31, 7  ;;  %v471_v39 = vshll.u32 %v7208_v11, 16  ;;  %v1233_v42 = vor.u32 %v1232_v33, %v1228_v21  ;;  %v7213_v50 = vpack.c.bf16 %v341_v37, %v341_v37 }
  0x1f   : > { %266 = vst.msk [vmem:[#allocation2 + $0x98] sm:$0x1] %vm229_vm1, %v8295_v0  ;;  %269 = vst.msk [vmem:[#allocation2 + $0xa4] sm:$0x1] %vm229_vm1, %v8295_v0  ;;  %v476_v40 = vshrl.u32 %v7209_v30, 16  ;;  %v479_v41 = vshll.u32 %v7209_v30, 16 }
  0x20   : > { %267 = vst.msk [vmem:[#allocation2 + $0x9c] sm:$0xf] %vm226_vm0, %v8295_v0  ;;  %268 = vst.msk [vmem:[#allocation2 + $0xa0] sm:$0xf] %vm226_vm0, %v8295_v0  ;;  %v791_v45 = vld [vmem:[#allocation2 + $0xc] sm:$0xf]  ;;  %v473_v47 = vor.u32 %v471_v39, %v470_v38 }
  0x21   : > { %270 = vst.msk [vmem:[#allocation2 + $0xa8] sm:$0xf] %vm226_vm0, %v8295_v0  ;;  %271 = vst.msk [vmem:[#allocation2 + $0xac] sm:$0xf] %vm226_vm0, %v8295_v0  ;;  %v474_v48 = vrot.slane %v470_v38, 4  ;;  %v478_v49 = vrot.slane %v476_v40, 7 }
  0x22   : > { %272 = vst.msk [vmem:[#allocation2 + $0xb0] sm:$0x1] %vm229_vm1, %v8295_v0  ;;  %275 = vst.msk [vmem:[#allocation2 + $0xbc] sm:$0x1] %vm229_vm1, %v8295_v0  ;;  %v804_v51 = vld [vmem:[#allocation2 + $0x20] sm:$0x1] }
  0x23   : > { %273 = vst.msk [vmem:[#allocation2 + $0xb4] sm:$0xf] %vm226_vm0, %v8295_v0  ;;  %274 = vst.msk [vmem:[#allocation2 + $0xb8] sm:$0xf] %vm226_vm0, %v8295_v0  ;;  %v502_v53 = vshrl.u32 %v7212_v46, 16  ;;  %v505_v54 = vshll.u32 %v7212_v46, 16  ;;  %v481_v56 = vor.u32 %v479_v41, %v478_v49 }
  0x24   : > { %276 = vst.msk [vmem:[#allocation2 + $0xc0] sm:$0xf] %vm226_vm0, %v8295_v0  ;;  %277 = vst.msk [vmem:[#allocation2 + $0xc4] sm:$0xf] %vm226_vm0, %v8295_v0  ;;  %v500_v55 = vrot.slane %v495_v25, 4  ;;  %s8297_s25 = smov 4  }
  0x25   : > { %278 = vst.msk [vmem:[#allocation2 + $0xc8] sm:$0x1] %vm229_vm1, %v8295_v0  ;;  %281 = vst.msk [vmem:[#allocation2 + $0xd4] sm:$0x1] %vm229_vm1, %v8295_v0  ;;  %v510_v58 = vshrl.u32 %v7213_v50, 16  ;;  %v513_v59 = vshll.u32 %v7213_v50, 16 }
  0x26   : > { %279 = vst.msk [vmem:[#allocation2 + $0xcc] sm:$0xf] %vm226_vm0, %v8295_v0  ;;  %280 = vst.msk [vmem:[#allocation2 + $0xd0] sm:$0xf] %vm226_vm0, %v8295_v0  ;;  %v797_v61 = vld [vmem:[#allocation2 + $0x14] sm:$0x1] }
  0x27   : > { %282 = vst [vmem:[#allocation3] sm:$0xf] %v8295_v0  ;;  %283 = vst [vmem:[#allocation3 + $0x4] sm:$0xf] %v8295_v0  ;;  %v342_v62 = vld [vmem:[%s8516_s23 + $0x30] sm:$0xff]  ;;  %v504_v63 = vrot.slane %v502_v53, 7 }
  0x28   : > { %284 = vst [vmem:[#allocation3 + $0x8] sm:$0x1] %v8295_v0  ;;  %285 = vst [vmem:[#allocation3 + $0xc] sm:$0xf] %v8295_v0  ;;  %v343_v2 = vld [vmem:[%s8516_s23 + $0x38] sm:$0xff]  ;;  %v512_v4 = vrot.slane %v510_v58, 7  ;;  %v8566_v10 = vpack.c.bf16 %v342_v62, %v342_v62 }
  0x29   : > { %286 = vst [vmem:[#allocation3 + $0x10] sm:$0xf] %v8295_v0  ;;  %287 = vst [vmem:[#allocation3 + $0x14] sm:$0x1] %v8295_v0  ;;  %v807_v5 = vld [vmem:[#allocation2 + $0x24] sm:$0xf]  ;;  %v507_v6 = vor.u32 %v505_v54, %v504_v63  ;;  %v8568_v14 = vpack.c.bf16 %v343_v2, %v343_v2 }
  0x2a   : > { %288 = vst [vmem:[#allocation3 + $0x18] sm:$0xf] %v8295_v0  ;;  %289 = vst [vmem:[#allocation3 + $0x1c] sm:$0xf] %v8295_v0  ;;  %v508_v7 = vrot.slane %v504_v63, 4  ;;  %v515_v11 = vor.u32 %v513_v59, %v512_v4  ;;  %v517_v13 = vrot.slane %v512_v4, 4 }
  0x2b   : > { %290 = vst [vmem:[#allocation3 + $0x20] sm:$0x1] %v8295_v0  ;;  %291 = vst [vmem:[#allocation3 + $0x24] sm:$0xf] %v8295_v0  ;;  %v811_v9 = vld [vmem:[#allocation2 + $0x2c] sm:$0x1] }
  0x2c   : > { %292 = vst [vmem:[#allocation3 + $0x28] sm:$0xf] %v8295_v0  ;;  %293 = vst [vmem:[#allocation3 + $0x2c] sm:$0x1] %v8295_v0  ;;  %s8298_s26 = smov 12   ;;  %v522_v31 = vshll.u32 %v8566_v10, 16 }
  0x2d   : > { %294 = vst [vmem:[#allocation3 + $0x30] sm:$0xf] %v8295_v0  ;;  %295 = vst [vmem:[#allocation3 + $0x34] sm:$0xf] %v8295_v0  ;;  %v527_v32 = vshrl.u32 %v8568_v14, 16  ;;  %v344_v62 = vld [vmem:[%s8516_s23 + $0x40] sm:$0xff] }
  0x2e   : > { %296 = vst [vmem:[#allocation3 + $0x38] sm:$0x1] %v8295_v0  ;;  %297 = vst [vmem:[#allocation3 + $0x3c] sm:$0xf] %v8295_v0  ;;  %s8299_s27 = smov 24   ;;  %s8300_s28 = smov 20  }
  0x2f   : > { %298 = vst [vmem:[#allocation3 + $0x40] sm:$0xf] %v8295_v0  ;;  %299 = vst [vmem:[#allocation3 + $0x44] sm:$0x1] %v8295_v0  ;;  %s8301_s29 = smov 32   ;;  %s8302_s30 = smov 16  }
  0x30   : > { %300 = vst [vmem:[#allocation3 + $0x48] sm:$0xf] %v8295_v0  ;;  %301 = vst [vmem:[#allocation3 + $0x4c] sm:$0xf] %v8295_v0  ;;  %s8303_s6 = smov 28   ;;  %vm2928_vm10 = vcmask 1041408  }
  0x31   : > { %302 = vst [vmem:[#allocation3 + $0x50] sm:$0x1] %v8295_v0  ;;  %303 = vst [vmem:[#allocation3 + $0x54] sm:$0xf] %v8295_v0  ;;  %vm2604_vm11 = vcmask 31744   ;;  %vm2637_vm12 = vcmask 64512  }
  0x32   : > { %304 = vst [vmem:[#allocation3 + $0x58] sm:$0xf] %v8295_v0  ;;  %305 = vst [vmem:[#allocation3 + $0x5c] sm:$0x1] %v8295_v0  ;;  %vm2670_vm13 = vcmask 97280   ;;  %vm2703_vm14 = vcmask 130048  }
  0x33   : > { %306 = vst [vmem:[#allocation3 + $0x60] sm:$0xf] %v8295_v0  ;;  %307 = vst [vmem:[#allocation3 + $0x64] sm:$0xf] %v8295_v0  ;;  %vm2736_vm15 = vcmask 162816  }
  0x34   : > { %308 = vst [vmem:[#allocation3 + $0x68] sm:$0x1] %v8295_v0  ;;  %309 = vst [vmem:[#allocation3 + $0x6c] sm:$0xf] %v8295_v0 }
  0x35   : > { %310 = vst [vmem:[#allocation3 + $0x70] sm:$0xf] %v8295_v0  ;;  %311 = vst [vmem:[#allocation3 + $0x74] sm:$0x1] %v8295_v0 }
  0x36   : > { %312 = vst [vmem:[#allocation3 + $0x78] sm:$0xf] %v8295_v0  ;;  %313 = vst [vmem:[#allocation3 + $0x7c] sm:$0xf] %v8295_v0 }
  0x37   : > { %314 = vst [vmem:[#allocation3 + $0x80] sm:$0x1] %v8295_v0  ;;  %315 = vst [vmem:[#allocation3 + $0x84] sm:$0xf] %v8295_v0 }
  0x38   : > { %316 = vst [vmem:[#allocation3 + $0x88] sm:$0xf] %v8295_v0  ;;  %317 = vst [vmem:[#allocation3 + $0x8c] sm:$0x1] %v8295_v0 }
  0x39   : > { %318 = vst [vmem:[#allocation3 + $0x90] sm:$0xf] %v8295_v0  ;;  %319 = vst [vmem:[#allocation3 + $0x94] sm:$0xf] %v8295_v0 }
  0x3a   : > { %320 = vst [vmem:[#allocation3 + $0x98] sm:$0x1] %v8295_v0  ;;  %321 = vst [vmem:[#allocation3 + $0x9c] sm:$0xf] %v8295_v0 }
  0x3b   : > { %322 = vst [vmem:[#allocation3 + $0xa0] sm:$0xf] %v8295_v0  ;;  %323 = vst [vmem:[#allocation3 + $0xa4] sm:$0x1] %v8295_v0 }
  0x3c   : > { %324 = vst [vmem:[#allocation3 + $0xa8] sm:$0xf] %v8295_v0  ;;  %325 = vst [vmem:[#allocation3 + $0xac] sm:$0xf] %v8295_v0 }
  0x3d   : > { %326 = vst [vmem:[#allocation3 + $0xb0] sm:$0x1] %v8295_v0  ;;  %327 = vst [vmem:[#allocation3 + $0xb4] sm:$0xf] %v8295_v0 }
  0x3e   : > { %328 = vst [vmem:[#allocation3 + $0xb8] sm:$0xf] %v8295_v0  ;;  %329 = vst [vmem:[#allocation3 + $0xbc] sm:$0x1] %v8295_v0 }
  0x3f   : > { %330 = vst [vmem:[#allocation3 + $0xc0] sm:$0xf] %v8295_v0  ;;  %331 = vst [vmem:[#allocation3 + $0xc4] sm:$0xf] %v8295_v0 }
  0x40   : > { %332 = vst [vmem:[#allocation3 + $0xc8] sm:$0x1] %v8295_v0  ;;  %333 = vst [vmem:[#allocation3 + $0xcc] sm:$0xf] %v8295_v0 }
  0x41   : > { %334 = vst [vmem:[#allocation3 + $0xd0] sm:$0xf] %v8295_v0  ;;  %335 = vst [vmem:[#allocation3 + $0xd4] sm:$0x1] %v8295_v0  ;;  %v483_v0 = vrot.slane %v478_v49, 4 }
  0x42   : > { %v7883_v8 = vld [vmem:[#allocation2 + $0x8] ss:$0 sps:$4 sm:$0x11]   ;;  %vm8528_vm7 = vmor %vm11090_vm2, %vm465_vm3  ;;  %vm2802_vm3 = vcmask 228352  }
  0x43   : > { %v1501_v18 = vrot.slane %v7883_v8, 1  ;;  %v1235_v19 = vshll.u32 %v7883_v8, 16  ;;  %vm8535_vm8 = vmand %vm226_vm0, %vm789_vm5  ;;  %v499_v43 = vsel %vm8528_vm7, %v491_v35, %v498_v36  ;;  %v482_v3 = vsel %vm8528_vm7, %v474_v48, %v481_v56 }
  0x44   : > { %v801_v44 = vsel %vm8535_vm8, %v490_v34, %v800_v29  ;;  %803 = vst.msk [vmem:[#allocation2 + $0x1c] sm:$0xf] %vm226_vm0, %v499_v43  ;;  %v792_v57 = vsel %vm8535_vm8, %v473_v47, %v791_v45  ;;  %vm8553_vm9 = vmand %vm229_vm1, %vm11090_vm2  ;;  %v516_v21 = vsel %vm8528_vm7, %v508_v7, %v515_v11  ;;  %vm2769_vm1 = vcmask 195584  }
  0x45   : > { %v1502_v26 = vsel %vm1499_vm6, %v1500_v17, %v1501_v18  ;;  %v1237_v27 = vrot.slane %v1235_v19, 1  ;;  %802 = vst [vmem:[#allocation2 + $0x18] sm:$0xf] %v801_v44  ;;  %793 = vst [vmem:[#allocation2 + $0xc] sm:$0xf] %v792_v57  ;;  %v805_v1 = vsel %vm8553_vm9, %v500_v55, %v804_v51  ;;  %v798_v8 = vsel %vm8553_vm9, %v483_v0, %v797_v61 }
  0x46   : > { %1548 = vrot.lane.b32.xlu1 %v1502_v26, %s8296_s24  ;;  %806 = vst [vmem:[#allocation2 + $0x20] sm:$0x1] %v805_v1  ;;  %794 = vst.msk [vmem:[#allocation2 + $0x10] sm:$0xf] %vm226_vm0, %v482_v3  ;;  %v808_v18 = vsel %vm8535_vm8, %v507_v6, %v807_v5  ;;  %v812_v24 = vsel %vm8553_vm9, %v517_v13, %v811_v9  ;;  %v345_v13 = vld [vmem:[%s8516_s23 + $0x48] sm:$0xff]  ;;  %vm2895_vm2 = vcmask 293888  }
  0x47   : > { %v1238_v52 = vsel %vm1226_vm4, %v1233_v42, %v1237_v27  ;;  %799 = vst [vmem:[#allocation2 + $0x14] sm:$0x1] %v798_v8  ;;  %809 = vst [vmem:[#allocation2 + $0x24] sm:$0xf] %v808_v18  ;;  %v519_v27 = vshrl.u32 %v8566_v10, 16 }
  0x48   : > { %1419 = vrot.lane.b32.xlu0 %v1238_v52, %s8297_s25  ;;  %810 = vst.msk [vmem:[#allocation2 + $0x28] sm:$0xf] %vm226_vm0, %v516_v21  ;;  %813 = vst [vmem:[#allocation2 + $0x2c] sm:$0x1] %v812_v24  ;;  %v346_v21 = vld [vmem:[%s8516_s23 + $0x50] sm:$0xff] }
  0x4b   : > { %v972_v16 = vld [vmem:[#allocation2 + $0x1c] sm:$0xf] }
  0x4c   : > { %v971_v15 = vld [vmem:[#allocation2 + $0x18] sm:$0xf]  ;;  %v1035_v26 = vld [vmem:[#allocation2 + $0x1c] sm:$0xf]  ;;  %v969_v29 = vld [vmem:[#allocation2 + $0xc] sm:$0xf] }
  0x4d   : > { %v1018_v17 = vld [vmem:[#allocation2 + $0x18] sm:$0xe]  ;;  %v8572_v19 = vcombine.low %v971_v15, %v972_v16  ;;  %v1017_v30 = vld [vmem:[#allocation2 + $0xc] sm:$0xe]  ;;  %v970_v38 = vld [vmem:[#allocation2 + $0x10] sm:$0xf] }
  0x4e   : > { %v6872_v20 = vcombine.low %v1018_v17, %v972_v16  ;;  %v1082_v22 = vld [vmem:[#allocation2 + $0x18] sm:$0xe]  ;;  %v954_v35 = vld [vmem:[#allocation2 + $0xc] sm:$0xe]  ;;  %v908_v40 = vld [vmem:[#allocation2 + $0x10] sm:$0xf]  ;;  %v8587_v41 = vcombine.low %v969_v29, %v970_v38  ;;  %v6871_v42 = vcombine.low %v1017_v30, %v970_v38 }
  0x4f   : > { %v1034_v25 = vld [vmem:[#allocation2 + $0x18] sm:$0xf]  ;;  %1662 = vrot.lane.b32.xlu1 %v8572_v19, %s8298_s26  ;;  %v1755_v33 = vshll.u32 %v8572_v19, 16  ;;  %v6919_v34 = vcombine.low %v1082_v22, %v1035_v26  ;;  %v907_v36 = vld [vmem:[#allocation2 + $0xc] sm:$0xf]  ;;  %v6824_v44 = vcombine.low %v954_v35, %v908_v40  ;;  %v1753_v5 = vshrl.u32 %v8572_v19, 16 }
  0x50   : > { %v2015_v37 = vrot.slane %v6872_v20, 1  ;;  %v8585_v39 = vcombine.low %v1034_v25, %v1035_v26  ;;  %v8589_v43 = vld [vmem:[#allocation2 + $0x14] ss:$0 sps:$4 sm:$0x11]   ;;  %v8591_v45 = vcombine.low %v907_v36, %v908_v40  ;;  %1660 = vrot.lane.b32.xlu0 %v8587_v41, %s8298_s26  ;;  %v1036_v48 = vld [vmem:[#allocation2 + $0x24] sm:$0xf]  ;;  %v8619_v25 = vpack.c.bf16 %v344_v62, %v344_v62 }
  0x51   : > { %v7895_v47 = vld [vmem:[#allocation2 + $0x14] ss:$0 sps:$4 sm:$0x11]   ;;  %v1083_v49 = vld [vmem:[#allocation2 + $0x24] sm:$0xe]  ;;  %v2012_v50 = vrot.slane %v6871_v42, 1 }
  0x52   : > { %v2255_v46 = vshll.u32 %v8585_v39, 16  ;;  %v2524_v51 = vrot.slane %v6919_v34, 1  ;;  %v1743_v52 = vshll.u32 %v8587_v41, 16  ;;  %v1037_v53 = vld [vmem:[#allocation2 + $0x28] sm:$0xf]  ;;  %v2013_v54 = vrot.slane %v8589_v43, 1 }
  0x53   : > { %v1503_v55 = vrot.slane %v6824_v44, 1  ;;  %v1504_v56 = vrot.slane %v7895_v47, 1  ;;  %v8598_v57 = vcombine.low %v1036_v48, %v1037_v53  ;;  %v6920_v58 = vcombine.low %v1083_v49, %v1037_v53  ;;  %v8600_v59 = vld [vmem:[#allocation2 + $0x20] ss:$0 sps:$4 sm:$0x11]  }
  0x54   : > { %v1242_v61 = vshll.u32 %v8591_v45, 16  ;;  %v7899_v63 = vld [vmem:[#allocation2 + $0x20] ss:$0 sps:$4 sm:$0x11]   ;;  %v1247_v0 = vshll.u32 %v7895_v47, 16  ;;  %2172 = vrot.lane.b32.xlu0 %v8585_v39, %s8299_s27  ;;  %v2014_v1 = vsel %vm1499_vm6, %v2012_v50, %v2013_v54  ;;  %v2525_v2 = vrot.slane %v8600_v59, 1 }
  0x55   : > { %2174 = vrot.lane.b32.xlu1 %v8598_v57, %s8299_s27  ;;  %v7900_v3 = vld [vmem:[#allocation2 + $0x2c] ss:$0 sps:$4 sm:$0x11]   ;;  %v1240_v4 = vshrl.u32 %v8591_v45, 16  ;;  %v1505_v6 = vsel %vm1499_vm6, %v1503_v55, %v1504_v56  ;;  %v2016_v7 = vrot.slane %v7899_v63, 1  ;;  %v1757_v9 = vrot.slane %v1755_v33, 1 }
  0x56   : > { %v1244_v8 = vrot.slane %v1242_v61, 1  ;;  %v909_v11 = vld [vmem:[#allocation2 + $0x18] sm:$0xf]  ;;  %v2267_v15 = vshll.u32 %v8598_v57, 16  ;;  %v2527_v16 = vrot.slane %v6920_v58, 1  ;;  %v1249_v17 = vrot.slane %v1247_v0, 1 }
  0x57   : > { %v1760_v18 = vshll.u32 %v7899_v63, 16  ;;  %v8615_v20 = vld [vmem:[#allocation2 + $0x1c] sm:$0xf]  ;;  %v1741_v22 = vshrl.u32 %v8587_v41, 16  ;;  %v1745_v24 = vrot.slane %v1743_v52, 1  ;;  %v2526_v26 = vsel %vm1499_vm6, %v2524_v51, %v2525_v2 }
  0x58   : > { %v911_v19 = vld [vmem:[#allocation2 + $0x24] sm:$0xf]  ;;  %2060 = vrot.lane.b32.xlu0 %v2014_v1, %s8300_s28  ;;  %v2528_v29 = vrot.slane %v7900_v3, 1  ;;  %v1748_v30 = vshll.u32 %v8589_v43, 16  ;;  %v912_v33 = vld [vmem:[#allocation2 + $0x28] sm:$0xf]  ;;  %v8625_v34 = vpack.c.bf16 %v345_v13, %v345_v13  ;;  %v2017_v35 = vsel %vm1499_vm6, %v2015_v37, %v2016_v7 }
  0x59   : > { %1550 = vrot.lane.b32.xlu1 %v1505_v6, %s8296_s24  ;;  %v1245_v36 = vor.u32 %v1244_v8, %v1240_v4  ;;  %v1758_v38 = vor.u32 %v1757_v9, %v1753_v5  ;;  %v1762_v40 = vrot.slane %v1760_v18, 1  ;;  %v347_v41 = vld [vmem:[%s8516_s23 + $0x58] sm:$0xff]  ;;  %v2265_v42 = vshrl.u32 %v8598_v57, 16  ;;  %v8630_v48 = vld [vmem:[#allocation2 + $0x2c] ss:$0 sps:$4 sm:$0x11]  }
  0x5a   : > { %v2269_v44 = vrot.slane %v2267_v15, 1  ;;  %v2272_v47 = vshll.u32 %v7900_v3, 16  ;;  %v8633_v49 = vcombine.low %v909_v11, %v8615_v20  ;;  %v1746_v50 = vor.u32 %v1745_v24, %v1741_v22  ;;  %v8637_v52 = vld [vmem:[#allocation2 + $0x20] ss:$0 sps:$4 sm:$0x11]  }
  0x5b   : > { %v1750_v43 = vrot.slane %v1748_v30, 1  ;;  %v8635_v51 = vcombine.low %v911_v19, %v912_v33  ;;  %v956_v37 = vld [vmem:[#allocation2 + $0x24] sm:$0xe]  ;;  %v8639_v53 = vpack.c.bf16 %v346_v21, %v346_v21  ;;  %v2529_v54 = vsel %vm1499_vm6, %v2527_v16, %v2528_v29  ;;  %v955_v6 = vld [vmem:[#allocation2 + $0x18] sm:$0xe] }
  0x5c   : > { %2572 = vrot.lane.b32.xlu0 %v2526_v26, %s8301_s29  ;;  %v2253_v55 = vshrl.u32 %v8585_v39, 16  ;;  %v2257_v56 = vrot.slane %v2255_v46, 1  ;;  %v8647_v57 = vpack.c.bf16 %v347_v41, %v347_v41  ;;  %v1250_v58 = vsel %vm1226_vm4, %v1245_v36, %v1249_v17  ;;  %v814_v11 = vld [vmem:[#allocation2 + $0x30] sm:$0xf]  ;;  %v973_v13 = vld [vmem:[#allocation2 + $0x24] sm:$0xf] }
  0x5d   : > { %2062 = vrot.lane.b32.xlu1 %v2017_v35, %s8300_s28  ;;  %v1763_v61 = vsel %vm1226_vm4, %v1758_v38, %v1762_v40  ;;  %v2260_v62 = vshll.u32 %v8600_v59, 16  ;;  %v1266_v63 = vshll.u32 %v8635_v51, 16  ;;  %v2270_v0 = vor.u32 %v2269_v44, %v2265_v42  ;;  %v8666_v21 = vld [vmem:[#allocation2 + $0x28] sm:$0xf]  ;;  %v818_v22 = vld [vmem:[#allocation2 + $0x38] sm:$0x1] }
  0x5e   : > { %v1271_v1 = vshll.u32 %v8630_v48, 16  ;;  %v1254_v2 = vshll.u32 %v8633_v49, 16  ;;  %v6826_v3 = vcombine.low %v956_v37, %v912_v33  ;;  %v1751_v4 = vsel %vm1226_vm4, %v1746_v50, %v1750_v43  ;;  %v8683_v41 = vld [vmem:[#allocation2 + $0x2c] ss:$0 sps:$4 sm:$0x11]  }
  0x5f   : > { %v2274_v39 = vrot.slane %v2272_v47, 1  ;;  %v1264_v46 = vshrl.u32 %v8635_v51, 16  ;;  %v1268_v5 = vrot.slane %v1266_v63, 1  ;;  %v2258_v59 = vor.u32 %v2257_v56, %v2253_v55 }
  0x60   : > { %1421 = vrot.lane.b32.xlu0 %v1250_v58, %s8297_s25  ;;  %v1252_v7 = vshrl.u32 %v8633_v49, 16  ;;  %v1256_v8 = vrot.slane %v1254_v2, 1  ;;  %v1259_v9 = vshll.u32 %v8637_v52, 16  ;;  %v2262_v15 = vrot.slane %v2260_v62, 1  ;;  %v821_v58 = vld [vmem:[#allocation2 + $0x3c] sm:$0xf] }
  0x61   : > { %2574 = vrot.lane.b32.xlu1 %v2529_v54, %s8301_s29  ;;  %v521_v16 = vrot.slane %v519_v27, 7  ;;  %v529_v17 = vrot.slane %v527_v32, 7  ;;  %v530_v18 = vshll.u32 %v8568_v14, 16  ;;  %v1273_v24 = vrot.slane %v1271_v1, 1  ;;  %v828_v2 = vld [vmem:[#allocation2 + $0x48] sm:$0xf] }
  0x62   : > { %v1509_v19 = vrot.slane %v6826_v3, 1  ;;  %v1510_v26 = vrot.slane %v8630_v48, 1  ;;  %v6825_v29 = vcombine.low %v955_v6, %v8615_v20  ;;  %v1269_v30 = vor.u32 %v1268_v5, %v1264_v46  ;;  %v1019_v3 = vld [vmem:[#allocation2 + $0x24] sm:$0xe] }
  0x63   : > { %v524_v33 = vor.u32 %v522_v31, %v521_v16  ;;  %v525_v35 = vrot.slane %v521_v16, 4  ;;  %v532_v27 = vor.u32 %v530_v18, %v529_v17  ;;  %v1257_v14 = vor.u32 %v1256_v8, %v1252_v7 }
  0x64   : > { %1932 = vrot.lane.b32.xlu0 %v1751_v4, %s8302_s30  ;;  %v1261_v32 = vrot.slane %v1259_v9, 1  ;;  %v8675_v36 = vcombine.low %v973_v13, %v8666_v21  ;;  %v534_v38 = vrot.slane %v529_v17, 4  ;;  %v2275_v40 = vsel %vm1226_vm4, %v2270_v0, %v2274_v39 }
  0x65   : > { %1934 = vrot.lane.b32.xlu1 %v1763_v61, %s8302_s30  ;;  %v2263_v20 = vsel %vm1226_vm4, %v2258_v59, %v2262_v15  ;;  %v533_v10 = vsel %vm8528_vm7, %v525_v35, %v532_v27  ;;  %v815_v31 = vsel %vm8535_vm8, %v524_v33, %v814_v11  ;;  %v1511_v42 = vsel %vm1499_vm6, %v1509_v19, %v1510_v26  ;;  %v825_v61 = vld [vmem:[#allocation2 + $0x44] sm:$0x1] }
  0x66   : > { %v1506_v44 = vrot.slane %v6825_v29, 1  ;;  %v1507_v47 = vrot.slane %v8637_v52, 1  ;;  %816 = vst [vmem:[#allocation2 + $0x30] sm:$0xf] %v815_v31  ;;  %817 = vst.msk [vmem:[#allocation2 + $0x34] sm:$0xf] %vm226_vm0, %v533_v10  ;;  %v819_v48 = vsel %vm8553_vm9, %v534_v38, %v818_v22  ;;  %v1274_v50 = vsel %vm1226_vm4, %v1269_v30, %v1273_v24 }
  0x67   : > { %820 = vst [vmem:[#allocation2 + $0x38] sm:$0x1] %v819_v48  ;;  %v536_v43 = vshrl.u32 %v8619_v25, 16  ;;  %v539_v37 = vshll.u32 %v8619_v25, 16  ;;  %v544_v54 = vshrl.u32 %v8625_v34, 16  ;;  %v1262_v52 = vsel %vm1226_vm4, %v1257_v14, %v1261_v32 }
  0x68   : > { %2444 = vrot.lane.b32.xlu0 %v2263_v20, %s8303_s6  ;;  %v1767_v55 = vshll.u32 %v8675_v36, 16  ;;  %v547_v56 = vshll.u32 %v8625_v34, 16  ;;  %v553_v62 = vshrl.u32 %v8639_v53, 16  ;;  %v556_v25 = vshll.u32 %v8639_v53, 16 }
  0x69   : > { %2446 = vrot.lane.b32.xlu1 %v2275_v40, %s8303_s6  ;;  %v538_v63 = vrot.slane %v536_v43, 7  ;;  %v546_v0 = vrot.slane %v544_v54, 7  ;;  %v561_v1 = vshrl.u32 %v8647_v57, 16  ;;  %v1765_v4 = vshrl.u32 %v8675_v36, 16 }
  0x6a   : > { %v1772_v39 = vshll.u32 %v8683_v41, 16  ;;  %v555_v46 = vrot.slane %v553_v62, 7  ;;  %v564_v5 = vshll.u32 %v8647_v57, 16  ;;  %v1769_v53 = vrot.slane %v1767_v55, 1  ;;  %v348_v55 = vld [vmem:[%s8516_s23 + $0x60] sm:$0xff] }
  0x6b   : > { %v541_v34 = vor.u32 %v539_v37, %v538_v63  ;;  %v542_v6 = vrot.slane %v538_v63, 4  ;;  %v549_v59 = vor.u32 %v547_v56, %v546_v0  ;;  %v551_v7 = vrot.slane %v546_v0, 4 }
  0x6c   : > { %1423 = vrot.lane.b32.xlu0 %v1262_v52, %s8297_s25  ;;  %v558_v8 = vor.u32 %v556_v25, %v555_v46  ;;  %v559_v9 = vrot.slane %v555_v46, 4  ;;  %v8707_v11 = vrot.slane %v561_v1, 7  ;;  %v1508_v13 = vsel %vm1499_vm6, %v1506_v44, %v1507_v47 }
  0x6d   : > { %1425 = vrot.lane.b32.xlu1 %v1274_v50, %s8297_s25  ;;  %v975_v15 = vld [vmem:[#allocation2 + $0x30] sm:$0xf]  ;;  %v976_v16 = vld [vmem:[#allocation2 + $0x34] sm:$0xf]  ;;  %v550_v57 = vsel %vm8528_vm7, %v542_v6, %v549_v59  ;;  %v822_v18 = vsel %vm8535_vm8, %v541_v34, %v821_v58  ;;  %v826_v22 = vsel %vm8553_vm9, %v551_v7, %v825_v61  ;;  %v6873_v19 = vcombine.low %v1019_v3, %v8666_v21 }
  0x6e   : > { %v1020_v17 = vld [vmem:[#allocation2 + $0x30] sm:$0xe]  ;;  %v6842_v24 = vcombine.low %v975_v15, %v976_v16  ;;  %v7911_v26 = vld [vmem:[#allocation2 + $0x38] ss:$0 sps:$4 sm:$0x11]   ;;  %v566_v29 = vor.u32 %v564_v5, %v8707_v11  ;;  %v829_v30 = vsel %vm8535_vm8, %v558_v8, %v828_v2  ;;  %v1770_v38 = vor.u32 %v1769_v53, %v1765_v4 }
  0x6f   : > { %823 = vst [vmem:[#allocation2 + $0x3c] sm:$0xf] %v822_v18  ;;  %824 = vst.msk [vmem:[#allocation2 + $0x40] sm:$0xf] %vm226_vm0, %v550_v57  ;;  %v6874_v33 = vcombine.low %v1020_v17, %v976_v16  ;;  %v1038_v35 = vld [vmem:[#allocation2 + $0x30] sm:$0xf] }
  0x70   : > { %827 = vst [vmem:[#allocation2 + $0x44] sm:$0x1] %v826_v22  ;;  %v8721_v27 = vld [vmem:[#allocation2 + $0x34] sm:$0xf]  ;;  %830 = vst [vmem:[#allocation2 + $0x48] sm:$0xf] %v829_v30  ;;  %1552 = vrot.lane.b32.xlu0 %v1508_v13, %s8296_s24  ;;  %v567_v10 = vsel %vm8528_vm7, %v559_v9, %v566_v29 }
  0x71   : > { %1554 = vrot.lane.b32.xlu1 %v1511_v42, %s8296_s24  ;;  %v1779_v21 = vshll.u32 %v6842_v24, 16  ;;  %v1777_v14 = vshrl.u32 %v6842_v24, 16  ;;  %v1784_v32 = vshll.u32 %v7911_v26, 16  ;;  %v1774_v40 = vrot.slane %v1772_v39, 1  ;;  %831 = vst.msk [vmem:[#allocation2 + $0x4c] sm:$0xf] %vm226_vm0, %v567_v10 }
  0x72   : > { %v8726_v20 = vcombine.low %v1038_v35, %v8721_v27  ;;  %v2018_v47 = vrot.slane %v6873_v19, 1  ;;  %v2021_v42 = vrot.slane %v6874_v33, 1  ;;  %v2022_v48 = vrot.slane %v7911_v26, 1  ;;  %v8732_v43 = vld [vmem:[#allocation2 + $0x38] ss:$0 sps:$4 sm:$0x11]  }
  0x73   : > { %v1781_v31 = vrot.slane %v1779_v21, 1  ;;  %v1786_v44 = vrot.slane %v1784_v32, 1  ;;  %v2019_v50 = vrot.slane %v8683_v41, 1  ;;  %v913_v54 = vld [vmem:[#allocation2 + $0x30] sm:$0xf]  ;;  %v1775_v56 = vsel %vm1226_vm4, %v1770_v38, %v1774_v40  ;;  %v349_v22 = vld [vmem:[%s8516_s23 + $0x68] sm:$0xff] }
  0x74   : > { %1664 = vrot.lane.b32.xlu0 %v8675_v36, %s8298_s26  ;;  %v8737_v52 = vld [vmem:[#allocation2 + $0x34] sm:$0xf]  ;;  %v1084_v62 = vld [vmem:[#allocation2 + $0x30] sm:$0xe]  ;;  %v2279_v63 = vshll.u32 %v8726_v20, 16  ;;  %v2023_v1 = vsel %vm1499_vm6, %v2021_v42, %v2022_v48  ;;  %v8747_v39 = vpack.c.bf16 %v348_v55, %v348_v55  ;;  %v2277_v5 = vshrl.u32 %v8726_v20, 16 }
  0x75   : > { %1666 = vrot.lane.b32.xlu1 %v6842_v24, %s8298_s26  ;;  %v1782_v37 = vor.u32 %v1781_v31, %v1777_v14  ;;  %v2020_v36 = vsel %vm1499_vm6, %v2018_v47, %v2019_v50  ;;  %v2284_v34 = vshll.u32 %v8732_v43, 16  ;;  %v8754_v6 = vcombine.low %v913_v54, %v8737_v52  ;;  %v8762_v17 = vld [vmem:[#allocation2 + $0x38] ss:$0 sps:$4 sm:$0x11]   ;;  %v957_v33 = vld [vmem:[#allocation2 + $0x30] sm:$0xe] }
  0x76   : > { %v1040_v58 = vld [vmem:[#allocation2 + $0x3c] sm:$0xf]  ;;  %v1041_v61 = vld [vmem:[#allocation2 + $0x40] sm:$0xf]  ;;  %v2281_v53 = vrot.slane %v2279_v63, 1  ;;  %v6921_v13 = vcombine.low %v1084_v62, %v8721_v27  ;;  %v570_v24 = vshrl.u32 %v8747_v39, 16  ;;  %v7221_v31 = vpack.c.bf16 %v349_v22, %v349_v22 }
  0x77   : > { %v1787_v41 = vsel %vm1226_vm4, %v1782_v37, %v1786_v44  ;;  %v6890_v0 = vcombine.low %v1040_v58, %v1041_v61  ;;  %v7917_v25 = vld [vmem:[#allocation2 + $0x44] ss:$0 sps:$4 sm:$0x11]   ;;  %v1085_v2 = vld [vmem:[#allocation2 + $0x3c] sm:$0xe]  ;;  %v2286_v57 = vrot.slane %v2284_v34, 1  ;;  %v6827_v42 = vcombine.low %v957_v33, %v8737_v52 }
  0x78   : > { %v915_v3 = vld [vmem:[#allocation2 + $0x3c] sm:$0xf]  ;;  %v8745_v4 = vld [vmem:[#allocation2 + $0x40] sm:$0xf]  ;;  %1936 = vrot.lane.b32.xlu0 %v1775_v56, %s8302_s30  ;;  %v2296_v7 = vshll.u32 %v7917_v25, 16  ;;  %v6922_v9 = vcombine.low %v1085_v2, %v1041_v61  ;;  %v1278_v18 = vshll.u32 %v8754_v6, 16  ;;  %v2282_v29 = vor.u32 %v2281_v53, %v2277_v5 }
  0x79   : > { %1938 = vrot.lane.b32.xlu1 %v1787_v41, %s8302_s30  ;;  %v2291_v46 = vshll.u32 %v6890_v0, 16  ;;  %v2289_v59 = vshrl.u32 %v6890_v0, 16  ;;  %v8757_v8 = vcombine.low %v915_v3, %v8745_v4  ;;  %v8760_v16 = vld [vmem:[#allocation2 + $0x44] ss:$0 sps:$4 sm:$0x11]   ;;  %v2534_v27 = vrot.slane %v7917_v25, 1 }
  0x7a   : > { %v2298_v26 = vrot.slane %v2296_v7, 1  ;;  %v2533_v35 = vrot.slane %v6922_v9, 1  ;;  %v2530_v21 = vrot.slane %v6921_v13, 1  ;;  %v2531_v14 = vrot.slane %v8732_v43, 1  ;;  %v832_v32 = vld [vmem:[#allocation2 + $0x50] sm:$0x1] }
  0x7b   : > { %v2293_v15 = vrot.slane %v2291_v46, 1  ;;  %v1290_v30 = vshll.u32 %v8757_v8, 16  ;;  %v1295_v38 = vshll.u32 %v8760_v16, 16  ;;  %v1283_v40 = vshll.u32 %v8762_v17, 16  ;;  %v958_v10 = vld [vmem:[#allocation2 + $0x3c] sm:$0xe] }
  0x7c   : > { %2064 = vrot.lane.b32.xlu0 %v2020_v36, %s8300_s28  ;;  %v1276_v44 = vshrl.u32 %v8754_v6, 16  ;;  %v1280_v47 = vrot.slane %v1278_v18, 1  ;;  %v568_v48 = vrot.slane %v8707_v11, 4  ;;  %v2287_v43 = vsel %vm1226_vm4, %v2282_v29, %v2286_v57  ;;  %v977_v55 = vld [vmem:[#allocation2 + $0x3c] sm:$0xf]  ;;  %v350_v46 = vld [vmem:[%s8516_s23 + $0x70] sm:$0xff] }
  0x7d   : > { %2066 = vrot.lane.b32.xlu1 %v2023_v1, %s8300_s28  ;;  %v2294_v19 = vor.u32 %v2293_v15, %v2289_v59  ;;  %v1288_v37 = vshrl.u32 %v8757_v8, 16  ;;  %v1292_v54 = vrot.slane %v1290_v30, 1  ;;  %v8782_v56 = vld [vmem:[#allocation2 + $0x40] sm:$0xf]  ;;  %v2532_v58 = vsel %vm1499_vm6, %v2530_v21, %v2531_v14  ;;  %v979_v61 = vld [vmem:[#allocation2 + $0x48] sm:$0xf] }
  0x7e   : > { %v8786_v62 = vld [vmem:[#allocation2 + $0x4c] sm:$0xf]  ;;  %v833_v11 = vsel %vm8553_vm9, %v568_v48, %v832_v32  ;;  %v572_v52 = vrot.slane %v570_v24, 7  ;;  %v2535_v63 = vsel %vm1499_vm6, %v2533_v35, %v2534_v27  ;;  %v1297_v41 = vrot.slane %v1295_v38, 1  ;;  %v351_v53 = vld [vmem:[%s8516_s23 + $0x78] sm:$0xff] }
  0x7f   : > { %v2299_v50 = vsel %vm1226_vm4, %v2294_v19, %v2298_v26  ;;  %v1516_v25 = vrot.slane %v8760_v16, 1  ;;  %834 = vst [vmem:[#allocation2 + $0x50] sm:$0x1] %v833_v11  ;;  %v1281_v1 = vor.u32 %v1280_v47, %v1276_v44  ;;  %v1512_v36 = vrot.slane %v6827_v42, 1  ;;  %v839_v16 = vld [vmem:[#allocation2 + $0x5c] sm:$0x1] }
  0x80   : > { %2176 = vrot.lane.b32.xlu0 %v8726_v20, %s8299_s27  ;;  %v6828_v20 = vcombine.low %v958_v10, %v8745_v4  ;;  %v8795_v2 = vcombine.low %v977_v55, %v8782_v56  ;;  %v573_v3 = vshll.u32 %v8747_v39, 16  ;;  %v835_v4 = vld [vmem:[#allocation2 + $0x54] sm:$0xf]  ;;  %v1293_v5 = vor.u32 %v1292_v54, %v1288_v37  ;;  %v8808_v24 = vld [vmem:[#allocation2 + $0x44] ss:$0 sps:$4 sm:$0x11]  }
  0x81   : > { %2178 = vrot.lane.b32.xlu1 %v6890_v0, %s8299_s27  ;;  %v1285_v0 = vrot.slane %v1283_v40, 1  ;;  %v8800_v34 = vcombine.low %v979_v61, %v8786_v62  ;;  %v578_v59 = vshrl.u32 %v7221_v31, 16  ;;  %v581_v7 = vshll.u32 %v7221_v31, 16  ;;  %v1021_v30 = vld [vmem:[#allocation2 + $0x3c] sm:$0xe] }
  0x82   : > { %v1515_v9 = vrot.slane %v6828_v20, 1  ;;  %v1513_v13 = vrot.slane %v8762_v17, 1  ;;  %v575_v15 = vor.u32 %v573_v3, %v572_v52  ;;  %v576_v57 = vrot.slane %v572_v52, 4  ;;  %v1022_v27 = vld [vmem:[#allocation2 + $0x48] sm:$0xe] }
  0x83   : > { %v580_v18 = vrot.slane %v578_v59, 7  ;;  %v1286_v39 = vsel %vm1226_vm4, %v1281_v1, %v1285_v0  ;;  %v1791_v22 = vshll.u32 %v8795_v2, 16  ;;  %v7222_v26 = vpack.c.bf16 %v350_v46, %v350_v46  ;;  %v1042_v10 = vld [vmem:[#allocation2 + $0x48] sm:$0xf]  ;;  %v8820_v31 = vld [vmem:[#allocation2 + $0x4c] sm:$0xf] }
  0x84   : > { %2448 = vrot.lane.b32.xlu0 %v2287_v43, %s8303_s6  ;;  %v836_v19 = vsel %vm8535_vm8, %v575_v15, %v835_v4  ;;  %v1298_v17 = vsel %vm1226_vm4, %v1293_v5, %v1297_v41  ;;  %v1803_v29 = vshll.u32 %v8800_v34, 16  ;;  %v7223_v14 = vpack.c.bf16 %v351_v53, %v351_v53  ;;  %v8838_v41 = vld [vmem:[#allocation2 + $0x4c] sm:$0xf]  ;;  %v842_v0 = vld [vmem:[#allocation2 + $0x60] sm:$0xf] }
  0x85   : > { %2450 = vrot.lane.b32.xlu1 %v2299_v50, %s8303_s6  ;;  %v583_v33 = vor.u32 %v581_v7, %v580_v18  ;;  %837 = vst [vmem:[#allocation2 + $0x54] sm:$0xf] %v836_v19  ;;  %v585_v35 = vrot.slane %v580_v18, 4  ;;  %v1517_v32 = vsel %vm1499_vm6, %v1515_v9, %v1516_v25  ;;  %v1514_v38 = vsel %vm1499_vm6, %v1512_v36, %v1513_v13  ;;  %v352_v25 = vld [vmem:[%s8516_s23 + $0x80] sm:$0xff] }
  0x86   : > { %v8814_v21 = vld [vmem:[#allocation2 + $0x50] ss:$0 sps:$4 sm:$0x11]   ;;  %v6875_v47 = vcombine.low %v1021_v30, %v8782_v56  ;;  %v1789_v42 = vshrl.u32 %v8795_v2, 16  ;;  %v1793_v48 = vrot.slane %v1791_v22, 1  ;;  %v1796_v50 = vshll.u32 %v8808_v24, 16 }
  0x87   : > { %v584_v40 = vsel %vm8528_vm7, %v576_v57, %v583_v33  ;;  %v840_v44 = vsel %vm8553_vm9, %v585_v35, %v839_v16  ;;  %v1801_v43 = vshrl.u32 %v8800_v34, 16  ;;  %v1805_v37 = vrot.slane %v1803_v29, 1  ;;  %v8842_v59 = vld [vmem:[#allocation2 + $0x50] ss:$0 sps:$4 sm:$0x11]  }
  0x88   : > { %2576 = vrot.lane.b32.xlu0 %v2532_v58, %s8301_s29  ;;  %838 = vst.msk [vmem:[#allocation2 + $0x58] sm:$0xf] %vm226_vm0, %v584_v40  ;;  %841 = vst [vmem:[#allocation2 + $0x5c] sm:$0x1] %v840_v44  ;;  %v1808_v54 = vshll.u32 %v8814_v21, 16  ;;  %v587_v55 = vshrl.u32 %v7222_v26, 16  ;;  %v6876_v20 = vcombine.low %v1022_v27, %v8786_v62  ;;  %v8834_v56 = vcombine.low %v1042_v10, %v8820_v31 }
  0x89   : > { %2578 = vrot.lane.b32.xlu1 %v2535_v63, %s8301_s29  ;;  %v595_v58 = vshrl.u32 %v7223_v14, 16  ;;  %v590_v61 = vshll.u32 %v7222_v26, 16  ;;  %v1794_v11 = vor.u32 %v1793_v48, %v1789_v42  ;;  %v1798_v52 = vrot.slane %v1796_v50, 1  ;;  %v917_v63 = vld [vmem:[#allocation2 + $0x48] sm:$0xf] }
  0x8a   : > { %v1806_v1 = vor.u32 %v1805_v37, %v1801_v43  ;;  %v1810_v36 = vrot.slane %v1808_v54, 1  ;;  %v2024_v3 = vrot.slane %v6875_v47, 1  ;;  %v1086_v62 = vld [vmem:[#allocation2 + $0x48] sm:$0xe]  ;;  %v589_v46 = vrot.slane %v587_v55, 7 }
  0x8b   : > { %v2025_v5 = vrot.slane %v8808_v24, 1  ;;  %v597_v7 = vrot.slane %v595_v58, 7  ;;  %v598_v53 = vshll.u32 %v7223_v14, 16  ;;  %v2027_v9 = vrot.slane %v6876_v20, 1  ;;  %v353_v40 = vld [vmem:[%s8516_s23 + $0x88] sm:$0xff] }
  0x8c   : > { %1427 = vrot.lane.b32.xlu0 %v1286_v39, %s8297_s25  ;;  %v1044_v4 = vld [vmem:[#allocation2 + $0x54] sm:$0xf]  ;;  %v2303_v15 = vshll.u32 %v8834_v56, 16  ;;  %v592_v16 = vor.u32 %v590_v61, %v589_v46  ;;  %v8847_v57 = vpack.c.bf16 %v352_v25, %v352_v25  ;;  %v1799_v18 = vsel %vm1226_vm4, %v1794_v11, %v1798_v52  ;;  %v846_v42 = vld [vmem:[#allocation2 + $0x68] sm:$0x1] }
  0x8d   : > { %1429 = vrot.lane.b32.xlu1 %v1298_v17, %s8297_s25  ;;  %v2028_v39 = vrot.slane %v8814_v21, 1  ;;  %v919_v24 = vld [vmem:[#allocation2 + $0x54] sm:$0xf]  ;;  %v8857_v19 = vcombine.low %v917_v63, %v8838_v41  ;;  %v1811_v26 = vsel %vm1226_vm4, %v1806_v1, %v1810_v36  ;;  %v600_v30 = vor.u32 %v598_v53, %v597_v7  ;;  %v8880_v54 = vld [vmem:[#allocation2 + $0x50] ss:$0 sps:$4 sm:$0x11]  }
  0x8e   : > { %v2026_v33 = vsel %vm1499_vm6, %v2024_v3, %v2025_v5  ;;  %v6923_v27 = vcombine.low %v1086_v62, %v8820_v31  ;;  %v2301_v21 = vshrl.u32 %v8834_v56, 16  ;;  %v2305_v14 = vrot.slane %v2303_v15, 1  ;;  %v1087_v44 = vld [vmem:[#allocation2 + $0x54] sm:$0xe] }
  0x8f   : > { %v8844_v13 = vld [vmem:[#allocation2 + $0x58] sm:$0xf]  ;;  %v8860_v17 = vld [vmem:[#allocation2 + $0x5c] ss:$0 sps:$4 sm:$0x11]   ;;  %v2029_v10 = vsel %vm1499_vm6, %v2027_v9, %v2028_v39  ;;  %v1302_v31 = vshll.u32 %v8857_v19, 16  ;;  %v7225_v58 = vpack.c.bf16 %v353_v40, %v353_v40 }
  0x90   : > { %1556 = vrot.lane.b32.xlu0 %v1514_v38, %s8296_s24  ;;  %v6892_v22 = vcombine.low %v1044_v4, %v8844_v13  ;;  %v8862_v29 = vld [vmem:[#allocation2 + $0x58] sm:$0xf]  ;;  %v602_v38 = vrot.slane %v597_v7, 4  ;;  %v604_v48 = vshrl.u32 %v8847_v57, 16  ;;  %v2320_v37 = vshll.u32 %v8860_v17, 16 }
  0x91   : > { %1558 = vrot.lane.b32.xlu1 %v1517_v32, %s8296_s24  ;;  %v2308_v32 = vshll.u32 %v8842_v59, 16  ;;  %v8875_v47 = vcombine.low %v919_v24, %v8862_v29  ;;  %v6924_v20 = vcombine.low %v1087_v44, %v8844_v13  ;;  %v2306_v61 = vor.u32 %v2305_v14, %v2301_v21  ;;  %v8891_v63 = vld [vmem:[%s11085_s1 + $0x10] ss:$0 sps:$4 sm:$0x33]   ;;  %v981_v9 = vld [vmem:[#allocation2 + $0x54] sm:$0xf] }
  0x92   : > { %v2315_v35 = vshll.u32 %v6892_v22, 16  ;;  %v2313_v50 = vshrl.u32 %v6892_v22, 16  ;;  %v847_v52 = vsel %vm8553_vm9, %v602_v38, %v846_v42  ;;  %v1300_v25 = vshrl.u32 %v8857_v19, 16  ;;  %v8896_v4 = vld [vmem:[#allocation2 + $0x5c] ss:$0 sps:$4 sm:$0x11]   ;;  %7865 = vmatprep.subr.msk.bf16.mxu0 %vm2928_vm10, %v8891_v63 }
  0x93   : > { %v2310_v11 = vrot.slane %v2308_v32, 1  ;;  %v1304_v1 = vrot.slane %v1302_v31, 1  ;;  %848 = vst [vmem:[#allocation2 + $0x68] sm:$0x1] %v847_v52  ;;  %v2322_v3 = vrot.slane %v2320_v37, 1  ;;  %v1314_v62 = vshll.u32 %v8875_v47, 16 }
  0x94   : > { %1668 = vrot.lane.b32.xlu0 %v8795_v2, %s8298_s26  ;;  %v843_v2 = vsel %vm8535_vm8, %v592_v16, %v842_v0  ;;  %v2317_v43 = vrot.slane %v2315_v35, 1  ;;  %v2536_v0 = vrot.slane %v6923_v27, 1  ;;  %v606_v5 = vrot.slane %v604_v48, 7  ;;  %v849_v16 = vld [vmem:[#allocation2 + $0x6c] sm:$0xf] }
  0x95   : > { %1670 = vrot.lane.b32.xlu1 %v8800_v34, %s8298_s26  ;;  %v593_v34 = vrot.slane %v589_v46, 4  ;;  %844 = vst [vmem:[#allocation2 + $0x60] sm:$0xf] %v843_v2  ;;  %v959_v46 = vld [vmem:[#allocation2 + $0x48] sm:$0xe]  ;;  %v2537_v7 = vrot.slane %v8842_v59, 1  ;;  %v1305_v40 = vor.u32 %v1304_v1, %v1300_v25 }
  0x96   : > { %v2318_v36 = vor.u32 %v2317_v43, %v2313_v50  ;;  %v1307_v53 = vshll.u32 %v8880_v54, 16  ;;  %v607_v13 = vshll.u32 %v8847_v57, 16  ;;  %v612_v15 = vshrl.u32 %v7225_v58, 16  ;;  %v960_v59 = vld [vmem:[#allocation2 + $0x54] sm:$0xe] }
  0x97   : > { %v601_v55 = vsel %vm8528_vm7, %v593_v34, %v600_v30  ;;  %v2539_v39 = vrot.slane %v6924_v20, 1  ;;  %v2540_v24 = vrot.slane %v8860_v17, 1  ;;  %v615_v34 = vshll.u32 %v7225_v58, 16  ;;  %v853_v57 = vld [vmem:[#allocation2 + $0x74] sm:$0x1] }
  0x98   : > { %1940 = vrot.lane.b32.xlu0 %v1799_v18, %s8302_s30  ;;  %845 = vst.msk [vmem:[#allocation2 + $0x64] sm:$0xf] %vm226_vm0, %v601_v55  ;;  %v2311_v18 = vsel %vm1226_vm4, %v2306_v61, %v2310_v11  ;;  %v609_v30 = vor.u32 %v607_v13, %v606_v5  ;;  %v610_v2 = vrot.slane %v606_v5, 4  ;;  %v2323_v35 = vsel %vm1226_vm4, %v2318_v36, %v2322_v3  ;;  %v8932_v55 = vld [vmem:[#allocation2 + $0x5c] ss:$0 sps:$4 sm:$0x11]  }
  0x99   : > { %1942 = vrot.lane.b32.xlu1 %v1811_v26, %s8302_s30  ;;  %v8904_v26 = vld [vmem:[#allocation2 + $0x58] sm:$0xf]  ;;  %v1312_v27 = vshrl.u32 %v8875_v47, 16  ;;  %v1316_v21 = vrot.slane %v1314_v62, 1  ;;  %v1319_v17 = vshll.u32 %v8896_v4, 16  ;;  %v2538_v42 = vsel %vm1499_vm6, %v2536_v0, %v2537_v7  ;;  %v354_v11 = vld [vmem:[%s8516_s23 + $0x90] sm:$0xff] }
  0x9a   : > { %v8918_v32 = vcombine.low %v981_v9, %v8904_v26  ;;  %v850_v44 = vsel %vm8535_vm8, %v609_v30, %v849_v16  ;;  %v1309_v48 = vrot.slane %v1307_v53, 1  ;;  %v1519_v0 = vrot.slane %v8880_v54, 1  ;;  %v1023_v25 = vld [vmem:[#allocation2 + $0x54] sm:$0xe]  ;;  %v7966_v16 = vld [vmem:[%s11085_s1 + $0x8] sm:$0xff]   ;;  %v355_v30 = vld [vmem:[%s8516_s23 + $0x98] sm:$0xff] }
  0x9b   : > { %851 = vst [vmem:[#allocation2 + $0x6c] sm:$0xf] %v850_v44  ;;  %v1317_v43 = vor.u32 %v1316_v21, %v1312_v27  ;;  %v1522_v36 = vrot.slane %v8896_v4, 1  ;;  %v8943_v3 = vld [vmem:[#allocation2 + $0x68] ss:$0 sps:$4 sm:$0x11]  }
  0x9c   : > { %2068 = vrot.lane.b32.xlu0 %v2026_v33, %s8300_s28  ;;  %v614_v33 = vrot.slane %v612_v15, 7  ;;  %v983_v14 = vld [vmem:[#allocation2 + $0x60] sm:$0xf]  ;;  %v1815_v61 = vshll.u32 %v8918_v32, 16  ;;  %v1310_v5 = vsel %vm1226_vm4, %v1305_v40, %v1309_v48  ;;  %v1820_v53 = vshll.u32 %v8932_v55, 16 }
  0x9d   : > { %2070 = vrot.lane.b32.xlu1 %v2029_v10, %s8300_s28  ;;  %v6830_v10 = vcombine.low %v960_v59, %v8862_v29  ;;  %v1321_v29 = vrot.slane %v1319_v17, 1  ;;  %v1046_v1 = vld [vmem:[#allocation2 + $0x60] sm:$0xf]  ;;  %v1813_v9 = vshrl.u32 %v8918_v32, 16  ;;  %v8952_v15 = vpack.c.bf16 %v354_v11, %v354_v11 }
  0x9e   : > { %v617_v38 = vor.u32 %v615_v34, %v614_v33  ;;  %v619_v31 = vrot.slane %v614_v33, 4  ;;  %v1024_v7 = vld [vmem:[#allocation2 + $0x60] sm:$0xe]  ;;  %v1817_v13 = vrot.slane %v1815_v61, 1  ;;  %v1832_v34 = vshll.u32 %v8943_v3, 16  ;;  %v359_v61 = vld [vmem:[%s8516_s23 + $0xb8] sm:$0xff] }
  0x9f   : > { %v1521_v52 = vrot.slane %v6830_v10, 1  ;;  %v8945_v62 = vld [vmem:[#allocation2 + $0x64] sm:$0xf]  ;;  %v2930_v27 = vsel %vm2928_vm10, %v8891_v63, 0  ;;  %v1822_v17 = vrot.slane %v1820_v53, 1  ;;  %v7227_v40 = vpack.c.bf16 %v355_v30, %v355_v30 }
  0xa0   : > { %2180 = vrot.lane.b32.xlu0 %v8834_v56, %s8299_s27  ;;  %v8915_v56 = vld [vmem:[#allocation2 + $0x64] sm:$0xf]  ;;  %v618_v50 = vsel %vm8528_vm7, %v610_v2, %v617_v38  ;;  %v854_v58 = vsel %vm8553_vm9, %v619_v31, %v853_v57  ;;  %v8955_v4 = vcombine.low %v1046_v1, %v8945_v62  ;;  %v1818_v21 = vor.u32 %v1817_v13, %v1813_v9  ;;  %v8976_v38 = vld [vmem:[#allocation2 + $0x68] ss:$0 sps:$4 sm:$0x11]  }
  0xa1   : > { %2182 = vrot.lane.b32.xlu1 %v6892_v22, %s8299_s27  ;;  %v6829_v22 = vcombine.low %v959_v46, %v8838_v41  ;;  %v2541_v41 = vsel %vm1499_vm6, %v2539_v39, %v2540_v24  ;;  %v8930_v37 = vcombine.low %v983_v14, %v8915_v56  ;;  %852 = vst.msk [vmem:[#allocation2 + $0x70] sm:$0xf] %vm226_vm0, %v618_v50  ;;  %855 = vst [vmem:[#allocation2 + $0x74] sm:$0x1] %v854_v58  ;;  %v356_v14 = vld [vmem:[%s8516_s23 + $0xa0] sm:$0xff]  ;;  %vm2835_vm10 = vcmask 261120  }
  0xa2   : > { %v1322_v46 = vsel %vm1226_vm4, %v1317_v43, %v1321_v29  ;;  %v6877_v39 = vcombine.low %v1023_v25, %v8904_v26  ;;  %v1048_v59 = vld [vmem:[#allocation2 + $0x6c] sm:$0xf]  ;;  %v1523_v2 = vsel %vm1499_vm6, %v1521_v52, %v1522_v36  ;;  %v6878_v33 = vcombine.low %v1024_v7, %v8915_v56  ;;  %7764 = vmatpush3.bf16.msra.mxu0 %v2930_v27  ;;  %v7969_v56 = vld [vmem:[%s11085_s1] sm:$0xff]   ;;  %v856_v1 = vld [vmem:[#allocation2 + $0x78] sm:$0xf] }
  0xa3   : > { %v1518_v20 = vrot.slane %v6829_v22, 1  ;;  %v1827_v54 = vshll.u32 %v8930_v37, 16  ;;  %v1825_v24 = vshrl.u32 %v8930_v37, 16  ;;  %v621_v26 = vshrl.u32 %v8952_v15, 16  ;;  %7765 = vmatprep.subr.bf16.mxu0 %v7966_v16  ;;  %v1088_v31 = vld [vmem:[#allocation2 + $0x60] sm:$0xe] }
  0xa4   : > { %2452 = vrot.lane.b32.xlu0 %v2311_v18, %s8303_s6  ;;  %v2327_v22 = vshll.u32 %v8955_v4, 16  ;;  %v2030_v63 = vrot.slane %v6877_v39, 1  ;;  %v2031_v10 = vrot.slane %v8932_v55, 1  ;;  %v2033_v48 = vrot.slane %v6878_v33, 1  ;;  %v921_v50 = vld [vmem:[#allocation2 + $0x60] sm:$0xf] }
  0xa5   : > { %2454 = vrot.lane.b32.xlu1 %v2323_v35, %s8303_s6  ;;  %v1520_v18 = vsel %vm1499_vm6, %v1518_v20, %v1519_v0  ;;  %v1829_v57 = vrot.slane %v1827_v54, 1  ;;  %v8987_v43 = vld [vmem:[#allocation2 + $0x64] sm:$0xf]  ;;  %v357_v29 = vld [vmem:[%s8516_s23 + $0xa8] sm:$0xff]  ;;  %v8990_v58 = vpack.c.bf16 %v356_v14, %v356_v14  ;;  %v358_v20 = vld [vmem:[%s8516_s23 + $0xb0] sm:$0xff]  ;;  %v1823_v11 = vsel %vm1226_vm4, %v1818_v21, %v1822_v17 }
  0xa6   : > { %v2034_v52 = vrot.slane %v8943_v3, 1  ;;  %v2325_v0 = vshrl.u32 %v8955_v4, 16  ;;  %v623_v25 = vrot.slane %v621_v26, 7  ;;  %7766 = vmatpush3.bf16.msra.mxu0 %v7966_v16  ;;  %v2329_v36 = vrot.slane %v2327_v22, 1  ;;  %v923_v53 = vld [vmem:[#allocation2 + $0x6c] sm:$0xf] }
  0xa7   : > { %v629_v7 = vshrl.u32 %v7227_v40, 16  ;;  %7767 = vmatprep.subr.bf16.mxu0 %v7969_v56  ;;  %v6925_v54 = vcombine.low %v1088_v31, %v8945_v62  ;;  %v9010_v13 = vcombine.low %v921_v50, %v8987_v43  ;;  %v632_v16 = vshll.u32 %v7227_v40, 16 }
  0xa8   : > { %2580 = vrot.lane.b32.xlu0 %v2538_v42, %s8301_s29  ;;  %v8969_v35 = vld [vmem:[#allocation2 + $0x70] sm:$0xf]  ;;  %v1834_v42 = vrot.slane %v1832_v34, 1  ;;  %v8996_v55 = vld [vmem:[#allocation2 + $0x74] ss:$0 sps:$4 sm:$0x11]   ;;  %v2032_v34 = vsel %vm1499_vm6, %v2030_v63, %v2031_v10  ;;  %v9014_v30 = vpack.c.bf16 %v358_v20, %v358_v20  ;;  %v9016_v62 = vpack.c.bf16 %v359_v61, %v359_v61 }
  0xa9   : > { %2582 = vrot.lane.b32.xlu1 %v2541_v41, %s8301_s29  ;;  %v8985_v44 = vcombine.low %v1048_v59, %v8969_v35  ;;  %v1830_v41 = vor.u32 %v1829_v57, %v1825_v24  ;;  %v9007_v9 = vld [vmem:[#allocation2 + $0x70] sm:$0xf]  ;;  %v627_v39 = vrot.slane %v623_v25, 4  ;;  %v631_v24 = vrot.slane %v629_v7, 7  ;;  %v961_v7 = vld [vmem:[#allocation2 + $0x60] sm:$0xe] }
  0xaa   : > { %7768 = vmatpush3.bf16.msra.mxu0 %v7969_v56  ;;  %v7229_v59 = vpack.c.bf16 %v357_v29, %v357_v29  ;;  %v9020_v33 = vcombine.low %v923_v53, %v9007_v9  ;;  %v9022_v57 = vld [vmem:[#allocation2 + $0x68] ss:$0 sps:$4 sm:$0x11]   ;;  %v9029_v14 = vrot.slane %v6925_v54, 1  ;;  %v2035_v40 = vsel %vm1499_vm6, %v2033_v48, %v2034_v52 }
  0xab   : > { %v2339_v3 = vshll.u32 %v8985_v44, 16  ;;  %v634_v27 = vor.u32 %v632_v16, %v631_v24  ;;  %v2337_v17 = vshrl.u32 %v8985_v44, 16  ;;  %v636_v22 = vrot.slane %v631_v24, 4  ;;  %v985_v24 = vld [vmem:[#allocation2 + $0x6c] sm:$0xf] }
  0xac   : > { %1431 = vrot.lane.b32.xlu0 %v1310_v5, %s8297_s25  ;;  %v624_v5 = vshll.u32 %v8952_v15, 16  ;;  %v1835_v15 = vsel %vm1226_vm4, %v1830_v41, %v1834_v42  ;;  %v2543_v56 = vrot.slane %v8976_v38, 1  ;;  %v1326_v63 = vshll.u32 %v9010_v13, 16 }
  0xad   : > { %1433 = vrot.lane.b32.xlu1 %v1322_v46, %s8297_s25  ;;  %v2332_v46 = vshll.u32 %v8976_v38, 16  ;;  %v2341_v26 = vrot.slane %v2339_v3, 1  ;;  %v635_v10 = vsel %vm8528_vm7, %v627_v39, %v634_v27  ;;  %v1324_v50 = vshrl.u32 %v9010_v13, 16  ;;  %v9043_v38 = vld [vmem:[#allocation2 + $0x74] ss:$0 sps:$4 sm:$0x11]  }
  0xae   : > { %859 = vst.msk [vmem:[#allocation2 + $0x7c] sm:$0xf] %vm226_vm0, %v635_v10  ;;  %v2330_v20 = vor.u32 %v2329_v36, %v2325_v0  ;;  %v1338_v61 = vshll.u32 %v9020_v33, 16  ;;  %v1328_v0 = vrot.slane %v1326_v63, 1  ;;  %v1331_v36 = vshll.u32 %v9022_v57, 16 }
  0xaf   : > { %v2334_v42 = vrot.slane %v2332_v46, 1  ;;  %v2342_v52 = vor.u32 %v2341_v26, %v2337_v17  ;;  %v649_v46 = vshll.u32 %v7229_v59, 16  ;;  %v655_v54 = vshrl.u32 %v9014_v30, 16  ;;  %v962_v27 = vld [vmem:[#allocation2 + $0x6c] sm:$0xe] }
  0xb0   : > { %1560 = vrot.lane.b32.xlu0 %v1520_v18, %s8296_s24  ;;  %v626_v18 = vor.u32 %v624_v5, %v623_v25  ;;  %v641_v25 = vshll.u32 %v8990_v58, 16  ;;  %v863_v5 = vld [vmem:[#allocation2 + $0x84] sm:$0xf]  ;;  %v2546_v16 = vrot.slane %v8996_v55, 1  ;;  %v867_v26 = vld [vmem:[#allocation2 + $0x8c] sm:$0x1] }
  0xb1   : > { %1562 = vrot.lane.b32.xlu1 %v1523_v2, %s8296_s24  ;;  %v2344_v2 = vshll.u32 %v8996_v55, 16  ;;  %v2335_v39 = vsel %vm1226_vm4, %v2330_v20, %v2334_v42  ;;  %v658_v63 = vshll.u32 %v9014_v30, 16  ;;  %v2544_v20 = vsel %vm1499_vm6, %v9029_v14, %v2543_v56  ;;  %v870_v14 = vld [vmem:[#allocation2 + $0x90] sm:$0xf] }
  0xb2   : > { %v857_v21 = vsel %vm8535_vm8, %v626_v18, %v856_v1  ;;  %v646_v1 = vshrl.u32 %v7229_v59, 16  ;;  %v1329_v30 = vor.u32 %v1328_v0, %v1324_v50 }
  0xb3   : > { %858 = vst [vmem:[#allocation2 + $0x78] sm:$0xf] %v857_v21  ;;  %v2346_v48 = vrot.slane %v2344_v2, 1  ;;  %v1340_v2 = vrot.slane %v1338_v61, 1  ;;  %v6832_v61 = vcombine.low %v962_v27, %v9007_v9 }
  0xb4   : > { %1672 = vrot.lane.b32.xlu0 %v8918_v32, %s8298_s26  ;;  %v1089_v32 = vld [vmem:[#allocation2 + $0x6c] sm:$0xe]  ;;  %v648_v18 = vrot.slane %v646_v1, 7  ;;  %v1333_v1 = vrot.slane %v1331_v36, 1 }
  0xb5   : > { %1674 = vrot.lane.b32.xlu1 %v8930_v37, %s8298_s26  ;;  %v860_v37 = vld [vmem:[#allocation2 + $0x80] sm:$0x1]  ;;  %v6926_v41 = vcombine.low %v1089_v32, %v8969_v35  ;;  %v2347_v55 = vsel %vm1226_vm4, %v2342_v52, %v2346_v48  ;;  %v9076_v42 = vld [vmem:[#allocation2 + $0x7c] sm:$0xf] }
  0xb6   : > { %v861_v29 = vsel %vm8553_vm9, %v636_v22, %v860_v37  ;;  %v9058_v37 = vld [vmem:[#allocation2 + $0x70] sm:$0xf]  ;;  %v651_v21 = vor.u32 %v649_v46, %v648_v18  ;;  %v653_v17 = vrot.slane %v648_v18, 4  ;;  %v666_v46 = vshll.u32 %v9016_v62, 16 }
  0xb7   : > { %862 = vst [vmem:[#allocation2 + $0x80] sm:$0x1] %v861_v29  ;;  %v2545_v53 = vrot.slane %v6926_v41, 1  ;;  %v9079_v29 = vcombine.low %v985_v24, %v9058_v37  ;;  %v1528_v18 = vrot.slane %v9043_v38, 1 }
  0xb8   : > { %1944 = vrot.lane.b32.xlu0 %v1823_v11, %s8302_s30  ;;  %v9036_v31 = vpop.permute.xlu1 %1548  ;;  %v638_v11 = vshrl.u32 %v8990_v58, 16  ;;  %v1343_v58 = vshll.u32 %v9043_v38, 16 }
  0xb9   : > { %1946 = vrot.lane.b32.xlu1 %v1835_v15, %s8302_s30  ;;  %v1336_v15 = vshrl.u32 %v9020_v33, 16  ;;  %v1839_v36 = vshll.u32 %v9079_v29, 16 }
  0xba   : > { %v9049_v35 = vpop.permute.xlu0 %1419  ;;  %v640_v3 = vrot.slane %v638_v11, 7  ;;  %v987_v41 = vld [vmem:[#allocation2 + $0x78] sm:$0xf]  ;;  %v2547_v11 = vsel %vm1499_vm6, %v2545_v53, %v2546_v16  ;;  %v360_v53 = vld [vmem:[%s8516_s23 + $0xc0] sm:$0xff]  ;;  %v361_v16 = vld [vmem:[%s8516_s23 + $0xc8] sm:$0xff] }
  0xbb   : > { %v1341_v52 = vor.u32 %v1340_v2, %v1336_v15  ;;  %v9093_v9 = vcombine.low %v987_v41, %v9076_v42  ;;  %v1527_v15 = vrot.slane %v6832_v61, 1  ;;  %v2606_v24 = vsel %vm2604_vm11, %v8521_v12, %v9049_v35  ;;  %v925_v41 = vld [vmem:[#allocation2 + $0x78] sm:$0xf] }
  0xbc   : > { %2072 = vrot.lane.b32.xlu0 %v2032_v34, %s8300_s28  ;;  %v643_v34 = vor.u32 %v641_v25, %v640_v3  ;;  %v644_v32 = vrot.slane %v640_v3, 4  ;;  %v1345_v25 = vrot.slane %v1343_v58, 1  ;;  %v1525_v3 = vrot.slane %v9022_v57, 1  ;;  %v1025_v58 = vld [vmem:[#allocation2 + $0x6c] sm:$0xe] }
  0xbd   : > { %2074 = vrot.lane.b32.xlu1 %v2035_v40, %s8300_s28  ;;  %v9069_v40 = vrot.slane %v655_v54, 7  ;;  %v9103_v54 = vld [vmem:[#allocation2 + $0x74] ss:$0 sps:$4 sm:$0x11]   ;;  %v1334_v57 = vsel %vm1226_vm4, %v1329_v30, %v1333_v1  ;;  %v1851_v27 = vshll.u32 %v9093_v9, 16  ;;  %v9135_v61 = vpack.c.bf16 %v360_v53, %v360_v53 }
  0xbe   : > { %v864_v22 = vsel %vm8535_vm8, %v643_v34, %v863_v5  ;;  %v652_v48 = vsel %vm8528_vm7, %v644_v32, %v651_v21  ;;  %v874_v5 = vld [vmem:[#allocation2 + $0x98] sm:$0x1]  ;;  %v1026_v34 = vld [vmem:[#allocation2 + $0x78] sm:$0xe]  ;;  %v1346_v38 = vsel %vm1226_vm4, %v1341_v52, %v1345_v25  ;;  %v9146_v25 = vld [vmem:[#allocation2 + $0x7c] sm:$0xf] }
  0xbf   : > { %865 = vst [vmem:[#allocation2 + $0x84] sm:$0xf] %v864_v22  ;;  %866 = vst.msk [vmem:[#allocation2 + $0x88] sm:$0xf] %vm226_vm0, %v652_v48  ;;  %v660_v56 = vor.u32 %v658_v63, %v9069_v40  ;;  %v1050_v32 = vld [vmem:[#allocation2 + $0x78] sm:$0xf]  ;;  %v6879_v63 = vcombine.low %v1025_v58, %v9058_v37  ;;  %v6880_v37 = vcombine.low %v1026_v34, %v9076_v42 }
  0xc0   : > { %2184 = vrot.lane.b32.xlu0 %v8955_v4, %s8299_s27  ;;  %v6831_v4 = vcombine.low %v961_v7, %v8987_v43  ;;  %v868_v43 = vsel %vm8553_vm9, %v653_v17, %v867_v26  ;;  %v9118_v21 = vld [vmem:[#allocation2 + $0x80] ss:$0 sps:$4 sm:$0x11]   ;;  %v9120_v17 = vld [vmem:[#allocation2 + $0x7c] sm:$0xf]  ;;  %v2037_v58 = vrot.slane %v9103_v54, 1 }
  0xc1   : > { %2186 = vrot.lane.b32.xlu1 %v8985_v44, %s8299_s27  ;;  %v9064_v59 = vpop.permute.xlu1 %1662  ;;  %v663_v44 = vshrl.u32 %v9016_v62, 16  ;;  %869 = vst [vmem:[#allocation2 + $0x8c] sm:$0x1] %v868_v43  ;;  %v1837_v62 = vshrl.u32 %v9079_v29, 16  ;;  %v871_v35 = vsel %vm8535_vm8, %v660_v56, %v870_v14  ;;  %v9137_v43 = vpack.c.bf16 %v361_v16, %v361_v16 }
  0xc2   : > { %v9073_v10 = vpop.permute.xlu0 %1660  ;;  %872 = vst [vmem:[#allocation2 + $0x90] sm:$0xf] %v871_v35  ;;  %v9133_v30 = vld [vmem:[#allocation2 + $0x80] ss:$0 sps:$4 sm:$0x11]   ;;  %v9144_v52 = vcombine.low %v1050_v32, %v9120_v17  ;;  %v2639_v14 = vsel %vm2637_vm12, %v2606_v24, %v9036_v31  ;;  %v1529_v56 = vsel %vm1499_vm6, %v1527_v15, %v1528_v18  ;;  %v9164_v24 = vcombine.low %v925_v41, %v9146_v25 }
  0xc3   : > { %v665_v50 = vrot.slane %v663_v44, 7  ;;  %v1844_v44 = vshll.u32 %v9103_v54, 16  ;;  %v672_v34 = vshrl.u32 %v9135_v61, 16 }
  0xc4   : > { %2456 = vrot.lane.b32.xlu0 %v2335_v39, %s8303_s6  ;;  %v1524_v39 = vrot.slane %v6831_v4, 1  ;;  %v1090_v4 = vld [vmem:[#allocation2 + $0x78] sm:$0xe]  ;;  %v2351_v54 = vshll.u32 %v9144_v52, 16 }
  0xc5   : > { %2458 = vrot.lane.b32.xlu1 %v2347_v55, %s8303_s6  ;;  %v661_v55 = vrot.slane %v9069_v40, 4  ;;  %v670_v2 = vrot.slane %v665_v50, 4  ;;  %v668_v12 = vor.u32 %v666_v46, %v665_v50  ;;  %v1841_v40 = vrot.slane %v1839_v36, 1 }
  0xc6   : > { %v9099_v7 = vpop.permute.xlu0 %2172  ;;  %v1853_v50 = vrot.slane %v1851_v27, 1  ;;  %v1856_v46 = vshll.u32 %v9118_v21, 16  ;;  %v1052_v42 = vld [vmem:[#allocation2 + $0x84] sm:$0xf]  ;;  %v1846_v16 = vrot.slane %v1844_v44, 1  ;;  %v6927_v31 = vcombine.low %v1090_v4, %v9120_v17 }
  0xc7   : > { %v9097_v0 = vpop.permute.xlu1 %2174  ;;  %v875_v48 = vsel %vm8553_vm9, %v670_v2, %v874_v5  ;;  %v669_v1 = vsel %vm8528_vm7, %v661_v55, %v668_v12  ;;  %v9154_v5 = vld [vmem:[#allocation2 + $0x88] sm:$0xf]  ;;  %v1842_v53 = vor.u32 %v1841_v40, %v1837_v62  ;;  %v927_v15 = vld [vmem:[#allocation2 + $0x84] sm:$0xf]  ;;  %v2039_v62 = vrot.slane %v6880_v37, 1 }
  0xc8   : > { %2584 = vrot.lane.b32.xlu0 %v2544_v20, %s8301_s29  ;;  %v1526_v20 = vsel %vm1499_vm6, %v1524_v39, %v1525_v3  ;;  %876 = vst [vmem:[#allocation2 + $0x98] sm:$0x1] %v875_v48  ;;  %873 = vst.msk [vmem:[#allocation2 + $0x94] sm:$0xf] %vm226_vm0, %v669_v1  ;;  %v2036_v39 = vrot.slane %v6879_v63, 1  ;;  %v1858_v55 = vrot.slane %v1856_v46, 1 }
  0xc9   : > { %2586 = vrot.lane.b32.xlu1 %v2547_v11, %s8301_s29  ;;  %v1849_v11 = vshrl.u32 %v9093_v9, 16  ;;  %v9161_v18 = vld [vmem:[#allocation2 + $0x88] sm:$0xf]  ;;  %v2040_v2 = vrot.slane %v9118_v21, 1  ;;  %v2356_v27 = vshll.u32 %v9133_v30, 16  ;;  %v1847_v35 = vsel %vm1226_vm4, %v1842_v53, %v1846_v16 }
  0xca   : > { %v9124_v26 = vpop.permute.xlu0 %2060  ;;  %v2038_v63 = vsel %vm1499_vm6, %v2036_v39, %v2037_v58  ;;  %v9177_v40 = vld [vmem:[#allocation2 + $0x8c] ss:$0 sps:$4 sm:$0x11]   ;;  %v2349_v44 = vshrl.u32 %v9144_v52, 16  ;;  %v9181_v4 = vcombine.low %v927_v15, %v9161_v18  ;;  %v9185_v41 = vrot.slane %v6927_v31, 1 }
  0xcb   : > { %v9126_v22 = vpop.permute.xlu1 %1550  ;;  %v1854_v32 = vor.u32 %v1853_v50, %v1849_v11  ;;  %v2549_v48 = vrot.slane %v9133_v30, 1  ;;  %v2368_v16 = vshll.u32 %v9177_v40, 16  ;;  %v9206_v39 = vld [vmem:[#allocation2 + $0x8c] ss:$0 sps:$4 sm:$0x11]  }
  0xcc   : > { %1435 = vrot.lane.b32.xlu0 %v1334_v57, %s8297_s25  ;;  %v9169_v57 = vcombine.low %v1052_v42, %v9154_v5  ;;  %v9202_v42 = vld [vmem:[#allocation2 + $0x80] ss:$0 sps:$4 sm:$0x11]  }
  0xcd   : > { %1437 = vrot.lane.b32.xlu1 %v1346_v38, %s8297_s25  ;;  %v1091_v38 = vld [vmem:[#allocation2 + $0x84] sm:$0xe]  ;;  %v1859_v46 = vsel %vm1226_vm4, %v1854_v32, %v1858_v55 }
  0xce   : > { %v9157_v3 = vpop.permute.xlu0 %2572  ;;  %v2363_v11 = vshll.u32 %v9169_v57, 16  ;;  %v6928_v1 = vcombine.low %v1091_v38, %v9154_v5  ;;  %v1362_v5 = vshll.u32 %v9181_v4, 16  ;;  %v2361_v58 = vshrl.u32 %v9169_v57, 16 }
  0xcf   : > { %v2063_v36 = vpop.permute.xlu1 %2062  ;;  %v2552_v38 = vrot.slane %v9177_v40, 1 }
  0xd0   : > { %1564 = vrot.lane.b32.xlu0 %v1526_v20, %s8296_s24  ;;  %v1350_v20 = vshll.u32 %v9164_v24, 16  ;;  %v9220_v32 = vrot.slane %v6928_v1, 1 }
  0xd1   : > { %1566 = vrot.lane.b32.xlu1 %v1529_v56, %s8296_s24  ;;  %v2672_v56 = vsel %vm2670_vm13, %v2639_v14, %v9073_v10  ;;  %v1348_v10 = vshrl.u32 %v9164_v24, 16 }
  0xd2   : > { %v1422_v12 = vpop.permute.xlu0 %1421  ;;  %v9213_v31 = vrot.slane %v1350_v20, 1  ;;  %v9229_v20 = vrot.slane %v1362_v5, 1  ;;  %v991_v5 = vld [vmem:[#allocation2 + $0x90] sm:$0xf] }
  0xd3   : > { %v2575_v17 = vpop.permute.xlu1 %2574  ;;  %v2608_v21 = vsel %vm2604_vm11, %v8591_v45, %v1422_v12  ;;  %v2353_v45 = vrot.slane %v2351_v54, 1  ;;  %v2365_v54 = vrot.slane %v2363_v11, 1  ;;  %v963_v11 = vld [vmem:[#allocation2 + $0x78] sm:$0xe] }
  0xd4   : > { %v2641_v37 = vsel %vm2637_vm12, %v2608_v21, %v9126_v22  ;;  %1676 = vrot.lane.b32.xlu0 %v9079_v29, %s8298_s26  ;;  %v2358_v22 = vrot.slane %v2356_v27, 1  ;;  %v2041_v29 = vsel %vm1499_vm6, %v2039_v62, %v2040_v2  ;;  %v362_v27 = vld [vmem:[%s8516_s23 + $0xd0] sm:$0xff]  ;;  %v2370_v21 = vrot.slane %v2368_v16, 1 }
  0xd5   : > { %1678 = vrot.lane.b32.xlu1 %v9093_v9, %s8298_s26  ;;  %v2674_v50 = vsel %vm2670_vm13, %v2641_v37, %v9064_v59  ;;  %v1355_v37 = vshll.u32 %v9202_v42, 16  ;;  %v2366_v16 = vor.u32 %v2365_v54, %v2361_v58  ;;  %v6833_v58 = vcombine.low %v963_v11, %v9146_v25  ;;  %v9272_v11 = vld [vmem:[#allocation2 + $0x98] ss:$0 sps:$4 sm:$0x11]  }
  0xd6   : > { %v1933_v53 = vpop.permute.xlu0 %1932  ;;  %v9259_v54 = vpack.c.bf16 %v362_v27, %v362_v27 }
  0xd7   : > { %v1935_v9 = vpop.permute.xlu1 %1934  ;;  %v2705_v14 = vsel %vm2703_vm14, %v2672_v56, %v1933_v53  ;;  %v964_v56 = vld [vmem:[#allocation2 + $0x84] sm:$0xe]  ;;  %v1357_v25 = vrot.slane %v1355_v37, 1  ;;  %v9284_v37 = vld [vmem:[#allocation2 + $0x8c] ss:$0 sps:$4 sm:$0x11]  }
  0xd8   : > { %v2707_v59 = vsel %vm2703_vm14, %v2674_v50, %v1935_v9  ;;  %v2738_v62 = vsel %vm2736_vm15, %v2705_v14, %v9124_v26  ;;  %1948 = vrot.lane.b32.xlu0 %v1847_v35, %s8302_s30  ;;  %v1367_v35 = vshll.u32 %v9206_v39, 16  ;;  %v989_v50 = vld [vmem:[#allocation2 + $0x84] sm:$0xf]  ;;  %v363_v14 = vld [vmem:[%s8516_s23 + $0xd8] sm:$0xff]  ;;  %v689_v30 = vshrl.u32 %v9259_v54, 16 }
  0xd9   : > { %v2740_v15 = vsel %vm2736_vm15, %v2707_v59, %v2063_v36  ;;  %1950 = vrot.lane.b32.xlu1 %v1859_v46, %s8302_s30  ;;  %v2771_v2 = vsel %vm2769_vm1, %v2738_v62, %v9099_v7  ;;  %v1360_v36 = vshrl.u32 %v9181_v4, 16  ;;  %v2354_v7 = vor.u32 %v2353_v45, %v2349_v44  ;;  %v9235_v46 = vld [vmem:[#allocation2 + $0x88] sm:$0xf]  ;;  %v9242_v59 = vld [vmem:[#allocation2 + $0x94] sm:$0xf] }
  0xda   : > { %v2773_v55 = vsel %vm2769_vm1, %v2740_v15, %v9097_v0  ;;  %v2445_v26 = vpop.permute.xlu0 %2444  ;;  %v674_v44 = vrot.slane %v672_v34, 7  ;;  %v877_v45 = vld [vmem:[#allocation2 + $0x9c] sm:$0xf]  ;;  %v683_v34 = vshll.u32 %v9137_v43, 16  ;;  %v881_v62 = vld [vmem:[#allocation2 + $0xa4] sm:$0x1]  ;;  %v9270_v27 = vcombine.low %v989_v50, %v9235_v46 }
  0xdb   : > { %v2447_v12 = vpop.permute.xlu1 %2446  ;;  %v2804_v1 = vsel %vm2802_vm3, %v2771_v2, %v2445_v26  ;;  %v1353_v50 = vor.u32 %v9213_v31, %v1348_v10  ;;  %v2550_v10 = vsel %vm1499_vm6, %v9185_v41, %v2549_v48  ;;  %v1530_v31 = vrot.slane %v6833_v58, 1  ;;  %v884_v58 = vld [vmem:[#allocation2 + $0xa8] sm:$0xf] }
  0xdc   : > { %v2806_v0 = vsel %vm2802_vm3, %v2773_v55, %v2447_v12  ;;  %2076 = vrot.lane.b32.xlu0 %v2038_v63, %s8300_s28  ;;  %v2837_v9 = vsel %vm2835_vm10, %v2804_v1, %v9157_v3  ;;  %v680_v63 = vshrl.u32 %v9137_v43, 16  ;;  %v364_v55 = vld [vmem:[%s8516_s23 + $0xe0] sm:$0xff]  ;;  %v678_v12 = vrot.slane %v674_v44, 4 }
  0xdd   : > { %2078 = vrot.lane.b32.xlu1 %v2041_v29, %s8300_s28  ;;  %v2839_v53 = vsel %vm2835_vm10, %v2806_v0, %v2575_v17  ;;  %7769 = vmatprep.mubr.msk.bf16.mxu0 %vm2895_vm2, %v2837_v9  ;;  %v675_v29 = vshll.u32 %v9135_v61, 16  ;;  %v9255_v17 = vrot.slane %v1367_v35, 1  ;;  %v2359_v61 = vsel %vm1226_vm4, %v2354_v7, %v2358_v22 }
  0xde   : > { %7770 = vmatmul.mubr.msk.bf16.vlgmr.msra.gmra.mxu0 %vm2895_vm2, %v2839_v53  ;;  %v9253_v3 = vpop.permute.xlu0 %1423  ;;  %v682_v26 = vrot.slane %v680_v63, 7  ;;  %v2371_v35 = vsel %vm1226_vm4, %v2366_v16, %v2370_v21  ;;  %v6834_v43 = vcombine.low %v964_v56, %v9161_v18  ;;  %v9275_v22 = vcombine.low %v991_v5, %v9242_v59  ;;  %v1028_v18 = vld [vmem:[#allocation2 + $0x90] sm:$0xe] }
  0xdf   : > { %v9250_v15 = vpop.permute.xlu1 %1425  ;;  %v677_v2 = vor.u32 %v675_v29, %v674_v44  ;;  %v1534_v21 = vrot.slane %v9206_v39, 1  ;;  %v7235_v56 = vpack.c.bf16 %v363_v14, %v363_v14  ;;  %v9293_v16 = vpack.c.bf16 %v364_v55, %v364_v55  ;;  %v9311_v29 = vld [vmem:[#allocation2 + $0x84] sm:$0xe]  ;;  %v1054_v63 = vld [vmem:[#allocation2 + $0x90] sm:$0xf] }
  0xe0   : > { %2188 = vrot.lane.b32.xlu0 %v9144_v52, %s8299_s27  ;;  %v685_v0 = vor.u32 %v683_v34, %v682_v26  ;;  %v687_v1 = vrot.slane %v682_v26, 4  ;;  %v2553_v39 = vsel %vm1499_vm6, %v9220_v32, %v2552_v38  ;;  %v1863_v5 = vshll.u32 %v9270_v27, 16  ;;  %v9320_v14 = vld [vmem:[#allocation2 + $0x94] sm:$0xf] }
  0xe1   : > { %2190 = vrot.lane.b32.xlu1 %v9169_v57, %s8299_s27  ;;  %v878_v57 = vsel %vm8535_vm8, %v677_v2, %v877_v45  ;;  %v1365_v44 = vor.u32 %v9229_v20, %v1360_v36  ;;  %v1533_v45 = vrot.slane %v6834_v43, 1  ;;  %v1875_v40 = vshll.u32 %v9275_v22, 16 }
  0xe2   : > { %v9281_v52 = vpop.permute.xlu0 %1552  ;;  %879 = vst [vmem:[#allocation2 + $0x9c] sm:$0xf] %v878_v57  ;;  %v686_v9 = vsel %vm8528_vm7, %v678_v12, %v685_v0  ;;  %v882_v53 = vsel %vm8553_vm9, %v687_v1, %v881_v62  ;;  %v1531_v48 = vrot.slane %v9202_v42, 1  ;;  %v1880_v38 = vshll.u32 %v9272_v11, 16  ;;  %v1092_v1 = vld [vmem:[#allocation2 + $0x90] sm:$0xe] }
  0xe3   : > { %v9279_v7 = vpop.permute.xlu1 %1554  ;;  %880 = vst.msk [vmem:[#allocation2 + $0xa0] sm:$0xf] %vm226_vm0, %v686_v9  ;;  %883 = vst [vmem:[#allocation2 + $0xa4] sm:$0x1] %v882_v53  ;;  %v692_v36 = vshll.u32 %v9259_v54, 16  ;;  %v697_v20 = vshrl.u32 %v7235_v56, 16  ;;  %v1358_v34 = vsel %vm1226_vm4, %v1353_v50, %v1357_v25  ;;  %v6882_v62 = vcombine.low %v1028_v18, %v9242_v59 }
  0xe4   : > { %2460 = vrot.lane.b32.xlu0 %v2359_v61, %s8303_s6  ;;  %v1861_v55 = vshrl.u32 %v9270_v27, 16  ;;  %v691_v61 = vrot.slane %v689_v30, 7  ;;  %v1865_v42 = vrot.slane %v1863_v5, 1  ;;  %v1868_v2 = vshll.u32 %v9284_v37, 16  ;;  %v888_v53 = vld [vmem:[#allocation2 + $0xb0] sm:$0x1] }
  0xe5   : > { %2462 = vrot.lane.b32.xlu1 %v2371_v35, %s8303_s6  ;;  %v699_v12 = vrot.slane %v697_v20, 7  ;;  %v700_v26 = vshll.u32 %v7235_v56, 16  ;;  %v1370_v54 = vsel %vm1226_vm4, %v1365_v44, %v9255_v17  ;;  %v1873_v35 = vshrl.u32 %v9275_v22, 16 }
  0xe6   : > { %v9316_v41 = vpop.permute.xlu0 %1664  ;;  %v1877_v25 = vrot.slane %v1875_v40, 1  ;;  %v694_v43 = vor.u32 %v692_v36, %v691_v61  ;;  %v6881_v57 = vcombine.low %v9311_v29, %v9235_v46  ;;  %v695_v18 = vrot.slane %v691_v61, 4 }
  0xe7   : > { %v9314_v32 = vpop.permute.xlu1 %1666  ;;  %v702_v50 = vor.u32 %v700_v26, %v699_v12  ;;  %v704_v9 = vrot.slane %v699_v12, 4  ;;  %v1535_v56 = vsel %vm1499_vm6, %v1533_v45, %v1534_v21  ;;  %v1532_v17 = vsel %vm1499_vm6, %v1530_v31, %v1531_v48  ;;  %v365_v48 = vld [vmem:[%s8516_s23 + $0xe8] sm:$0xff] }
  0xe8   : > { %2588 = vrot.lane.b32.xlu0 %v2550_v10, %s8301_s29  ;;  %v9343_v10 = vld [vmem:[#allocation2 + $0x98] ss:$0 sps:$4 sm:$0x11]   ;;  %v885_v5 = vsel %vm8535_vm8, %v694_v43, %v884_v58  ;;  %v1882_v46 = vrot.slane %v1880_v38, 1  ;;  %v1866_v44 = vor.u32 %v1865_v42, %v1861_v55  ;;  %v1870_v40 = vrot.slane %v1868_v2, 1 }
  0xe9   : > { %2590 = vrot.lane.b32.xlu1 %v2553_v39, %s8301_s29  ;;  %v9341_v39 = vcombine.low %v1054_v63, %v9320_v14  ;;  %v2045_v29 = vrot.slane %v6882_v62, 1  ;;  %886 = vst [vmem:[#allocation2 + $0xa8] sm:$0xf] %v885_v5  ;;  %v1878_v21 = vor.u32 %v1877_v25, %v1873_v35  ;;  %v2046_v31 = vrot.slane %v9272_v11, 1  ;;  %v1056_v20 = vld [vmem:[#allocation2 + $0x9c] sm:$0xf] }
  0xea   : > { %v9334_v0 = vpop.permute.xlu0 %1936  ;;  %v703_v45 = vsel %vm8528_vm7, %v695_v18, %v702_v50  ;;  %v889_v30 = vsel %vm8553_vm9, %v704_v9, %v888_v53  ;;  %v9355_v58 = vld [vmem:[#allocation2 + $0xa0] sm:$0xf]  ;;  %v6929_v38 = vcombine.low %v1092_v1, %v9320_v14  ;;  %v929_v11 = vld [vmem:[#allocation2 + $0x90] sm:$0xf]  ;;  %v9360_v62 = vld [vmem:[#allocation2 + $0x94] sm:$0xf]  ;;  %v9369_v12 = vpack.c.bf16 %v365_v48, %v365_v48 }
  0xeb   : > { %v9332_v59 = vpop.permute.xlu1 %1938  ;;  %887 = vst.msk [vmem:[#allocation2 + $0xac] sm:$0xf] %vm226_vm0, %v703_v45  ;;  %890 = vst [vmem:[#allocation2 + $0xb0] sm:$0x1] %v889_v30  ;;  %v706_v55 = vshrl.u32 %v9293_v16, 16  ;;  %v2042_v61 = vrot.slane %v6881_v57, 1  ;;  %v1883_v26 = vsel %vm1226_vm4, %v1878_v21, %v1882_v46  ;;  %v2047_v35 = vsel %vm1499_vm6, %v2045_v29, %v2046_v31 }
  0xec   : > { %1439 = vrot.lane.b32.xlu0 %v1358_v34, %s8297_s25  ;;  %v2375_v34 = vshll.u32 %v9341_v39, 16  ;;  %v2043_v42 = vrot.slane %v9284_v37, 1  ;;  %v2380_v2 = vshll.u32 %v9343_v10, 16  ;;  %v9367_v14 = vld [vmem:[#allocation2 + $0x98] ss:$0 sps:$4 sm:$0x11]   ;;  %v9375_v25 = vcombine.low %v1056_v20, %v9355_v58 }
  0xed   : > { %1441 = vrot.lane.b32.xlu1 %v1370_v54, %s8297_s25  ;;  %v1871_v54 = vsel %vm1226_vm4, %v1866_v44, %v1870_v40  ;;  %v2612_v43 = vsel %vm2604_vm11, %v8635_v51, %v9250_v15  ;;  %v2373_v1 = vshrl.u32 %v9341_v39, 16  ;;  %v9381_v18 = vrot.slane %v6929_v38, 1  ;;  %v9402_v44 = vld [vmem:[#allocation2 + $0xa4] ss:$0 sps:$4 sm:$0x11]  }
  0xee   : > { %v2065_v36 = vpop.permute.xlu0 %2064  ;;  %v9384_v50 = vcombine.low %v929_v11, %v9360_v62  ;;  %v9386_v9 = vrot.slane %v2375_v34, 1  ;;  %v2555_v53 = vrot.slane %v9343_v10, 1  ;;  %v709_v5 = vshll.u32 %v9293_v16, 16  ;;  %v9406_v16 = vld [vmem:[#allocation2 + $0xa0] sm:$0xf] }
  0xef   : > { %v2067_v63 = vpop.permute.xlu1 %2066  ;;  %v2610_v51 = vsel %vm2604_vm11, %v8633_v49, %v9253_v3  ;;  %v2645_v15 = vsel %vm2637_vm12, %v2612_v43, %v9279_v7  ;;  %v2044_v46 = vsel %vm1499_vm6, %v2042_v61, %v2043_v42  ;;  %v9404_v40 = vrot.slane %v2380_v2, 1  ;;  %v1093_v38 = vld [vmem:[#allocation2 + $0x9c] sm:$0xe]  ;;  %v891_v11 = vld [vmem:[#allocation2 + $0xb4] sm:$0xf] }
  0xf0   : > { %1568 = vrot.lane.b32.xlu0 %v1532_v17, %s8296_s24  ;;  %v9389_v17 = vrot.slane %v706_v55, 7  ;;  %v2643_v49 = vsel %vm2637_vm12, %v2610_v51, %v9281_v52  ;;  %v2678_v3 = vsel %vm2670_vm13, %v2645_v15, %v9314_v32  ;;  %v2387_v7 = vshll.u32 %v9375_v25, 16  ;;  %v9443_v15 = vld [vmem:[#allocation2 + $0xa4] ss:$0 sps:$4 sm:$0x11]  }
  0xf1   : > { %1570 = vrot.lane.b32.xlu1 %v1535_v56, %s8296_s24  ;;  %v931_v56 = vld [vmem:[#allocation2 + $0x9c] sm:$0xf]  ;;  %v2711_v29 = vsel %vm2703_vm14, %v2678_v3, %v9332_v59  ;;  %v1372_v45 = vshrl.u32 %v9384_v50, 16  ;;  %v1374_v30 = vshll.u32 %v9384_v50, 16  ;;  %v2385_v34 = vshrl.u32 %v9375_v25, 16 }
  0xf2   : > { %v2177_v57 = vpop.permute.xlu0 %2176  ;;  %v9423_v32 = vcombine.low %v931_v56, %v9406_v16  ;;  %v711_v48 = vor.u32 %v709_v5, %v9389_v17  ;;  %v2744_v20 = vsel %vm2736_vm15, %v2711_v29, %v2067_v63  ;;  %v2389_v42 = vrot.slane %v2387_v7, 1  ;;  %v366_v63 = vld [vmem:[%s8516_s23 + $0xf0] sm:$0xff]  ;;  %v895_v3 = vld [vmem:[#allocation2 + $0xbc] sm:$0x1] }
  0xf3   : > { %v2179_v37 = vpop.permute.xlu1 %2178  ;;  %v712_v56 = vrot.slane %v9389_v17, 4  ;;  %v717_v5 = vshll.u32 %v9369_v12, 16  ;;  %v367_v7 = vld [vmem:[%s8516_s23 + $0xf8] sm:$0xff]  ;;  %v1376_v17 = vrot.slane %v1374_v30, 1  ;;  %v9450_v29 = vpack.c.bf16 %v366_v63, %v366_v63  ;;  %v9483_v63 = vld [vmem:[#allocation2 + $0xac] sm:$0xf] }
  0xf4   : > { %1680 = vrot.lane.b32.xlu0 %v9270_v27, %s8298_s26  ;;  %v2676_v27 = vsel %vm2670_vm13, %v2643_v49, %v9316_v41  ;;  %v714_v41 = vshrl.u32 %v9369_v12, 16  ;;  %v2777_v55 = vsel %vm2769_vm1, %v2744_v20, %v2179_v37  ;;  %v892_v49 = vsel %vm8535_vm8, %v711_v48, %v891_v11  ;;  %v966_v48 = vld [vmem:[#allocation2 + $0x9c] sm:$0xe]  ;;  %v9462_v20 = vld [vmem:[#allocation2 + $0xa0] sm:$0xf] }
  0xf5   : > { %1682 = vrot.lane.b32.xlu1 %v9275_v22, %s8298_s26  ;;  %v1379_v22 = vshll.u32 %v9367_v14, 16  ;;  %v2709_v52 = vsel %vm2703_vm14, %v2676_v27, %v9334_v0  ;;  %v2392_v0 = vshll.u32 %v9402_v44, 16  ;;  %893 = vst [vmem:[#allocation2 + $0xb4] sm:$0xf] %v892_v49  ;;  %v1391_v11 = vshll.u32 %v9443_v15, 16 }
  0xf6   : > { %v2449_v31 = vpop.permute.xlu0 %2448  ;;  %v2742_v59 = vsel %vm2736_vm15, %v2709_v52, %v2065_v36  ;;  %v716_v2 = vrot.slane %v714_v41, 7  ;;  %v1386_v52 = vshll.u32 %v9423_v32, 16  ;;  %v993_v41 = vld [vmem:[#allocation2 + $0x9c] sm:$0xf] }
  0xf7   : > { %v2451_v21 = vpop.permute.xlu1 %2450  ;;  %v2775_v61 = vsel %vm2769_vm1, %v2742_v59, %v2177_v57  ;;  %v6930_v57 = vcombine.low %v1093_v38, %v9355_v58  ;;  %v2390_v58 = vor.u32 %v2389_v42, %v2385_v34  ;;  %v9464_v59 = vld [vmem:[#allocation2 + $0xa4] ss:$0 sps:$4 sm:$0x11]   ;;  %v2558_v34 = vrot.slane %v9402_v44, 1 }
  0xf8   : > { %1952 = vrot.lane.b32.xlu0 %v1871_v54, %s8302_s30  ;;  %v2810_v36 = vsel %vm2802_vm3, %v2777_v55, %v2451_v21  ;;  %v719_v27 = vor.u32 %v717_v5, %v716_v2  ;;  %v721_v12 = vrot.slane %v716_v2, 4  ;;  %v2394_v21 = vrot.slane %v2392_v0, 1  ;;  %v995_v55 = vld [vmem:[#allocation2 + $0xa8] sm:$0xf] }
  0xf9   : > { %1954 = vrot.lane.b32.xlu1 %v1883_v26, %s8302_s30  ;;  %v2808_v26 = vsel %vm2802_vm3, %v2775_v61, %v2449_v31  ;;  %v2378_v31 = vor.u32 %v9386_v9, %v2373_v1  ;;  %v2557_v9 = vrot.slane %v6930_v57, 1  ;;  %v1384_v0 = vshrl.u32 %v9423_v32, 16 }
  0xfa   : > { %v2577_v54 = vpop.permute.xlu0 %2576  ;;  %v720_v38 = vsel %vm8528_vm7, %v712_v56, %v719_v27  ;;  %v896_v1 = vsel %vm8553_vm9, %v721_v12, %v895_v3  ;;  %v9478_v61 = vpack.c.bf16 %v367_v7, %v367_v7  ;;  %v2395_v42 = vsel %vm1226_vm4, %v2390_v58, %v2394_v21  ;;  %v9518_v12 = vld [vmem:[#allocation2 + $0xb0] ss:$0 sps:$4 sm:$0x11]  }
  0xfb   : > { %v2579_v43 = vpop.permute.xlu1 %2578  ;;  %v2841_v37 = vsel %vm2835_vm10, %v2808_v26, %v2577_v54  ;;  %894 = vst.msk [vmem:[#allocation2 + $0xb8] sm:$0xf] %vm226_vm0, %v720_v38  ;;  %897 = vst [vmem:[#allocation2 + $0xbc] sm:$0x1] %v896_v1  ;;  %v2383_v44 = vsel %vm1226_vm4, %v2378_v31, %v9404_v40  ;;  %v1388_v2 = vrot.slane %v1386_v52, 1  ;;  %v6836_v26 = vcombine.low %v966_v48, %v9406_v16 }
  0xfc   : > { %v2843_v51 = vsel %vm2835_vm10, %v2810_v36, %v2579_v43  ;;  %2080 = vrot.lane.b32.xlu0 %v2044_v46, %s8300_s28  ;;  %7773 = vmatprep.mubr.msk.bf16.mxu0 %vm2895_vm2, %v2841_v37  ;;  %v2556_v54 = vsel %vm1499_vm6, %v9381_v18, %v2555_v53  ;;  %v1377_v40 = vor.u32 %v1376_v17, %v1372_v45  ;;  %v1381_v56 = vrot.slane %v1379_v22, 1  ;;  %v1029_v53 = vld [vmem:[#allocation2 + $0x9c] sm:$0xe]  ;;  %v1058_v38 = vld [vmem:[#allocation2 + $0xa8] sm:$0xf] }
  0xfd   : > { %2082 = vrot.lane.b32.xlu1 %v2047_v35, %s8300_s28  ;;  %v965_v35 = vld [vmem:[#allocation2 + $0x90] sm:$0xe]  ;;  %7774 = vmatmul.mubr.msk.bf16.gmra.mxu0 %vm2895_vm2, %v2843_v51  ;;  %v9501_v5 = vcombine.low %v993_v41, %v9462_v20  ;;  %v1393_v16 = vrot.slane %v1391_v11, 1  ;;  %v9507_v10 = vcombine.low %v995_v55, %v9483_v63  ;;  %v1892_v18 = vshll.u32 %v9464_v59, 16  ;;  %v1030_v41 = vld [vmem:[#allocation2 + $0xa8] sm:$0xe] }
  0xfe   : > { %v9460_v30 = vpop.permute.xlu0 %1427  ;;  %v6835_v43 = vcombine.low %v965_v35, %v9360_v62  ;;  %v2559_v62 = vsel %vm1499_vm6, %v2557_v9, %v2558_v34  ;;  %v1389_v45 = vor.u32 %v1388_v2, %v1384_v0  ;;  %v726_v22 = vshll.u32 %v9450_v29, 16  ;;  %v9534_v11 = vld [vmem:[#allocation2 + $0xb0] ss:$0 sps:$4 sm:$0x11]  }
  0xff   : > { %v9458_v46 = vpop.permute.xlu1 %1429  ;;  %v731_v37 = vshrl.u32 %v9478_v61, 16  ;;  %v1539_v3 = vrot.slane %v6836_v26, 1  ;;  %v1537_v17 = vrot.slane %v9367_v14, 1  ;;  %v1382_v27 = vsel %vm1226_vm4, %v1377_v40, %v1381_v56  ;;  %v898_v14 = vld [vmem:[#allocation2 + $0xc0] sm:$0xf] }
 0x100   : > { %2192 = vrot.lane.b32.xlu0 %v9341_v39, %s8299_s27  ;;  %v1536_v7 = vrot.slane %v6835_v43, 1  ;;  %v1887_v58 = vshll.u32 %v9501_v5, 16  ;;  %v6883_v21 = vcombine.low %v1029_v53, %v9462_v20  ;;  %v1899_v31 = vshll.u32 %v9507_v10, 16  ;;  %v902_v26 = vld [vmem:[#allocation2 + $0xc8] sm:$0x1] }
 0x101   : > { %2194 = vrot.lane.b32.xlu1 %v9375_v25, %s8299_s27  ;;  %v723_v25 = vshrl.u32 %v9450_v29, 16  ;;  %v1540_v29 = vrot.slane %v9443_v15, 1  ;;  %v1885_v52 = vshrl.u32 %v9501_v5, 16  ;;  %v1894_v48 = vrot.slane %v1892_v18, 1  ;;  %v9547_v18 = vld [vmem:[#allocation2 + $0xac] sm:$0xf] }
 0x102   : > { %v9488_v39 = vpop.permute.xlu0 %1556  ;;  %v1394_v35 = vsel %vm1226_vm4, %v1389_v45, %v1393_v16  ;;  %v733_v9 = vrot.slane %v731_v37, 7  ;;  %v734_v20 = vshll.u32 %v9478_v61, 16  ;;  %v2049_v15 = vrot.slane %v9464_v59, 1  ;;  %v933_v16 = vld [vmem:[#allocation2 + $0xa8] sm:$0xf] }
 0x103   : > { %v9486_v36 = vpop.permute.xlu1 %1558  ;;  %v725_v51 = vrot.slane %v723_v25, 7  ;;  %v1897_v55 = vshrl.u32 %v9507_v10, 16  ;;  %v2048_v2 = vrot.slane %v6883_v21, 1  ;;  %v9538_v25 = vld [vmem:[#allocation2 + $0xac] sm:$0xf]  ;;  %v1901_v61 = vrot.slane %v1899_v31, 1 }
 0x104   : > { %2464 = vrot.lane.b32.xlu0 %v2383_v44, %s8303_s6  ;;  %v1889_v44 = vrot.slane %v1887_v58, 1  ;;  %v6884_v43 = vcombine.low %v1030_v41, %v9483_v63  ;;  %v1541_v40 = vsel %vm1499_vm6, %v1539_v3, %v1540_v29  ;;  %v1538_v56 = vsel %vm1499_vm6, %v1536_v7, %v1537_v17 }
 0x105   : > { %2466 = vrot.lane.b32.xlu1 %v2395_v42, %s8303_s6  ;;  %v728_v1 = vor.u32 %v726_v22, %v725_v51  ;;  %v1904_v42 = vshll.u32 %v9518_v12, 16  ;;  %v729_v59 = vrot.slane %v725_v51, 4  ;;  %v736_v53 = vor.u32 %v734_v20, %v733_v9 }
 0x106   : > { %v9514_v49 = vpop.permute.xlu0 %1668  ;;  %v2404_v63 = vshll.u32 %v9534_v11, 16  ;;  %v738_v51 = vrot.slane %v733_v9, 4  ;;  %v1890_v3 = vor.u32 %v1889_v44, %v1885_v52  ;;  %v2051_v7 = vrot.slane %v6884_v43, 1 }
 0x107   : > { %v9512_v57 = vpop.permute.xlu1 %1670  ;;  %v899_v45 = vsel %vm8535_vm8, %v728_v1, %v898_v14  ;;  %v2052_v17 = vrot.slane %v9518_v12, 1  ;;  %v737_v28 = vsel %vm8528_vm7, %v729_v59, %v736_v53  ;;  %v1902_v21 = vor.u32 %v1901_v61, %v1897_v55  ;;  %v1094_v14 = vld [vmem:[#allocation2 + $0xa8] sm:$0xe]  ;;  %v1095_v55 = vld [vmem:[#allocation2 + $0xb4] sm:$0xe] }
 0x108   : > { %2592 = vrot.lane.b32.xlu0 %v2556_v54, %s8301_s29  ;;  %v1060_v54 = vld [vmem:[#allocation2 + $0xb4] sm:$0xf]  ;;  %900 = vst [vmem:[#allocation2 + $0xc0] sm:$0xf] %v899_v45  ;;  %v903_v58 = vsel %vm8553_vm9, %v738_v51, %v902_v26  ;;  %v1906_v29 = vrot.slane %v1904_v42, 1  ;;  %v2561_v52 = vrot.slane %v9534_v11, 1  ;;  %v9572_v60 = vcombine.low %v933_v16, %v9547_v18 }
 0x109   : > { %2594 = vrot.lane.b32.xlu1 %v2559_v62, %s8301_s29  ;;  %v9545_v62 = vld [vmem:[#allocation2 + $0xb8] sm:$0xf]  ;;  %901 = vst.msk [vmem:[#allocation2 + $0xc4] sm:$0xf] %vm226_vm0, %v737_v28  ;;  %904 = vst [vmem:[#allocation2 + $0xc8] sm:$0x1] %v903_v58  ;;  %v1895_v9 = vsel %vm1226_vm4, %v1890_v3, %v1894_v48  ;;  %v2050_v20 = vsel %vm1499_vm6, %v2048_v2, %v2049_v15  ;;  %v2616_v42 = vsel %vm2604_vm11, %v8757_v8, %v9458_v46 }
 0x10a   : > { %v9531_v0 = vpop.permute.xlu0 %1940  ;;  %v9563_v31 = vcombine.low %v1060_v54, %v9545_v62  ;;  %v9569_v1 = vrot.slane %v2404_v63, 1  ;;  %v2614_v44 = vsel %vm2604_vm11, %v8754_v6, %v9460_v30  ;;  %v6931_v26 = vcombine.low %v1094_v14, %v9538_v25  ;;  %v935_v48 = vld [vmem:[#allocation2 + $0xb4] sm:$0xf]  ;;  %v9592_v46 = vld [vmem:[#allocation2 + $0xbc] ss:$0 sps:$4 sm:$0x11]  }
 0x10b   : > { %v9529_v34 = vpop.permute.xlu1 %1942  ;;  %v2649_v15 = vsel %vm2637_vm12, %v2616_v42, %v9486_v36  ;;  %v2647_v2 = vsel %vm2637_vm12, %v2614_v44, %v9488_v39  ;;  %v1907_v8 = vsel %vm1226_vm4, %v1902_v21, %v1906_v29  ;;  %v9595_v30 = vld [vmem:[#allocation2 + $0xb8] sm:$0xf]  ;;  %v1398_v43 = vshll.u32 %v9572_v60, 16  ;;  %v9626_v58 = vld [vmem:[#allocation2 + $0xbc] ss:$0 sps:$4 sm:$0x11]  }
 0x10c   : > { %1443 = vrot.lane.b32.xlu0 %v1382_v27, %s8297_s25  ;;  %v9552_v27 = vcombine.low %v1058_v38, %v9538_v25  ;;  %v2411_v6 = vshll.u32 %v9563_v31, 16  ;;  %v2053_v59 = vsel %vm1499_vm6, %v2051_v7, %v2052_v17  ;;  %v9614_v16 = vcombine.low %v935_v48, %v9595_v30  ;;  %v967_v21 = vld [vmem:[#allocation2 + $0xa8] sm:$0xe]  ;;  %v8029_v29 = vld [vmem:[%s11087_s3 + $0x78] sm:$0xff]   ;;  %v968_v48 = vld [vmem:[#allocation2 + $0xb4] sm:$0xe] }
 0x10d   : > { %1445 = vrot.lane.b32.xlu1 %v1394_v35, %s8297_s25  ;;  %v2416_v45 = vshll.u32 %v9592_v46, 16  ;;  %v2560_v3 = vrot.slane %v6931_v26, 1  ;;  %v1396_v7 = vshrl.u32 %v9572_v60, 16  ;;  %7291 = vmatprep.subr.bf16.mxu1 %v8029_v29  ;;  %vm3542_vm0 = vcmask 1043456  }
 0x10e   : > { %v2069_v37 = vpop.permute.xlu0 %2068  ;;  %v2397_v12 = vshrl.u32 %v9552_v27, 16  ;;  %v2399_v38 = vshll.u32 %v9552_v27, 16  ;;  %v1410_v14 = vshll.u32 %v9614_v16, 16  ;;  %vm9986_vm8 = vmand %vm3542_vm0, %vm789_vm5  ;;  %vm3548_vm9 = vcmask 1040384  }
 0x10f   : > { %v2071_v22 = vpop.permute.xlu1 %2070  ;;  %v2418_v42 = vrot.slane %v2416_v45, 1  ;;  %vm11099_vm5 = vsmask.f32 256 }
 0x110   : > { %1572 = vrot.lane.b32.xlu0 %v1538_v56, %s8296_s24  ;;  %v2401_v36 = vrot.slane %v2399_v38, 1  ;;  %vm9994_vm0 = vmand %vm3548_vm9, %vm11099_vm5 }
 0x111   : > { %1574 = vrot.lane.b32.xlu1 %v1541_v40, %s8296_s24  ;;  %v6932_v40 = vcombine.low %v1095_v55, %v9545_v62  ;;  %v2413_v62 = vrot.slane %v2411_v6, 1  ;;  %v1064_v6 = vld [vmem:[#allocation2 + $0xcc] sm:$0xf] }
 0x112   : > { %v2181_v41 = vpop.permute.xlu0 %2180  ;;  %v2402_v44 = vor.u32 %v2401_v36, %v2397_v12  ;;  %v1408_v12 = vshrl.u32 %v9614_v16, 16  ;;  %v1412_v36 = vrot.slane %v1410_v14, 1 }
 0x113   : > { %v2183_v35 = vpop.permute.xlu1 %2182  ;;  %v2563_v26 = vrot.slane %v6932_v40, 1 }
 0x114   : > { %1684 = vrot.lane.b32.xlu0 %v9501_v5, %s8298_s26  ;;  %v2682_v5 = vsel %vm2670_vm13, %v2649_v15, %v9512_v57 }
 0x115   : > { %1686 = vrot.lane.b32.xlu1 %v9507_v10, %s8298_s26  ;;  %v2680_v10 = vsel %vm2670_vm13, %v2647_v2, %v9514_v49  ;;  %v2715_v39 = vsel %vm2703_vm14, %v2682_v5, %v9529_v34  ;;  %v2409_v49 = vshrl.u32 %v9563_v31, 16  ;;  %v9616_v34 = vld [vmem:[#allocation2 + $0xb0] ss:$0 sps:$4 sm:$0x11]   ;;  %v997_v2 = vld [vmem:[#allocation2 + $0xb4] sm:$0xf] }
 0x116   : > { %v2453_v61 = vpop.permute.xlu0 %2452  ;;  %v2713_v54 = vsel %vm2703_vm14, %v2680_v10, %v9531_v0  ;;  %v2748_v57 = vsel %vm2736_vm15, %v2715_v39, %v2071_v22  ;;  %v1543_v38 = vrot.slane %v9616_v34, 1  ;;  %v9647_v5 = vld [vmem:[#allocation2 + $0xd0] sm:$0xf]  ;;  %v2564_v10 = vrot.slane %v9592_v46, 1  ;;  %v999_v46 = vld [vmem:[#allocation2 + $0xc0] sm:$0xf] }
 0x117   : > { %v2455_v25 = vpop.permute.xlu1 %2454  ;;  %v2746_v56 = vsel %vm2736_vm15, %v2713_v54, %v2069_v37  ;;  %v2781_v0 = vsel %vm2769_vm1, %v2748_v57, %v2183_v35  ;;  %v1400_v35 = vrot.slane %v1398_v43, 1  ;;  %v2414_v55 = vor.u32 %v2413_v62, %v2409_v49  ;;  %v9661_v54 = vld [vmem:[#allocation2 + $0xc4] sm:$0xf] }
 0x118   : > { %1956 = vrot.lane.b32.xlu0 %v1895_v9, %s8302_s30  ;;  %v2779_v53 = vsel %vm2769_vm1, %v2746_v56, %v2181_v41  ;;  %v2814_v22 = vsel %vm2802_vm3, %v2781_v0, %v2455_v25  ;;  %v1403_v41 = vshll.u32 %v9616_v34, 16  ;;  %v8030_v9 = vld [vmem:[%s11087_s3 + $0x38] sm:$0xff]   ;;  %v1415_v25 = vshll.u32 %v9626_v58, 16 }
 0x119   : > { %1958 = vrot.lane.b32.xlu1 %v1907_v8, %s8302_s30  ;;  %v2812_v37 = vsel %vm2802_vm3, %v2779_v53, %v2453_v61  ;;  %v9645_v8 = vld [vmem:[#allocation2 + $0xb8] sm:$0xf]  ;;  %7292 = vmatpush3.bf16.msra.mxu1 %v8030_v9  ;;  %v8031_v61 = vld [vmem:[%s11087_s3 + $0x70] sm:$0xff]   ;;  %v6838_v43 = vcombine.low %v968_v48, %v9595_v30  ;;  %v6837_v39 = vcombine.low %v967_v21, %v9547_v18  ;;  %v9673_v30 = vld [vmem:[#allocation2 + $0xbc] ss:$0 sps:$4 sm:$0x11]  }
 0x11a   : > { %v2581_v51 = vpop.permute.xlu0 %2580  ;;  %v2419_v40 = vsel %vm1226_vm4, %v2414_v55, %v2418_v42  ;;  %7293 = vmatprep.subr.bf16.mxu1 %v8031_v61  ;;  %v2562_v18 = vsel %vm1499_vm6, %v2560_v3, %v2561_v52  ;;  %v1405_v56 = vrot.slane %v1403_v41, 1  ;;  %v9679_v49 = vcombine.low %v997_v2, %v9645_v8  ;;  %v8034_v52 = vld [vmem:[%s11087_s3 + $0x28] sm:$0xff]   ;;  %v1031_v21 = vld [vmem:[#allocation2 + $0xb4] sm:$0xe]  ;;  %v8038_v9 = vld [vmem:[%s11087_s3 + $0x20] sm:$0xff]  }
 0x11b   : > { %v2583_v63 = vpop.permute.xlu1 %2582  ;;  %v2845_v28 = vsel %vm2835_vm10, %v2812_v37, %v2581_v51  ;;  %v9682_v0 = vcombine.low %v1064_v6, %v9647_v5  ;;  %v1417_v53 = vrot.slane %v1415_v25, 1  ;;  %v1401_v62 = vor.u32 %v1400_v35, %v1396_v7  ;;  %v8036_v7 = vld [vmem:[%s11087_s3 + $0xb8] sm:$0xff]   ;;  %v9714_v35 = vld [vmem:[#allocation2 + $0xc8] ss:$0 sps:$4 sm:$0x11]   ;;  %v8039_v55 = vld [vmem:[%s11087_s3 + $0xf0] sm:$0xff]  }
 0x11c   : > { %v2847_v17 = vsel %vm2835_vm10, %v2814_v22, %v2583_v63  ;;  %2084 = vrot.lane.b32.xlu0 %v2050_v20, %s8300_s28  ;;  %7777 = vmatprep.mubr.msk.bf16.mxu0 %vm2895_vm2, %v2845_v28  ;;  %v1545_v11 = vrot.slane %v6838_v43, 1  ;;  %v1542_v45 = vrot.slane %v6837_v39, 1  ;;  %v8035_v22 = vld [vmem:[%s11087_s3 + $0xf8] sm:$0xff]   ;;  %v2565_v37 = vsel %vm1499_vm6, %v2563_v26, %v2564_v10  ;;  %v8040_v2 = vld [vmem:[%s11087_s3 + $0xb0] sm:$0xff]  }
 0x11d   : > { %2086 = vrot.lane.b32.xlu1 %v2053_v59, %s8300_s28  ;;  %7778 = vmatmul.mubr.msk.bf16.gmra.mxu0 %vm2895_vm2, %v2847_v17  ;;  %v8032_v59 = vld [vmem:[%s11087_s3 + $0x30] sm:$0xff]   ;;  %v1413_v63 = vor.u32 %v1412_v36, %v1408_v12  ;;  %v1546_v51 = vrot.slane %v9626_v58, 1  ;;  %v9698_v3 = vcombine.low %v999_v46, %v9661_v54  ;;  %v1911_v29 = vshll.u32 %v9679_v49, 16  ;;  %v8037_v58 = vld [vmem:[%s11087_s3 + $0x60] sm:$0xff]   ;;  %v8041_v39 = vld [vmem:[%s11087_s3 + $0x58] sm:$0xff]  }
 0x11e   : > { %v9643_v15 = vpop.permute.xlu0 %1431  ;;  %7294 = vmatpush3.bf16.msra.mxu1 %v8032_v59  ;;  %7403 = vmatprep.subr.bf16.mxu0 %v8035_v22  ;;  %v1406_v14 = vsel %vm1226_vm4, %v1401_v62, %v1405_v56  ;;  %v1916_v41 = vshll.u32 %v9673_v30, 16  ;;  %v1909_v26 = vshrl.u32 %v9679_v49, 16  ;;  %v2435_v48 = vshll.u32 %v9682_v0, 16  ;;  %v1032_v12 = vld [vmem:[#allocation2 + $0xc0] sm:$0xe] }
 0x11f   : > { %v9641_v20 = vpop.permute.xlu1 %1433  ;;  %7404 = vmatpush3.bf16.msra.mxu0 %v8036_v7  ;;  %v1418_v42 = vsel %vm1226_vm4, %v1413_v63, %v1417_v53  ;;  %v1913_v25 = vrot.slane %v1911_v29, 1  ;;  %v6885_v61 = vcombine.low %v1031_v21, %v9645_v8  ;;  %v1062_v36 = vld [vmem:[#allocation2 + $0xc0] sm:$0xf]  ;;  %v9735_v43 = vld [vmem:[#allocation2 + $0xd4] ss:$0 sps:$4 sm:$0x11]   ;;  %v1544_v56 = vsel %vm1499_vm6, %v1542_v45, %v1543_v38 }
 0x120   : > { %2196 = vrot.lane.b32.xlu0 %v9552_v27, %s8299_s27  ;;  %7405 = vmatprep.subr.bf16.mxu0 %v8039_v55  ;;  %v1921_v46 = vshrl.u32 %v9698_v3, 16  ;;  %v1928_v59 = vshll.u32 %v9714_v35, 16  ;;  %v8042_v8 = vld [vmem:[%s11087_s3 + $0x18] sm:$0xff]   ;;  %v8044_v53 = vld [vmem:[%s11087_s3 + $0xa8] sm:$0xff]   ;;  %v1918_v22 = vrot.slane %v1916_v41, 1  ;;  %v2055_v34 = vrot.slane %v9673_v30, 1 }
 0x121   : > { %2198 = vrot.lane.b32.xlu1 %v9563_v31, %s8299_s27  ;;  %v2407_v31 = vsel %vm1226_vm4, %v2402_v44, %v9569_v1  ;;  %v8033_v1 = vld [vmem:[%s11087_s3 + $0x68] sm:$0xff]   ;;  %v1923_v44 = vshll.u32 %v9698_v3, 16  ;;  %v2054_v63 = vrot.slane %v6885_v61, 1  ;;  %v8045_v38 = vld [vmem:[%s11087_s3 + $0x50] sm:$0xff]   ;;  %v8047_v30 = vld [vmem:[%s11087_s3 + $0xe0] sm:$0xff]   ;;  %v2620_v61 = vsel %vm2604_vm11, %v8875_v47, %v9641_v20 }
 0x122   : > { %v9671_v27 = vpop.permute.xlu0 %1560  ;;  %7295 = vmatprep.subr.bf16.mxu1 %v8033_v1  ;;  %v9774_v7 = vld [vmem:[#allocation2 + $0xc8] ss:$0 sps:$4 sm:$0x11]   ;;  %v1930_v29 = vrot.slane %v1928_v59, 1  ;;  %v8048_v41 = vld [vmem:[%s11087_s3 + $0xa0] sm:$0xff]   ;;  %v8051_v47 = vld [vmem:[%s11087_s3 + $0xd8] sm:$0xff]  }
 0x123   : > { %v9669_v57 = vpop.permute.xlu1 %1562  ;;  %7296 = vmatpush3.bf16.msra.mxu1 %v8034_v52  ;;  %7406 = vmatpush3.bf16.msra.mxu0 %v8040_v2  ;;  %v1925_v1 = vrot.slane %v1923_v44, 1  ;;  %v9788_v44 = vld [vmem:[#allocation3 + $0x4] sm:$0xf]  ;;  %v8050_v59 = vld [vmem:[%s11087_s3 + $0x8] sm:$0xff]  }
 0x124   : > { %2468 = vrot.lane.b32.xlu0 %v2407_v31, %s8303_s6  ;;  %7297 = vmatprep.subr.bf16.mxu1 %v8037_v58  ;;  %v8043_v31 = vld [vmem:[%s11087_s3 + $0xe8] sm:$0xff]   ;;  %v9782_v58 = vrot.slane %v2435_v48, 1  ;;  %v2056_v48 = vsel %vm1499_vm6, %v2054_v63, %v2055_v34  ;;  %v8055_v63 = vld [vmem:[%s11087_s3 + $0xd0] sm:$0xff]  }
 0x125   : > { %2470 = vrot.lane.b32.xlu1 %v2419_v40, %s8303_s6  ;;  %v9744_v40 = vld [vmem:[#allocation2 + $0xc4] sm:$0xf]  ;;  %7407 = vmatprep.subr.bf16.mxu0 %v8043_v31  ;;  %v1926_v21 = vor.u32 %v1925_v1, %v1921_v46 }
 0x126   : > { %v9705_v28 = vpop.permute.xlu0 %1672  ;;  %v9771_v45 = vcombine.low %v1062_v36, %v9744_v40  ;;  %v2618_v36 = vsel %vm2604_vm11, %v8857_v19, %v9643_v15  ;;  %v2653_v19 = vsel %vm2637_vm12, %v2620_v61, %v9669_v57 }
 0x127   : > { %v9703_v17 = vpop.permute.xlu1 %1674  ;;  %7298 = vmatpush3.bf16.msra.mxu1 %v8038_v9  ;;  %7408 = vmatpush3.bf16.msra.mxu0 %v8044_v53  ;;  %v2651_v20 = vsel %vm2637_vm12, %v2618_v36, %v9671_v27  ;;  %v1931_v15 = vsel %vm1226_vm4, %v1926_v21, %v1930_v29 }
 0x128   : > { %2596 = vrot.lane.b32.xlu0 %v2562_v18, %s8301_s29  ;;  %v1547_v18 = vsel %vm1499_vm6, %v1545_v11, %v1546_v51  ;;  %7299 = vmatprep.subr.bf16.mxu1 %v8041_v39  ;;  %v6886_v11 = vcombine.low %v1032_v12, %v9661_v54  ;;  %v2433_v51 = vshrl.u32 %v9682_v0, 16  ;;  %v8046_v54 = vld [vmem:[%s11087_s3 + $0x10] sm:$0xff]   ;;  %v8049_v12 = vld [vmem:[%s11087_s3 + $0x48] sm:$0xff]   ;;  %v2058_v39 = vrot.slane %v9714_v35, 1 }
 0x129   : > { %2598 = vrot.lane.b32.xlu1 %v2565_v37, %s8301_s29  ;;  %v1914_v37 = vor.u32 %v1913_v25, %v1909_v26  ;;  %7409 = vmatprep.subr.bf16.mxu0 %v8047_v30  ;;  %v2423_v46 = vshll.u32 %v9771_v45, 16  ;;  %v2684_v57 = vsel %vm2670_vm13, %v2651_v20, %v9705_v28  ;;  %v2421_v27 = vshrl.u32 %v9771_v45, 16  ;;  %v8056_v30 = vld [vmem:[%s11087_s3 + $0x90] sm:$0xff]  }
 0x12a   : > { %v9732_v10 = vpop.permute.xlu0 %1944  ;;  %v2057_v2 = vrot.slane %v6886_v11, 1 }
 0x12b   : > { %v9730_v6 = vpop.permute.xlu1 %1946  ;;  %7300 = vmatpush3.bf16.msra.mxu1 %v8042_v8  ;;  %v1919_v26 = vsel %vm1226_vm4, %v1914_v37, %v1918_v22  ;;  %7410 = vmatpush3.bf16.msra.mxu0 %v8048_v41  ;;  %v2686_v8 = vsel %vm2670_vm13, %v2653_v19, %v9703_v17  ;;  %v2717_v53 = vsel %vm2703_vm14, %v2684_v57, %v9732_v10  ;;  %v8053_v17 = vld [vmem:[%s11087_s3 + $0x40] sm:$0xff]   ;;  %v3706_v57 = vld [vmem:[#allocation3] sm:$0xe] }
 0x12c   : > { %1447 = vrot.lane.b32.xlu0 %v1406_v14, %s8297_s25  ;;  %v2440_v14 = vshll.u32 %v9735_v43, 16  ;;  %7301 = vmatprep.subr.bf16.mxu1 %v8045_v38  ;;  %v2719_v1 = vsel %vm2703_vm14, %v2686_v8, %v9730_v6  ;;  %v2059_v6 = vsel %vm1499_vm6, %v2057_v2, %v2058_v39  ;;  %v8054_v10 = vld [vmem:[%s11087_s3] sm:$0xff]   ;;  %v2425_v38 = vrot.slane %v2423_v46, 1  ;;  %v8059_v46 = vld [vmem:[%s11087_s3 + $0xc8] sm:$0xff]  }
 0x12d   : > { %1449 = vrot.lane.b32.xlu1 %v1418_v42, %s8297_s25  ;;  %v3658_v42 = vld [vmem:[#allocation3] sm:$0xf]  ;;  %7411 = vmatprep.subr.bf16.mxu0 %v8051_v47  ;;  %v1096_v2 = vld [vmem:[#allocation2 + $0xc0] sm:$0xe] }
 0x12e   : > { %v9761_v52 = vpop.permute.xlu0 %2072  ;;  %v9796_v25 = vcombine.low %v3658_v42, %v9788_v44  ;;  %v2442_v61 = vrot.slane %v2440_v14, 1  ;;  %v2426_v47 = vor.u32 %v2425_v38, %v2421_v27 }
 0x12f   : > { %v9759_v62 = vpop.permute.xlu1 %2074  ;;  %7302 = vmatpush3.bf16.msra.mxu1 %v8046_v54  ;;  %v2750_v11 = vsel %vm2736_vm15, %v2717_v53, %v9761_v52  ;;  %v1097_v54 = vld [vmem:[#allocation2 + $0xcc] sm:$0xe] }
 0x130   : > { %1576 = vrot.lane.b32.xlu0 %v1544_v56, %s8296_s24  ;;  %7303 = vmatprep.subr.bf16.mxu1 %v8049_v12  ;;  %v3998_v35 = vshll.u32 %v9796_v25, 16  ;;  %v2428_v56 = vshll.u32 %v9774_v7, 16  ;;  %v3996_v28 = vshrl.u32 %v9796_v25, 16  ;;  %v2752_v37 = vsel %vm2736_vm15, %v2719_v1, %v9759_v62 }
 0x131   : > { %1578 = vrot.lane.b32.xlu1 %v1547_v18, %s8296_s24  ;;  %v6934_v36 = vcombine.low %v1097_v54, %v9647_v5  ;;  %v8060_v5 = vld [vmem:[%s11087_s3 + $0x88] sm:$0xff]  }
 0x132   : > { %v2185_v55 = vpop.permute.xlu0 %2184  ;;  %v4000_v22 = vrot.slane %v3998_v35, 1  ;;  %v2430_v19 = vrot.slane %v2428_v56, 1  ;;  %v2567_v35 = vrot.slane %v9774_v7, 1 }
 0x133   : > { %v2187_v9 = vpop.permute.xlu1 %2186  ;;  %7304 = vmatpush3.bf16.msra.mxu1 %v8050_v59  ;;  %v2783_v52 = vsel %vm2769_vm1, %v2750_v11, %v2185_v55  ;;  %v2438_v59 = vor.u32 %v9782_v58, %v2433_v51  ;;  %v2569_v51 = vrot.slane %v6934_v36, 1 }
 0x134   : > { %1688 = vrot.lane.b32.xlu0 %v9679_v49, %s8298_s26  ;;  %v8052_v49 = vld [vmem:[%s11087_s3 + $0x98] sm:$0xff]   ;;  %v2785_v62 = vsel %vm2769_vm1, %v2752_v37, %v2187_v9  ;;  %7305 = vmatprep.subr.bf16.mxu1 %v8053_v17  ;;  %v4001_v21 = vor.u32 %v4000_v22, %v3996_v28 }
 0x135   : > { %1690 = vrot.lane.b32.xlu1 %v9698_v3, %s8298_s26  ;;  %v9824_v3 = vld [vmem:[#allocation3 + $0x8] ss:$0 sps:$4 sm:$0x11]   ;;  %7412 = vmatpush3.bf16.msra.mxu0 %v8052_v49  ;;  %v2443_v58 = vsel %vm1226_vm4, %v2438_v59, %v2442_v61  ;;  %s10992_s26 = scalar_lea.vmem %s11089_s5, %s7206_s20 }
 0x136   : > { %v2457_v18 = vpop.permute.xlu0 %2456  ;;  %v4003_v34 = vshll.u32 %v9824_v3, 16  ;;  %7413 = vmatprep.subr.bf16.mxu0 %v8055_v63 }
 0x137   : > { %v2459_v31 = vpop.permute.xlu1 %2458  ;;  %v2816_v41 = vsel %vm2802_vm3, %v2783_v52, %v2457_v18  ;;  %7306 = vmatpush3.bf16.msra.mxu1 %v8054_v10 }
 0x138   : > { %1960 = vrot.lane.b32.xlu0 %v1919_v26, %s8302_s30  ;;  %v2818_v29 = vsel %vm2802_vm3, %v2785_v62, %v2459_v31  ;;  %v4005_v9 = vrot.slane %v4003_v34, 1  ;;  %v7019_v31 = vcombine.low %v3706_v57, %v9788_v44 }
 0x139   : > { %1962 = vrot.lane.b32.xlu1 %v1931_v15, %s8302_s30  ;;  %7414 = vmatpush3.bf16.msra.mxu0 %v8056_v30  ;;  %v2431_v15 = vsel %vm1226_vm4, %v2426_v47, %v2430_v19 }
 0x13a   : > { %v2585_v26 = vpop.permute.xlu0 %2584  ;;  %v4006_v39 = vsel %vm1226_vm4, %v4001_v21, %v4005_v9  ;;  %7415 = vmatprep.subr.bf16.mxu0 %v8059_v46  ;;  %v4251_v27 = vrot.slane %v7019_v31, 1 }
 0x13b   : > { %v2587_v42 = vpop.permute.xlu1 %2586  ;;  %v2849_v12 = vsel %vm2835_vm10, %v2816_v41, %v2585_v26  ;;  %5858 = vmatprep.mubr.bf16.mxu1 %v4006_v39 }
 0x13c   : > { %v2851_v55 = vsel %vm2835_vm10, %v2818_v29, %v2587_v42  ;;  %2088 = vrot.lane.b32.xlu0 %v2056_v48, %s8300_s28  ;;  %7781 = vmatprep.mubr.msk.bf16.mxu0 %vm2895_vm2, %v2849_v12  ;;  %v6933_v48 = vcombine.low %v1096_v2, %v9744_v40  ;;  %v2570_v40 = vrot.slane %v9735_v43, 1  ;;  %v4252_v43 = vrot.slane %v9824_v3, 1 }
 0x13d   : > { %2090 = vrot.lane.b32.xlu1 %v2059_v6, %s8300_s28  ;;  %7782 = vmatmul.mubr.msk.bf16.gmra.mxu0 %vm2895_vm2, %v2851_v55 }
 0x13e   : > { %v1436_v20 = vpop.permute.xlu0 %1435  ;;  %5859 = vmatmul.mubr.bf16.vlgmr.msra.gmra.mxu1 %v9796_v25  ;;  %v2566_v49 = vrot.slane %v6933_v48, 1  ;;  %7416 = vmatpush3.bf16.msra.mxu0 %v8060_v5  ;;  %v8063_v25 = vld [vmem:[%s11087_s3 + $0xc0] sm:$0xff]   ;;  %v2571_v7 = vsel %vm1499_vm6, %v2569_v51, %v2570_v40  ;;  %v9904_v53 = vsel %vm1499_vm6, %v4251_v27, %v4252_v43 }
 0x13f   : > { %v1438_v14 = vpop.permute.xlu1 %1437  ;;  %7417 = vmatprep.subr.bf16.mxu0 %v8063_v25  ;;  %v2622_v6 = vsel %vm2604_vm11, %v9010_v13, %v1436_v20 }
 0x140   : > { %2200 = vrot.lane.b32.xlu0 %v9771_v45, %s8299_s27  ;;  %v8064_v45 = vld [vmem:[%s11087_s3 + $0x80] sm:$0xff]   ;;  %v2568_v18 = vsel %vm1499_vm6, %v2566_v49, %v2567_v35  ;;  %v2624_v11 = vsel %vm2604_vm11, %v9020_v33, %v1438_v14 }
 0x141   : > { %2202 = vrot.lane.b32.xlu1 %v9682_v0, %s8299_s27 }
 0x142   : > { %v1565_v0 = vpop.permute.xlu0 %1564  ;;  %7418 = vmatpush3.bf16.msra.mxu0 %v8064_v45 }
 0x143   : > { %v1567_v8 = vpop.permute.xlu1 %1566  ;;  %v2655_v63 = vsel %vm2637_vm12, %v2622_v6, %v1565_v0 }
 0x144   : > { %2472 = vrot.lane.b32.xlu0 %v2431_v15, %s8303_s6  ;;  %v2657_v10 = vsel %vm2637_vm12, %v2624_v11, %v1567_v8 }
 0x145   : > { %2474 = vrot.lane.b32.xlu1 %v2443_v58, %s8303_s6 }
 0x146   : > { %v1677_v1 = vpop.permute.xlu0 %1676 }
 0x147   : > { %v1679_v56 = vpop.permute.xlu1 %1678  ;;  %v2688_v62 = vsel %vm2670_vm13, %v2655_v63, %v1677_v1 }
 0x148   : > { %2600 = vrot.lane.b32.xlu0 %v2568_v18, %s8301_s29  ;;  %v2690_v34 = vsel %vm2670_vm13, %v2657_v10, %v1679_v56 }
 0x149   : > { %2602 = vrot.lane.b32.xlu1 %v2571_v7, %s8301_s29 }
 0x14a   : > { %v1949_v3 = vpop.permute.xlu0 %1948 }
 0x14b   : > { %v1951_v44 = vpop.permute.xlu1 %1950  ;;  %v2721_v30 = vsel %vm2703_vm14, %v2688_v62, %v1949_v3 }
 0x14c   : > { %v2723_v54 = vsel %vm2703_vm14, %v2690_v34, %v1951_v44 }
 0x14e   : > { %v2077_v28 = vpop.permute.xlu0 %2076 }
 0x14f   : > { %v2079_v17 = vpop.permute.xlu1 %2078  ;;  %v2754_v33 = vsel %vm2736_vm15, %v2721_v30, %v2077_v28 }
 0x150   : > { %v2756_v21 = vsel %vm2736_vm15, %v2723_v54, %v2079_v17 }
 0x152   : > { %v2189_v37 = vpop.permute.xlu0 %2188 }
 0x153   : > { %v2191_v22 = vpop.permute.xlu1 %2190  ;;  %v2787_v29 = vsel %vm2769_vm1, %v2754_v33, %v2189_v37 }
 0x154   : > { %v2789_v13 = vsel %vm2769_vm1, %v2756_v21, %v2191_v22 }
 0x156   : > { %v2461_v38 = vpop.permute.xlu0 %2460 }
 0x157   : > { %v2463_v52 = vpop.permute.xlu1 %2462  ;;  %v2820_v42 = vsel %vm2802_vm3, %v2787_v29, %v2461_v38 }
 0x158   : > { %v2822_v41 = vsel %vm2802_vm3, %v2789_v13, %v2463_v52 }
 0x15a   : > { %v2589_v2 = vpop.permute.xlu0 %2588 }
 0x15b   : > { %v2591_v26 = vpop.permute.xlu1 %2590  ;;  %v2853_v55 = vsel %vm2835_vm10, %v2820_v42, %v2589_v2 }
 0x15c   : > { %v2855_v9 = vsel %vm2835_vm10, %v2822_v41, %v2591_v26  ;;  %7785 = vmatprep.mubr.msk.bf16.mxu0 %vm2895_vm2, %v2853_v55 }
 0x15d   : > { %7786 = vmatmul.mubr.msk.bf16.gmra.mxu0 %vm2895_vm2, %v2855_v9 }
 0x15e   : > { %v1440_v61 = vpop.permute.xlu0 %1439 }
 0x15f   : > { %v1442_v12 = vpop.permute.xlu1 %1441  ;;  %v2626_v40 = vsel %vm2604_vm11, %v9164_v24, %v1440_v61 }
 0x160   : > { %v2628_v51 = vsel %vm2604_vm11, %v9181_v4, %v1442_v12 }
 0x162   : > { %v1569_v39 = vpop.permute.xlu0 %1568 }
 0x163   : > { %v1571_v36 = vpop.permute.xlu1 %1570  ;;  %v2659_v15 = vsel %vm2637_vm12, %v2626_v40, %v1569_v39 }
 0x164   : > { %v2661_v58 = vsel %vm2637_vm12, %v2628_v51, %v1571_v36 }
 0x166   : > { %v1681_v59 = vpop.permute.xlu0 %1680 }
 0x167   : > { %v1683_v46 = vpop.permute.xlu1 %1682  ;;  %v2692_v35 = vsel %vm2670_vm13, %v2659_v15, %v1681_v59 }
 0x168   : > { %v2694_v49 = vsel %vm2670_vm13, %v2661_v58, %v1683_v46  ;;  %v9970_v46 = vld [vmem:[%s11086_s2] ss:$0 sm:$0xff] }
 0x16a   : > { %v1953_v19 = vpop.permute.xlu0 %1952 }
 0x16b   : > { %v1955_v47 = vpop.permute.xlu1 %1954  ;;  %v2725_v45 = vsel %vm2703_vm14, %v2692_v35, %v1953_v19 }
 0x16c   : > { %v2727_v0 = vsel %vm2703_vm14, %v2694_v49, %v1955_v47 }
 0x16e   : > { %v2081_v5 = vpop.permute.xlu0 %2080 }
 0x16f   : > { %v2083_v48 = vpop.permute.xlu1 %2082  ;;  %v2758_v4 = vsel %vm2736_vm15, %v2725_v45, %v2081_v5 }
 0x170   : > { %v2760_v57 = vsel %vm2736_vm15, %v2727_v0, %v2083_v48 }
 0x172   : > { %v2193_v20 = vpop.permute.xlu0 %2192 }
 0x173   : > { %v2195_v14 = vpop.permute.xlu1 %2194  ;;  %v2791_v43 = vsel %vm2769_vm1, %v2758_v4, %v2193_v20 }
 0x174   : > { %v2793_v24 = vsel %vm2769_vm1, %v2760_v57, %v2195_v14 }
 0x176   : > { %v2465_v8 = vpop.permute.xlu0 %2464 }
 0x177   : > { %v2467_v25 = vpop.permute.xlu1 %2466  ;;  %v2824_v7 = vsel %vm2802_vm3, %v2791_v43, %v2465_v8 }
 0x178   : > { %v2826_v31 = vsel %vm2802_vm3, %v2793_v24, %v2467_v25 }
 0x17a   : > { %v2593_v27 = vpop.permute.xlu0 %2592 }
 0x17b   : > { %v2595_v18 = vpop.permute.xlu1 %2594  ;;  %v2857_v1 = vsel %vm2835_vm10, %v2824_v7, %v2593_v27 }
 0x17c   : > { %v2859_v56 = vsel %vm2835_vm10, %v2826_v31, %v2595_v18  ;;  %7789 = vmatprep.mubr.msk.bf16.mxu0 %vm2895_vm2, %v2857_v1 }
 0x17d   : > { %7790 = vmatmul.mubr.msk.bf16.gmra.mxu0 %vm2895_vm2, %v2859_v56  ;;  %v3553_v56 = vld [vmem:[#allocation3 + $0x18] sm:$0xf] }
 0x17e   : > { %v1444_v3 = vpop.permute.xlu0 %1443 }
 0x17f   : > { %v1446_v44 = vpop.permute.xlu1 %1445  ;;  %v2630_v38 = vsel %vm2604_vm11, %v9384_v50, %v1444_v3 }
 0x180   : > { %v2632_v52 = vsel %vm2604_vm11, %v9423_v32, %v1446_v44 }
 0x182   : > { %v1573_v28 = vpop.permute.xlu0 %1572 }
 0x183   : > { %v1575_v17 = vpop.permute.xlu1 %1574  ;;  %v2663_v30 = vsel %vm2637_vm12, %v2630_v38, %v1573_v28  ;;  %v3557_v38 = vld [vmem:[#allocation3 + $0x20] sm:$0x1] }
 0x184   : > { %v2665_v54 = vsel %vm2637_vm12, %v2632_v52, %v1575_v17 }
 0x186   : > { %v1685_v37 = vpop.permute.xlu0 %1684 }
 0x187   : > { %v1687_v22 = vpop.permute.xlu1 %1686  ;;  %v2696_v33 = vsel %vm2670_vm13, %v2663_v30, %v1685_v37 }
 0x188   : > { %v2698_v21 = vsel %vm2670_vm13, %v2665_v54, %v1687_v22  ;;  %v3544_v22 = vld [vmem:[#allocation3 + $0xc] sm:$0xf] }
 0x18a   : > { %v1957_v6 = vpop.permute.xlu0 %1956 }
 0x18b   : > { %v1959_v11 = vpop.permute.xlu1 %1958  ;;  %v2729_v42 = vsel %vm2703_vm14, %v2696_v33, %v1957_v6 }
 0x18c   : > { %v2731_v41 = vsel %vm2703_vm14, %v2698_v21, %v1959_v11 }
 0x18e   : > { %v2085_v63 = vpop.permute.xlu0 %2084 }
 0x18f   : > { %v2087_v10 = vpop.permute.xlu1 %2086  ;;  %v2762_v32 = vsel %vm2736_vm15, %v2729_v42, %v2085_v63 }
 0x190   : > { %v2764_v26 = vsel %vm2736_vm15, %v2731_v41, %v2087_v10 }
 0x192   : > { %v2197_v62 = vpop.permute.xlu0 %2196 }
 0x193   : > { %v2199_v34 = vpop.permute.xlu1 %2198  ;;  %v2795_v2 = vsel %vm2769_vm1, %v2762_v32, %v2197_v62 }
 0x194   : > { %v2797_v50 = vsel %vm2769_vm1, %v2764_v26, %v2199_v34 }
 0x196   : > { %v2469_v29 = vpop.permute.xlu0 %2468 }
 0x197   : > { %v2471_v13 = vpop.permute.xlu1 %2470  ;;  %v2828_v55 = vsel %vm2802_vm3, %v2795_v2, %v2469_v29 }
 0x198   : > { %v2830_v9 = vsel %vm2802_vm3, %v2797_v50, %v2471_v13  ;;  %v3550_v50 = vld [vmem:[#allocation3 + $0x14] sm:$0x1] }
 0x19a   : > { %v2597_v61 = vpop.permute.xlu0 %2596 }
 0x19b   : > { %v2599_v12 = vpop.permute.xlu1 %2598  ;;  %v2861_v39 = vsel %vm2835_vm10, %v2828_v55, %v2597_v61 }
 0x19c   : > { %v2863_v36 = vsel %vm2835_vm10, %v2830_v9, %v2599_v12  ;;  %7793 = vmatprep.mubr.msk.bf16.mxu0 %vm2895_vm2, %v2861_v39 }
 0x19d   : > { %7794 = vmatmul.mubr.msk.bf16.gmra.mxu0 %vm2895_vm2, %v2863_v36 }
 0x19e   : > { %v7771_v47 = vpop.f32.mrf.mxu0  ;;  %v9976_v48 = vpop.permute.xlu0 %1447 }
 0x19f   : > { %v9973_v59 = vpop.permute.xlu1 %1449  ;;  %v2975_v19 = vadd.f32 %v7771_v47, %v9970_v46  ;;  %v8103_v47 = vld [vmem:[%s11087_s3 + $0x178] sm:$0xff]  }
 0x1a0   : > { %v2966_v5 = vpop.f32.mrf.mxu0  ;;  %7515 = vmatprep.subr.bf16.mxu1 %v8103_v47 }
 0x1a1   : > { %v3095_v14 = vmax.f32 %v2975_v19, 0.0  ;;  %v2967_v20 = vadd.f32 %v9970_v46, %v2966_v5  ;;  %v8104_v19 = vld [vmem:[%s11087_s3 + $0x138] sm:$0xff]  }
 0x1a2   : > { %v7772_v40 = vpop.f32.mrf.mxu0  ;;  %v9982_v35 = vpop.permute.xlu0 %1576  ;;  %7516 = vmatpush3.bf16.msra.mxu1 %v8104_v19 }
 0x1a3   : > { %v9979_v51 = vpop.permute.xlu1 %1578  ;;  %v7242_v58 = vpack.c.bf16 %v3095_v14, %v3095_v14  ;;  %v3093_v15 = vmax.f32 %v2967_v20, 0.0  ;;  %v2978_v49 = vadd.f32 %v7772_v40, %v9970_v46  ;;  %v2636_v14 = vsel %vm2604_vm11, %v9614_v16, %v9973_v59  ;;  %v8105_v20 = vld [vmem:[%s11087_s3 + $0x170] sm:$0xff]  }
 0x1a4   : > { %v2969_v25 = vpop.f32.mrf.mxu0  ;;  %v2634_v40 = vsel %vm2604_vm11, %v9572_v60, %v9976_v48  ;;  %7517 = vmatprep.subr.bf16.mxu1 %v8105_v20 }
 0x1a5   : > { %v3239_v8 = vshrl.u32 %v7242_v58, 16  ;;  %v7240_v0 = vpack.c.bf16 %v3093_v15, %v3093_v15  ;;  %v3096_v45 = vmax.f32 %v2978_v49, 0.0  ;;  %v2970_v57 = vadd.f32 %v9970_v46, %v2969_v25 }
 0x1a6   : > { %v3242_v43 = vshll.u32 %v7242_v58, 16  ;;  %v1689_v18 = vpop.permute.xlu0 %1688  ;;  %v2669_v58 = vsel %vm2637_vm12, %v2636_v14, %v9979_v51  ;;  %v2667_v15 = vsel %vm2637_vm12, %v2634_v40, %v9982_v35 }
 0x1a7   : > { %v1691_v4 = vpop.permute.xlu1 %1690  ;;  %v3241_v24 = vrot.slane %v3239_v8, 7  ;;  %v3222_v31 = vshrl.u32 %v7240_v0, 16  ;;  %v7243_v7 = vpack.c.bf16 %v3096_v45, %v3096_v45  ;;  %v3094_v1 = vmax.f32 %v2970_v57, 0.0 }
 0x1a8   : > { %v3225_v17 = vshll.u32 %v7240_v0, 16  ;;  %v2702_v49 = vsel %vm2670_vm13, %v2669_v58, %v1691_v4  ;;  %v2700_v16 = vsel %vm2670_vm13, %v2667_v15, %v1689_v18 }
 0x1a9   : > { %v3244_v44 = vor.u32 %v3242_v43, %v3241_v24  ;;  %v3224_v3 = vrot.slane %v3222_v31, 7  ;;  %v3247_v28 = vshrl.u32 %v7243_v7, 16  ;;  %v7241_v37 = vpack.c.bf16 %v3094_v1, %v3094_v1 }
 0x1aa   : > { %v3250_v34 = vshll.u32 %v7243_v7, 16  ;;  %v1961_v62 = vpop.permute.xlu0 %1960  ;;  %v3245_v30 = vrot.slane %v3241_v24, 4 }
 0x1ab   : > { %v1963_v11 = vpop.permute.xlu1 %1962  ;;  %v3554_v6 = vsel %vm9986_vm8, %v3244_v44, %v3553_v56  ;;  %v3227_v10 = vor.u32 %v3225_v17, %v3224_v3  ;;  %v3249_v63 = vrot.slane %v3247_v28, 7  ;;  %v3230_v54 = vshrl.u32 %v7241_v37, 16 }
 0x1ac   : > { %3555 = vst [vmem:[#allocation3 + $0x18] sm:$0xf] %v3554_v6  ;;  %v3233_v41 = vshll.u32 %v7241_v37, 16  ;;  %v3228_v9 = vrot.slane %v3224_v3, 4  ;;  %v2735_v59 = vsel %vm2703_vm14, %v2702_v49, %v1963_v11  ;;  %v2733_v60 = vsel %vm2703_vm14, %v2700_v16, %v1961_v62  ;;  %v8108_v6 = vld [vmem:[%s11087_s3 + $0x130] sm:$0xff]  }
 0x1ad   : > { %v3545_v21 = vsel %vm9986_vm8, %v3227_v10, %v3544_v22  ;;  %v3252_v33 = vor.u32 %v3250_v34, %v3249_v63  ;;  %v3254_v13 = vrot.slane %v3249_v63, 4  ;;  %v3232_v29 = vrot.slane %v3230_v54, 7  ;;  %7518 = vmatpush3.bf16.msra.mxu1 %v8108_v6 }
 0x1ae   : > { %3546 = vst [vmem:[#allocation3 + $0xc] sm:$0xf] %v3545_v21  ;;  %v2089_v2 = vpop.permute.xlu0 %2088 }
 0x1af   : > { %v2091_v42 = vpop.permute.xlu1 %2090  ;;  %v3253_v26 = vsel %vm8528_vm7, %v3245_v30, %v3252_v33  ;;  %v3558_v32 = vsel %vm9994_vm0, %v3254_v13, %v3557_v38  ;;  %v3235_v55 = vor.u32 %v3233_v41, %v3232_v29  ;;  %v3237_v12 = vrot.slane %v3232_v29, 4 }
 0x1b0   : > { %3556 = vst [vmem:[#allocation3 + $0x1c] sm:$0xf] %v3253_v26  ;;  %3559 = vst [vmem:[#allocation3 + $0x20] sm:$0x1] %v3558_v32  ;;  %v2768_v48 = vsel %vm2736_vm15, %v2735_v59, %v2091_v42  ;;  %v2766_v35 = vsel %vm2736_vm15, %v2733_v60, %v2089_v2 }
 0x1b1   : > { %v3236_v61 = vsel %vm8528_vm7, %v3228_v9, %v3235_v55  ;;  %v3551_v36 = vsel %vm9994_vm0, %v3237_v12, %v3550_v50 }
 0x1b2   : > { %3547 = vst [vmem:[#allocation3 + $0x10] sm:$0xf] %v3236_v61  ;;  %3552 = vst [vmem:[#allocation3 + $0x14] sm:$0x1] %v3551_v36  ;;  %v2201_v5 = vpop.permute.xlu0 %2200 }
 0x1b3   : > { %v2203_v39 = vpop.permute.xlu1 %2202  ;;  %v3662_v0 = vld [vmem:[#allocation3 + $0x18] sm:$0xf]  ;;  %v2799_v43 = vsel %vm2769_vm1, %v2766_v35, %v2201_v5 }
 0x1b4   : > { %v2801_v4 = vsel %vm2769_vm1, %v2768_v48, %v2203_v39  ;;  %v3724_v47 = vld [vmem:[#allocation3 + $0x18] sm:$0xf]  ;;  %v3567_v48 = vld [vmem:[#allocation3 + $0x30] sm:$0xf] }
 0x1b5   : > { %v3660_v51 = vld [vmem:[#allocation3 + $0xc] sm:$0xf] }
 0x1b6   : > { %v2473_v8 = vpop.permute.xlu0 %2472  ;;  %v3722_v37 = vld [vmem:[#allocation3 + $0xc] sm:$0xf] }
 0x1b7   : > { %v2475_v25 = vpop.permute.xlu1 %2474  ;;  %v10030_v45 = vld [vmem:[#allocation3 + $0x1c] sm:$0xf]  ;;  %v10039_v24 = vld [vmem:[#allocation3 + $0x20] ss:$0 sps:$4 sm:$0x11]   ;;  %v2832_v1 = vsel %vm2802_vm3, %v2799_v43, %v2473_v8 }
 0x1b8   : > { %v10035_v57 = vcombine.low %v3662_v0, %v10030_v45  ;;  %v2834_v31 = vsel %vm2802_vm3, %v2801_v4, %v2475_v25  ;;  %v4027_v54 = vshll.u32 %v10039_v24, 16  ;;  %v3725_v2 = vld [vmem:[#allocation3 + $0x1c] sm:$0xf]  ;;  %v3707_v19 = vld [vmem:[#allocation3 + $0xc] sm:$0xe] }
 0x1b9   : > { %v3723_v18 = vld [vmem:[#allocation3 + $0x10] sm:$0xf]  ;;  %v10045_v28 = vld [vmem:[#allocation3 + $0x14] ss:$0 sps:$4 sm:$0x11]   ;;  %v10064_v14 = vcombine.low %v3724_v47, %v3725_v2  ;;  %v8120_v47 = vld [vmem:[%s11087_s3 + $0x1f8] sm:$0xff]  }
 0x1ba   : > { %v3661_v56 = vld [vmem:[#allocation3 + $0x10] sm:$0xf]  ;;  %v2601_v3 = vpop.permute.xlu0 %2600  ;;  %v4022_v11 = vshll.u32 %v10035_v57, 16  ;;  %v10053_v10 = vcombine.low %v3722_v37, %v3723_v18  ;;  %v4015_v62 = vshll.u32 %v10045_v28, 16  ;;  %v4020_v13 = vshrl.u32 %v10035_v57, 16  ;;  %7627 = vmatprep.subr.bf16.mxu0 %v8120_v47 }
 0x1bb   : > { %v2603_v7 = vpop.permute.xlu1 %2602  ;;  %v6988_v17 = vcombine.low %v3660_v51, %v3661_v56  ;;  %v2865_v22 = vsel %vm2835_vm10, %v2832_v1, %v2601_v3  ;;  %v4029_v55 = vrot.slane %v4027_v54, 1  ;;  %v7020_v20 = vcombine.low %v3707_v19, %v3661_v56  ;;  %v3788_v60 = vld [vmem:[#allocation3 + $0x1c] sm:$0xf]  ;;  %v3835_v56 = vld [vmem:[#allocation3 + $0x18] sm:$0xe] }
 0x1bc   : > { %v2867_v44 = vsel %vm2835_vm10, %v2834_v31, %v2603_v7  ;;  %7797 = vmatprep.mubr.msk.bf16.mxu0 %vm2895_vm2, %v2865_v22  ;;  %v4024_v38 = vrot.slane %v4022_v11, 1  ;;  %v4017_v41 = vrot.slane %v4015_v62, 1  ;;  %v4255_v4 = vrot.slane %v10045_v28, 1  ;;  %v3560_v1 = vld [vmem:[#allocation3 + $0x24] sm:$0xf] }
 0x1bd   : > { %v4010_v63 = vshll.u32 %v6988_v17, 16  ;;  %v7775_v34 = vpop.f32.mrf.mxu0  ;;  %7798 = vmatmul.mubr.msk.bf16.gmra.mxu0 %vm2895_vm2, %v2867_v44  ;;  %v4008_v21 = vshrl.u32 %v6988_v17, 16  ;;  %v4254_v35 = vrot.slane %v7020_v20, 1  ;;  %v3571_v11 = vld [vmem:[#allocation3 + $0x38] sm:$0x1] }
 0x1be   : > { %v2991_v30 = vadd.f32 %v7775_v34, %v9970_v46  ;;  %6019 = vmatprep.mubr.bf16.mxu0 %v10053_v10  ;;  %v4025_v50 = vor.u32 %v4024_v38, %v4020_v13  ;;  %v8173_v54 = vld [vmem:[#allocation3 + $0x20] ss:$0 sps:$4 sm:$0x11]   ;;  %v3581_v47 = vld [vmem:[#allocation3 + $0x48] sm:$0xf] }
 0x1bf   : > { %v4012_v33 = vrot.slane %v4010_v63, 1  ;;  %v2982_v29 = vpop.f32.mrf.mxu0  ;;  %v4256_v63 = vsel %vm1499_vm6, %v4254_v35, %v4255_v4 }
 0x1c0   : > { %v3099_v42 = vmax.f32 %v2991_v30, 0.0  ;;  %v2983_v26 = vadd.f32 %v9970_v46, %v2982_v29  ;;  %v4030_v49 = vsel %vm1226_vm4, %v4025_v50, %v4029_v55  ;;  %v3564_v29 = vld [vmem:[#allocation3 + $0x2c] sm:$0x1]  ;;  %v5180_v50 = vrot.slane %v8173_v54, 1  ;;  %v8118_v55 = vld [vmem:[%s11087_s3 + $0x128] sm:$0xff]  }
 0x1c1   : > { %v4013_v32 = vor.u32 %v4012_v33, %v4008_v21  ;;  %v7776_v9 = vpop.f32.mrf.mxu0 }
 0x1c2   : > { %v7246_v12 = vpack.c.bf16 %v3099_v42, %v3099_v42  ;;  %v3097_v61 = vmax.f32 %v2983_v26, 0.0  ;;  %v2994_v36 = vadd.f32 %v7776_v9, %v9970_v46  ;;  %v8117_v9 = vld [vmem:[%s11087_s3 + $0x168] sm:$0xff]  }
 0x1c3   : > { %v4018_v39 = vsel %vm1226_vm4, %v4013_v32, %v4017_v41  ;;  %v2985_v5 = vpop.f32.mrf.mxu0  ;;  %7519 = vmatprep.subr.bf16.mxu1 %v8117_v9 }
 0x1c4   : > { %5866 = vmatprep.mubr.bf16.mxu1 %v4018_v39  ;;  %v3273_v40 = vshrl.u32 %v7246_v12, 16  ;;  %v7244_v58 = vpack.c.bf16 %v3097_v61, %v3097_v61  ;;  %v3100_v15 = vmax.f32 %v2994_v36, 0.0  ;;  %v2986_v25 = vadd.f32 %v9970_v46, %v2985_v5  ;;  %v8119_v39 = vld [vmem:[%s11087_s3 + $0x160] sm:$0xff]   ;;  %7520 = vmatpush3.bf16.msra.mxu1 %v8118_v55 }
 0x1c5   : > { %5867 = vmatmul.mubr.bf16.gmra.mxu1 %v6988_v17  ;;  %6020 = vmatmul.mubr.bf16.vlgmr.msra.gmra.mxu0 %v9904_v53  ;;  %v3276_v59 = vshll.u32 %v7246_v12, 16  ;;  %v7115_v53 = vcombine.low %v3835_v56, %v3788_v60  ;;  %v3708_v12 = vld [vmem:[#allocation3 + $0x18] sm:$0xe] }
 0x1c6   : > { %5874 = vmatprep.mubr.bf16.mxu1 %v4030_v49  ;;  %v3275_v16 = vrot.slane %v3273_v40, 7  ;;  %v3256_v8 = vshrl.u32 %v7244_v58, 16  ;;  %v7247_v0 = vpack.c.bf16 %v3100_v15, %v3100_v15  ;;  %6027 = vmatprep.mubr.bf16.mxu0 %v10064_v14  ;;  %v3098_v51 = vmax.f32 %v2986_v25, 0.0 }
 0x1c7   : > { %v3259_v7 = vshll.u32 %v7244_v58, 16  ;;  %v5179_v41 = vrot.slane %v7115_v53, 1  ;;  %v7021_v36 = vcombine.low %v3708_v12, %v10030_v45  ;;  %7521 = vmatprep.subr.bf16.mxu1 %v8119_v39  ;;  %v4258_v15 = vrot.slane %v10039_v24, 1  ;;  %v8124_v24 = vld [vmem:[%s11087_s3 + $0x1b8] sm:$0xff]  }
 0x1c8   : > { %v3278_v43 = vor.u32 %v3276_v59, %v3275_v16  ;;  %v3258_v31 = vrot.slane %v3256_v8, 7  ;;  %v3281_v18 = vshrl.u32 %v7247_v0, 16  ;;  %v7245_v44 = vpack.c.bf16 %v3098_v51, %v3098_v51  ;;  %7628 = vmatpush3.bf16.msra.mxu0 %v8124_v24 }
 0x1c9   : > { %v3284_v37 = vshll.u32 %v7247_v0, 16  ;;  %v3279_v28 = vrot.slane %v3275_v16, 4  ;;  %v10092_v61 = vsel %vm1499_vm6, %v5179_v41, %v5180_v50  ;;  %v4257_v40 = vrot.slane %v7021_v36, 1 }
 0x1ca   : > { %v3568_v3 = vsel %vm9986_vm8, %v3278_v43, %v3567_v48  ;;  %v3261_v17 = vor.u32 %v3259_v7, %v3258_v31  ;;  %v3283_v22 = vrot.slane %v3281_v18, 7  ;;  %v3264_v6 = vshrl.u32 %v7245_v44, 16  ;;  %v8123_v43 = vld [vmem:[%s11087_s3 + $0x120] sm:$0xff]  }
 0x1cb   : > { %3569 = vst [vmem:[#allocation3 + $0x30] sm:$0xf] %v3568_v3  ;;  %v3267_v21 = vshll.u32 %v7245_v44, 16  ;;  %v3262_v42 = vrot.slane %v3258_v31, 4  ;;  %v4259_v31 = vsel %vm1499_vm6, %v4257_v40, %v4258_v15  ;;  %7522 = vmatpush3.bf16.msra.mxu1 %v8123_v43 }
 0x1cc   : > { %v3561_v34 = vsel %vm9986_vm8, %v3261_v17, %v3560_v1  ;;  %v3286_v62 = vor.u32 %v3284_v37, %v3283_v22  ;;  %v3288_v38 = vrot.slane %v3283_v22, 4  ;;  %v3266_v30 = vrot.slane %v3264_v6, 7 }
 0x1cd   : > { %5875 = vmatmul.mubr.bf16.gmra.mxu1 %v10035_v57  ;;  %3562 = vst [vmem:[#allocation3 + $0x24] sm:$0xf] %v3561_v34  ;;  %6028 = vmatmul.mubr.bf16.gmra.mxu0 %v4256_v63 }
 0x1ce   : > { %v3287_v33 = vsel %vm8528_vm7, %v3279_v28, %v3286_v62  ;;  %v3572_v13 = vsel %vm9994_vm0, %v3288_v38, %v3571_v11  ;;  %v3269_v26 = vor.u32 %v3267_v21, %v3266_v30  ;;  %v3271_v32 = vrot.slane %v3266_v30, 4 }
 0x1cf   : > { %3570 = vst [vmem:[#allocation3 + $0x34] sm:$0xf] %v3287_v33  ;;  %3573 = vst [vmem:[#allocation3 + $0x38] sm:$0x1] %v3572_v13 }
 0x1d0   : > { %v3270_v57 = vsel %vm8528_vm7, %v3262_v42, %v3269_v26  ;;  %v3565_v2 = vsel %vm9994_vm0, %v3271_v32, %v3564_v29 }
 0x1d1   : > { %3563 = vst [vmem:[#allocation3 + $0x28] sm:$0xf] %v3270_v57  ;;  %3566 = vst [vmem:[#allocation3 + $0x2c] sm:$0x1] %v3565_v2 }
 0x1d2   : > { %v3666_v19 = vld [vmem:[#allocation3 + $0x30] sm:$0xf] }
 0x1d3   : > { %v3728_v35 = vld [vmem:[#allocation3 + $0x30] sm:$0xf] }
 0x1d4   : > { %v3726_v20 = vld [vmem:[#allocation3 + $0x24] sm:$0xf] }
 0x1d5   : > { %v3664_v58 = vld [vmem:[#allocation3 + $0x24] sm:$0xf] }
 0x1d6   : > { %v10101_v5 = vld [vmem:[#allocation3 + $0x34] sm:$0xf]  ;;  %v10107_v49 = vld [vmem:[#allocation3 + $0x38] ss:$0 sps:$4 sm:$0x11]  }
 0x1d7   : > { %v10104_v45 = vcombine.low %v3666_v19, %v10101_v5  ;;  %v3709_v25 = vld [vmem:[#allocation3 + $0x24] sm:$0xe]  ;;  %v3729_v59 = vld [vmem:[#allocation3 + $0x34] sm:$0xf]  ;;  %v4051_v53 = vshll.u32 %v10107_v49, 16 }
 0x1d8   : > { %v3727_v16 = vld [vmem:[#allocation3 + $0x28] sm:$0xf]  ;;  %v8079_v48 = vld [vmem:[#allocation3 + $0x2c] ss:$0 sps:$4 sm:$0x11]   ;;  %v10120_v7 = vcombine.low %v3728_v35, %v3729_v59 }
 0x1d9   : > { %v3665_v8 = vld [vmem:[#allocation3 + $0x28] sm:$0xf]  ;;  %v10109_v0 = vcombine.low %v3726_v20, %v3727_v16  ;;  %v4046_v51 = vshll.u32 %v10104_v45, 16  ;;  %v4039_v56 = vshll.u32 %v8079_v48, 16  ;;  %v4044_v37 = vshrl.u32 %v10104_v45, 16 }
 0x1da   : > { %v6990_v60 = vcombine.low %v3664_v58, %v3665_v8  ;;  %v7022_v4 = vcombine.low %v3709_v25, %v3665_v8  ;;  %v4261_v28 = vrot.slane %v8079_v48, 1  ;;  %v4053_v21 = vrot.slane %v4051_v53, 1  ;;  %v3574_v25 = vld [vmem:[#allocation3 + $0x3c] sm:$0xf] }
 0x1db   : > { %6035 = vmatprep.mubr.bf16.mxu0 %v10109_v0  ;;  %v4048_v44 = vrot.slane %v4046_v51, 1  ;;  %v4041_v6 = vrot.slane %v4039_v56, 1  ;;  %v3585_v51 = vld [vmem:[#allocation3 + $0x50] sm:$0x1] }
 0x1dc   : > { %v4034_v18 = vshll.u32 %v6990_v60, 16  ;;  %6036 = vmatmul.mubr.bf16.gmra.mxu0 %v4259_v31  ;;  %v4032_v17 = vshrl.u32 %v6990_v60, 16  ;;  %v4260_v63 = vrot.slane %v7022_v4, 1 }
 0x1dd   : > { %v7779_v1 = vpop.f32.mrf.mxu0  ;;  %6043 = vmatprep.mubr.bf16.mxu0 %v10120_v7  ;;  %v4049_v54 = vor.u32 %v4048_v44, %v4044_v37  ;;  %v8182_v44 = vld [vmem:[#allocation3 + $0x38] ss:$0 sps:$4 sm:$0x11]  }
 0x1de   : > { %v3007_v3 = vadd.f32 %v7779_v1, %v9970_v46  ;;  %v4036_v22 = vrot.slane %v4034_v18, 1  ;;  %v4262_v26 = vsel %vm1499_vm6, %v4260_v63, %v4261_v28  ;;  %v3792_v18 = vld [vmem:[#allocation3 + $0x34] sm:$0xf]  ;;  %v3837_v63 = vld [vmem:[#allocation3 + $0x30] sm:$0xe] }
 0x1df   : > { %v2998_v11 = vpop.f32.mrf.mxu0  ;;  %v4054_v2 = vsel %vm1226_vm4, %v4049_v54, %v4053_v21  ;;  %v7117_v28 = vcombine.low %v3837_v63, %v3792_v18  ;;  %v8133_v54 = vld [vmem:[%s11087_s3 + $0x158] sm:$0xff]   ;;  %v5186_v21 = vrot.slane %v8182_v44, 1  ;;  %v8142_v44 = vld [vmem:[%s11087_s3 + $0x1a8] sm:$0xff]  }
 0x1e0   : > { %v3103_v34 = vmax.f32 %v3007_v3, 0.0  ;;  %v2999_v62 = vadd.f32 %v9970_v46, %v2998_v11  ;;  %v4037_v38 = vor.u32 %v4036_v22, %v4032_v17  ;;  %v3578_v17 = vld [vmem:[#allocation3 + $0x44] sm:$0x1]  ;;  %v3790_v22 = vld [vmem:[#allocation3 + $0x28] sm:$0xf]  ;;  %7523 = vmatprep.subr.bf16.mxu1 %v8133_v54 }
 0x1e1   : > { %v7780_v30 = vpop.f32.mrf.mxu0 }
 0x1e2   : > { %v7250_v33 = vpack.c.bf16 %v3103_v34, %v3103_v34  ;;  %v3101_v13 = vmax.f32 %v2999_v62, 0.0  ;;  %v3010_v29 = vadd.f32 %v7780_v30, %v9970_v46  ;;  %v4042_v41 = vsel %vm1226_vm4, %v4037_v38, %v4041_v6  ;;  %v3836_v34 = vld [vmem:[#allocation3 + $0x24] sm:$0xe]  ;;  %v8134_v30 = vld [vmem:[%s11087_s3 + $0x1f0] sm:$0xff]  }
 0x1e3   : > { %5882 = vmatprep.mubr.bf16.mxu1 %v4042_v41  ;;  %v3001_v42 = vpop.f32.mrf.mxu0  ;;  %7629 = vmatprep.subr.bf16.mxu0 %v8134_v30  ;;  %v8135_v41 = vld [vmem:[%s11087_s3 + $0x118] sm:$0xff]  }
 0x1e4   : > { %v3307_v32 = vshrl.u32 %v7250_v33, 16  ;;  %v7248_v50 = vpack.c.bf16 %v3101_v13, %v3101_v13  ;;  %v3104_v57 = vmax.f32 %v3010_v29, 0.0  ;;  %5883 = vmatmul.mubr.bf16.gmra.mxu1 %v6990_v60  ;;  %v3002_v9 = vadd.f32 %v9970_v46, %v3001_v42  ;;  %6044 = vmatmul.mubr.bf16.gmra.mxu0 %v4262_v26  ;;  %v3710_v13 = vld [vmem:[#allocation3 + $0x30] sm:$0xe]  ;;  %v8136_v42 = vld [vmem:[%s11087_s3 + $0x1b0] sm:$0xff]  }
 0x1e5   : > { %5890 = vmatprep.mubr.bf16.mxu1 %v4054_v2  ;;  %v3310_v12 = vshll.u32 %v7250_v33, 16  ;;  %v7116_v33 = vcombine.low %v3836_v34, %v3790_v22  ;;  %v7023_v29 = vcombine.low %v3710_v13, %v10101_v5  ;;  %v5185_v26 = vrot.slane %v7117_v28, 1  ;;  %7524 = vmatpush3.bf16.msra.mxu1 %v8135_v41  ;;  %v8138_v5 = vld [vmem:[%s11087_s3 + $0x1e8] sm:$0xff]  }
 0x1e6   : > { %v3309_v55 = vrot.slane %v3307_v32, 7  ;;  %v3290_v36 = vshrl.u32 %v7248_v50, 16  ;;  %v7251_v39 = vpack.c.bf16 %v3104_v57, %v3104_v57  ;;  %v3102_v19 = vmax.f32 %v3002_v9, 0.0  ;;  %7630 = vmatpush3.bf16.msra.mxu0 %v8136_v42 }
 0x1e7   : > { %v3293_v58 = vshll.u32 %v7248_v50, 16  ;;  %v8137_v50 = vld [vmem:[%s11087_s3 + $0x150] sm:$0xff]   ;;  %v10165_v57 = vsel %vm1499_vm6, %v5185_v26, %v5186_v21  ;;  %v5182_v2 = vrot.slane %v7116_v33, 1  ;;  %7631 = vmatprep.subr.bf16.mxu0 %v8138_v5 }
 0x1e8   : > { %v3312_v20 = vor.u32 %v3310_v12, %v3309_v55  ;;  %v3292_v40 = vrot.slane %v3290_v36, 7  ;;  %v3315_v15 = vshrl.u32 %v7251_v39, 16  ;;  %v7249_v16 = vpack.c.bf16 %v3102_v19, %v3102_v19  ;;  %7525 = vmatprep.subr.bf16.mxu1 %v8137_v50 }
 0x1e9   : > { %v3318_v48 = vshll.u32 %v7251_v39, 16  ;;  %v3313_v4 = vrot.slane %v3309_v55, 4  ;;  %v4263_v36 = vrot.slane %v7023_v29, 1  ;;  %v4264_v19 = vrot.slane %v10107_v49, 1 }
 0x1ea   : > { %v3582_v59 = vsel %vm9986_vm8, %v3312_v20, %v3581_v47  ;;  %v3295_v8 = vor.u32 %v3293_v58, %v3292_v40  ;;  %v3317_v60 = vrot.slane %v3315_v15, 7  ;;  %v3298_v35 = vshrl.u32 %v7249_v16, 16  ;;  %7632 = vmatpush3.bf16.msra.mxu0 %v8142_v44 }
 0x1eb   : > { %3583 = vst [vmem:[#allocation3 + $0x48] sm:$0xf] %v3582_v59  ;;  %v3301_v1 = vshll.u32 %v7249_v16, 16  ;;  %v3296_v37 = vrot.slane %v3292_v40, 4  ;;  %v4265_v49 = vsel %vm1499_vm6, %v4263_v36, %v4264_v19  ;;  %v3595_v19 = vld [vmem:[#allocation3 + $0x60] sm:$0xf] }
 0x1ec   : > { %v3575_v43 = vsel %vm9986_vm8, %v3295_v8, %v3574_v25  ;;  %v3320_v24 = vor.u32 %v3318_v48, %v3317_v60  ;;  %v3322_v31 = vrot.slane %v3317_v60, 4  ;;  %5891 = vmatmul.mubr.bf16.gmra.mxu1 %v10104_v45  ;;  %v3300_v56 = vrot.slane %v3298_v35, 7  ;;  %v8179_v45 = vld [vmem:[#allocation3 + $0x2c] ss:$0 sps:$4 sm:$0x11]  }
 0x1ed   : > { %3576 = vst [vmem:[#allocation3 + $0x3c] sm:$0xf] %v3575_v43  ;;  %v5183_v32 = vrot.slane %v8179_v45, 1 }
 0x1ee   : > { %v3321_v53 = vsel %vm8528_vm7, %v3313_v4, %v3320_v24  ;;  %v3586_v3 = vsel %vm9994_vm0, %v3322_v31, %v3585_v51  ;;  %v3303_v11 = vor.u32 %v3301_v1, %v3300_v56  ;;  %v3305_v6 = vrot.slane %v3300_v56, 4  ;;  %v8141_v1 = vld [vmem:[%s11087_s3 + $0x110] sm:$0xff]  }
 0x1ef   : > { %3584 = vst [vmem:[#allocation3 + $0x4c] sm:$0xf] %v3321_v53  ;;  %3587 = vst [vmem:[#allocation3 + $0x50] sm:$0x1] %v3586_v3  ;;  %v10176_v58 = vsel %vm1499_vm6, %v5182_v2, %v5183_v32  ;;  %7526 = vmatpush3.bf16.msra.mxu1 %v8141_v1 }
 0x1f0   : > { %v3304_v62 = vsel %vm8528_vm7, %v3296_v37, %v3303_v11  ;;  %v3579_v38 = vsel %vm9994_vm0, %v3305_v6, %v3578_v17 }
 0x1f1   : > { %3577 = vst [vmem:[#allocation3 + $0x40] sm:$0xf] %v3304_v62  ;;  %3580 = vst [vmem:[#allocation3 + $0x44] sm:$0x1] %v3579_v38 }
 0x1f2   : > { %v3670_v9 = vld [vmem:[#allocation3 + $0x48] sm:$0xf] }
 0x1f3   : > { %v3732_v51 = vld [vmem:[#allocation3 + $0x48] sm:$0xf] }
 0x1f4   : > { %v3730_v12 = vld [vmem:[#allocation3 + $0x3c] sm:$0xf] }
 0x1f5   : > { %v3668_v39 = vld [vmem:[#allocation3 + $0x3c] sm:$0xf] }
 0x1f6   : > { %v10167_v55 = vld [vmem:[#allocation3 + $0x4c] sm:$0xf]  ;;  %v10173_v20 = vld [vmem:[#allocation3 + $0x50] ss:$0 sps:$4 sm:$0x11]  }
 0x1f7   : > { %v10170_v47 = vcombine.low %v3670_v9, %v10167_v55  ;;  %v3711_v40 = vld [vmem:[#allocation3 + $0x3c] sm:$0xe]  ;;  %v3733_v25 = vld [vmem:[#allocation3 + $0x4c] sm:$0xf]  ;;  %v4075_v56 = vshll.u32 %v10173_v20, 16 }
 0x1f8   : > { %v3731_v15 = vld [vmem:[#allocation3 + $0x40] sm:$0xf]  ;;  %v8089_v60 = vld [vmem:[#allocation3 + $0x44] ss:$0 sps:$4 sm:$0x11]   ;;  %v10183_v4 = vcombine.low %v3732_v51, %v3733_v25 }
 0x1f9   : > { %v3669_v16 = vld [vmem:[#allocation3 + $0x40] sm:$0xf]  ;;  %v10178_v59 = vcombine.low %v3730_v12, %v3731_v15  ;;  %v4070_v48 = vshll.u32 %v10170_v47, 16  ;;  %v4063_v24 = vshll.u32 %v8089_v60, 16  ;;  %v4068_v22 = vshrl.u32 %v10170_v47, 16 }
 0x1fa   : > { %v6992_v8 = vcombine.low %v3668_v39, %v3669_v16  ;;  %v7024_v35 = vcombine.low %v3711_v40, %v3669_v16  ;;  %v4267_v63 = vrot.slane %v8089_v60, 1  ;;  %v4077_v54 = vrot.slane %v4075_v56, 1 }
 0x1fb   : > { %6051 = vmatprep.mubr.bf16.mxu0 %v10178_v59  ;;  %v4072_v18 = vrot.slane %v4070_v48, 1  ;;  %v4065_v11 = vrot.slane %v4063_v24, 1  ;;  %v3588_v48 = vld [vmem:[#allocation3 + $0x54] sm:$0xf] }
 0x1fc   : > { %v4058_v43 = vshll.u32 %v6992_v8, 16  ;;  %6052 = vmatmul.mubr.bf16.gmra.mxu0 %v4265_v49  ;;  %v4056_v3 = vshrl.u32 %v6992_v8, 16  ;;  %v4266_v6 = vrot.slane %v7024_v35, 1 }
 0x1fd   : > { %v7783_v31 = vpop.f32.mrf.mxu0  ;;  %6059 = vmatprep.mubr.bf16.mxu0 %v10183_v4  ;;  %v4073_v62 = vor.u32 %v4072_v18, %v4068_v22 }
 0x1fe   : > { %v3023_v53 = vadd.f32 %v7783_v31, %v9970_v46  ;;  %v4060_v17 = vrot.slane %v4058_v43, 1  ;;  %v4268_v41 = vsel %vm1499_vm6, %v4266_v6, %v4267_v63  ;;  %v7307_v39 = vpop.f32.mrf.mxu1  ;;  %v3599_v31 = vld [vmem:[#allocation3 + $0x68] sm:$0x1]  ;;  %v3592_v6 = vld [vmem:[#allocation3 + $0x5c] sm:$0x1] }
 0x1ff   : > { %v3014_v37 = vpop.f32.mrf.mxu0  ;;  %v4078_v50 = vsel %vm1226_vm4, %v4073_v62, %v4077_v54  ;;  %v8186_v62 = vld [vmem:[#allocation3 + $0x44] ss:$0 sps:$4 sm:$0x11]   ;;  %v3838_v54 = vld [vmem:[#allocation3 + $0x3c] sm:$0xe] }
 0x200   : > { %v3107_v45 = vmax.f32 %v3023_v53, 0.0  ;;  %v3015_v28 = vadd.f32 %v9970_v46, %v3014_v37  ;;  %v4061_v34 = vor.u32 %v4060_v17, %v4056_v3  ;;  %v7308_v24 = vpop.f32.mrf.mxu1 }
 0x201   : > { %v7784_v38 = vpop.f32.mrf.mxu0  ;;  %v10203_v56 = vadd.f32 %v7308_v24, %v7307_v39  ;;  %v8155_v39 = vld [vmem:[%s11087_s3 + $0x140] sm:$0xff]  }
 0x202   : > { %v7254_v30 = vpack.c.bf16 %v3107_v45, %v3107_v45  ;;  %v3105_v21 = vmax.f32 %v3015_v28, 0.0  ;;  %v3026_v33 = vadd.f32 %v7784_v38, %v9970_v46  ;;  %v4066_v13 = vsel %vm1226_vm4, %v4061_v34, %v4065_v11  ;;  %v3794_v34 = vld [vmem:[#allocation3 + $0x40] sm:$0xf] }
 0x203   : > { %5898 = vmatprep.mubr.bf16.mxu1 %v4066_v13  ;;  %v3017_v29 = vpop.f32.mrf.mxu0  ;;  %v8151_v13 = vld [vmem:[%s11087_s3 + $0x148] sm:$0xff]  }
 0x204   : > { %v3341_v42 = vshrl.u32 %v7254_v30, 16  ;;  %v7252_v26 = vpack.c.bf16 %v3105_v21, %v3105_v21  ;;  %v3108_v32 = vmax.f32 %v3026_v33, 0.0  ;;  %5899 = vmatmul.mubr.bf16.gmra.mxu1 %v6992_v8  ;;  %v3018_v5 = vadd.f32 %v9970_v46, %v3017_v29  ;;  %6060 = vmatmul.mubr.bf16.gmra.mxu0 %v4268_v41  ;;  %v8152_v41 = vld [vmem:[%s11087_s3 + $0x1e0] sm:$0xff]  }
 0x205   : > { %5906 = vmatprep.mubr.bf16.mxu1 %v4078_v50  ;;  %v3344_v9 = vshll.u32 %v7254_v30, 16  ;;  %v3712_v30 = vld [vmem:[#allocation3 + $0x48] sm:$0xe]  ;;  %v7118_v21 = vcombine.low %v3838_v54, %v3794_v34  ;;  %v5189_v29 = vrot.slane %v8186_v62, 1  ;;  %7527 = vmatprep.subr.bf16.mxu1 %v8151_v13 }
 0x206   : > { %v3343_v2 = vrot.slane %v3341_v42, 7  ;;  %v3324_v12 = vshrl.u32 %v7252_v26, 16  ;;  %v7255_v36 = vpack.c.bf16 %v3108_v32, %v3108_v32  ;;  %v3106_v40 = vmax.f32 %v3018_v5, 0.0  ;;  %v8153_v42 = vld [vmem:[%s11087_s3 + $0x108] sm:$0xff]   ;;  %7633 = vmatprep.subr.bf16.mxu0 %v8152_v41 }
 0x207   : > { %v3327_v16 = vshll.u32 %v7252_v26, 16  ;;  %v7025_v33 = vcombine.low %v3712_v30, %v10167_v55  ;;  %v5188_v26 = vrot.slane %v7118_v21, 1  ;;  %7528 = vmatpush3.bf16.msra.mxu1 %v8153_v42 }
 0x208   : > { %v3346_v15 = vor.u32 %v3344_v9, %v3343_v2  ;;  %v3326_v25 = vrot.slane %v3324_v12, 7  ;;  %v3349_v60 = vshrl.u32 %v7255_v36, 16  ;;  %v7253_v51 = vpack.c.bf16 %v3106_v40, %v3106_v40  ;;  %7529 = vmatprep.subr.bf16.mxu1 %v8155_v39 }
 0x209   : > { %v3352_v43 = vshll.u32 %v7255_v36, 16  ;;  %v3347_v1 = vrot.slane %v3343_v2, 4  ;;  %v4269_v55 = vrot.slane %v7025_v33, 1  ;;  %v4270_v2 = vrot.slane %v10173_v20, 1  ;;  %v8154_v36 = vld [vmem:[%s11087_s3 + $0x1a0] sm:$0xff]   ;;  %v8156_v20 = vld [vmem:[%s11087_s3 + $0x1d8] sm:$0xff]  }
 0x20a   : > { %v3596_v8 = vsel %vm9986_vm8, %v3346_v15, %v3595_v19  ;;  %v3329_v35 = vor.u32 %v3327_v16, %v3326_v25  ;;  %v3351_v49 = vrot.slane %v3349_v60, 7  ;;  %v3332_v18 = vshrl.u32 %v7253_v51, 16  ;;  %7634 = vmatpush3.bf16.msra.mxu0 %v8154_v36 }
 0x20b   : > { %3597 = vst [vmem:[#allocation3 + $0x60] sm:$0xf] %v3596_v8  ;;  %v3335_v22 = vshll.u32 %v7253_v51, 16  ;;  %v3330_v63 = vrot.slane %v3326_v25, 4  ;;  %v10244_v15 = vsel %vm1499_vm6, %v5188_v26, %v5189_v29  ;;  %7635 = vmatprep.subr.bf16.mxu0 %v8156_v20  ;;  %v4271_v24 = vsel %vm1499_vm6, %v4269_v55, %v4270_v2 }
 0x20c   : > { %v3589_v44 = vsel %vm9986_vm8, %v3329_v35, %v3588_v48  ;;  %v3354_v53 = vor.u32 %v3352_v43, %v3351_v49  ;;  %v3356_v3 = vrot.slane %v3351_v49, 4  ;;  %5907 = vmatmul.mubr.bf16.gmra.mxu1 %v10170_v47  ;;  %v3334_v17 = vrot.slane %v3332_v18, 7 }
 0x20d   : > { %3590 = vst [vmem:[#allocation3 + $0x54] sm:$0xf] %v3589_v44 }
 0x20e   : > { %v3355_v37 = vsel %vm8528_vm7, %v3347_v1, %v3354_v53  ;;  %v3600_v11 = vsel %vm9994_vm0, %v3356_v3, %v3599_v31  ;;  %v3337_v45 = vor.u32 %v3335_v22, %v3334_v17  ;;  %v3339_v28 = vrot.slane %v3334_v17, 4 }
 0x20f   : > { %3598 = vst [vmem:[#allocation3 + $0x64] sm:$0xf] %v3355_v37  ;;  %3601 = vst [vmem:[#allocation3 + $0x68] sm:$0x1] %v3600_v11 }
 0x210   : > { %v3338_v47 = vsel %vm8528_vm7, %v3330_v63, %v3337_v45  ;;  %v3593_v38 = vsel %vm9994_vm0, %v3339_v28, %v3592_v6  ;;  %v8159_v63 = vld [vmem:[%s11087_s3 + $0x100] sm:$0xff]   ;;  %v8160_v45 = vld [vmem:[%s11087_s3 + $0x198] sm:$0xff]  }
 0x211   : > { %3591 = vst [vmem:[#allocation3 + $0x58] sm:$0xf] %v3338_v47  ;;  %3594 = vst [vmem:[#allocation3 + $0x5c] sm:$0x1] %v3593_v38  ;;  %7530 = vmatpush3.bf16.msra.mxu1 %v8159_v63  ;;  %7636 = vmatpush3.bf16.msra.mxu0 %v8160_v45  ;;  %v8171_v45 = vld [vmem:[%s11087_s3 + $0x188] sm:$0xff]  }
 0x212   : > { %v3674_v32 = vld [vmem:[#allocation3 + $0x60] sm:$0xf] }
 0x213   : > { %v3736_v49 = vld [vmem:[#allocation3 + $0x60] sm:$0xf] }
 0x214   : > { %v3734_v5 = vld [vmem:[#allocation3 + $0x54] sm:$0xf] }
 0x215   : > { %v3672_v9 = vld [vmem:[#allocation3 + $0x54] sm:$0xf] }
 0x216   : > { %v10226_v50 = vld [vmem:[#allocation3 + $0x64] sm:$0xf]  ;;  %v10238_v19 = vld [vmem:[#allocation3 + $0x68] ss:$0 sps:$4 sm:$0x11]  }
 0x217   : > { %v10230_v12 = vcombine.low %v3674_v32, %v10226_v50  ;;  %v3713_v40 = vld [vmem:[#allocation3 + $0x54] sm:$0xe]  ;;  %v3737_v16 = vld [vmem:[#allocation3 + $0x64] sm:$0xf]  ;;  %v4099_v6 = vshll.u32 %v10238_v19, 16  ;;  %v8164_v32 = vld [vmem:[%s11087_s3 + $0x1d0] sm:$0xff]  }
 0x218   : > { %v3735_v25 = vld [vmem:[#allocation3 + $0x58] sm:$0xf]  ;;  %v8099_v8 = vld [vmem:[#allocation3 + $0x5c] ss:$0 sps:$4 sm:$0x11]   ;;  %v10251_v18 = vcombine.low %v3736_v49, %v3737_v16  ;;  %7637 = vmatprep.subr.bf16.mxu0 %v8164_v32  ;;  %v8175_v32 = vld [vmem:[%s11087_s3 + $0x180] sm:$0xff]  }
 0x219   : > { %v3673_v60 = vld [vmem:[#allocation3 + $0x58] sm:$0xf]  ;;  %v10246_v48 = vcombine.low %v3734_v5, %v3735_v25  ;;  %v4094_v35 = vshll.u32 %v10230_v12, 16  ;;  %v4087_v44 = vshll.u32 %v8099_v8, 16  ;;  %v4092_v11 = vshrl.u32 %v10230_v12, 16 }
 0x21a   : > { %v6994_v51 = vcombine.low %v3672_v9, %v3673_v60  ;;  %v7026_v43 = vcombine.low %v3713_v40, %v3673_v60  ;;  %v4273_v21 = vrot.slane %v8099_v8, 1  ;;  %v4101_v26 = vrot.slane %v4099_v6, 1  ;;  %v8165_v5 = vld [vmem:[%s11087_s3 + $0x190] sm:$0xff]   ;;  %v3796_v8 = vld [vmem:[#allocation3 + $0x4c] sm:$0xf] }
 0x21b   : > { %6067 = vmatprep.mubr.bf16.mxu0 %v10246_v48  ;;  %v4096_v3 = vrot.slane %v4094_v35, 1  ;;  %v4089_v54 = vrot.slane %v4087_v44, 1  ;;  %v3609_v35 = vld [vmem:[#allocation3 + $0x78] sm:$0xf]  ;;  %7638 = vmatpush3.bf16.msra.mxu0 %v8165_v5  ;;  %v3839_v44 = vld [vmem:[#allocation3 + $0x48] sm:$0xe] }
 0x21c   : > { %v4082_v1 = vshll.u32 %v6994_v51, 16  ;;  %6068 = vmatmul.mubr.bf16.gmra.mxu0 %v4271_v24  ;;  %v4080_v22 = vshrl.u32 %v6994_v51, 16  ;;  %v4272_v62 = vrot.slane %v7026_v43, 1  ;;  %v8170_v43 = vld [vmem:[%s11087_s3 + $0x1c8] sm:$0xff]  }
 0x21d   : > { %v7787_v31 = vpop.f32.mrf.mxu0  ;;  %6075 = vmatprep.mubr.bf16.mxu0 %v10251_v18  ;;  %v4097_v30 = vor.u32 %v4096_v3, %v4092_v11  ;;  %7639 = vmatprep.subr.bf16.mxu0 %v8170_v43 }
 0x21e   : > { %v3039_v53 = vadd.f32 %v7787_v31, %v9970_v46  ;;  %v4084_v37 = vrot.slane %v4082_v1, 1  ;;  %v10266_v46 = vld [vmem:[%s11086_s2] ss:$0 sm:$0xff]  ;;  %v4274_v40 = vsel %vm1499_vm6, %v4272_v62, %v4273_v21 }
 0x21f   : > { %v3030_v17 = vpop.f32.mrf.mxu0  ;;  %v4102_v39 = vsel %vm1226_vm4, %v4097_v30, %v4101_v26  ;;  %7640 = vmatpush3.bf16.msra.mxu0 %v8171_v45  ;;  %v8174_v30 = vld [vmem:[%s11087_s3 + $0x1c0] sm:$0xff]   ;;  %v3606_v26 = vld [vmem:[#allocation3 + $0x74] sm:$0x1] }
 0x220   : > { %v3111_v28 = vmax.f32 %v3039_v53, 0.0  ;;  %v3031_v34 = vadd.f32 %v10266_v46, %v3030_v17  ;;  %v4085_v38 = vor.u32 %v4084_v37, %v4080_v22  ;;  %v3602_v53 = vld [vmem:[#allocation3 + $0x6c] sm:$0xf]  ;;  %v8189_v17 = vld [vmem:[#allocation3 + $0x50] ss:$0 sps:$4 sm:$0x11]   ;;  %v7119_v22 = vcombine.low %v3839_v44, %v3796_v8  ;;  %7641 = vmatprep.subr.bf16.mxu0 %v8174_v30 }
 0x221   : > { %v7788_v47 = vpop.f32.mrf.mxu0 }
 0x222   : > { %v7258_v33 = vpack.c.bf16 %v3111_v28, %v3111_v28  ;;  %v3109_v13 = vmax.f32 %v3031_v34, 0.0  ;;  %v3042_v29 = vadd.f32 %v10266_v46, %v7788_v47  ;;  %v4090_v41 = vsel %vm1226_vm4, %v4085_v38, %v4089_v54  ;;  %v3613_v28 = vld [vmem:[#allocation3 + $0x80] sm:$0x1] }
 0x223   : > { %v3033_v42 = vpop.f32.mrf.mxu0  ;;  %5914 = vmatprep.mubr.bf16.mxu1 %v4090_v41  ;;  %7642 = vmatpush3.bf16.msra.mxu0 %v8175_v32 }
 0x224   : > { %v3375_v55 = vshrl.u32 %v7258_v33, 16  ;;  %v7256_v2 = vpack.c.bf16 %v3109_v13, %v3109_v13  ;;  %v3112_v9 = vmax.f32 %v3042_v29, 0.0  ;;  %v3034_v36 = vadd.f32 %v10266_v46, %v3033_v42  ;;  %5915 = vmatmul.mubr.bf16.gmra.mxu1 %v6994_v51  ;;  %6076 = vmatmul.mubr.bf16.gmra.mxu0 %v4274_v40 }
 0x225   : > { %v3378_v25 = vshll.u32 %v7258_v33, 16  ;;  %5922 = vmatprep.mubr.bf16.mxu1 %v4102_v39  ;;  %v5191_v13 = vrot.slane %v7119_v22, 1  ;;  %v5192_v29 = vrot.slane %v8189_v17, 1 }
 0x226   : > { %v3377_v20 = vrot.slane %v3375_v55, 7  ;;  %v3358_v16 = vshrl.u32 %v7256_v2, 16  ;;  %v7259_v60 = vpack.c.bf16 %v3112_v9, %v3112_v9  ;;  %v3110_v49 = vmax.f32 %v3034_v36, 0.0  ;;  %v3798_v9 = vld [vmem:[#allocation3 + $0x58] sm:$0xf] }
 0x227   : > { %v3361_v31 = vshll.u32 %v7256_v2, 16  ;;  %v8193_v36 = vld [vmem:[#allocation3 + $0x5c] ss:$0 sps:$4 sm:$0x11]  }
 0x228   : > { %v3380_v51 = vor.u32 %v3378_v25, %v3377_v20  ;;  %v3360_v24 = vrot.slane %v3358_v16, 7  ;;  %v3383_v1 = vshrl.u32 %v7259_v60, 16  ;;  %v7257_v3 = vpack.c.bf16 %v3110_v49, %v3110_v49  ;;  %v3714_v25 = vld [vmem:[#allocation3 + $0x60] sm:$0xe]  ;;  %v3840_v16 = vld [vmem:[#allocation3 + $0x54] sm:$0xe] }
 0x229   : > { %v3386_v63 = vshll.u32 %v7259_v60, 16  ;;  %v3381_v62 = vrot.slane %v3377_v20, 4  ;;  %v10309_v20 = vsel %vm1499_vm6, %v5191_v13, %v5192_v29  ;;  %v7027_v60 = vcombine.low %v3714_v25, %v10226_v50 }
 0x22a   : > { %v3610_v37 = vsel %vm9986_vm8, %v3380_v51, %v3609_v35  ;;  %v3363_v11 = vor.u32 %v3361_v31, %v3360_v24  ;;  %v3385_v6 = vrot.slane %v3383_v1, 7  ;;  %v3366_v34 = vshrl.u32 %v7257_v3, 16 }
 0x22b   : > { %3611 = vst [vmem:[#allocation3 + $0x78] sm:$0xf] %v3610_v37  ;;  %v3369_v33 = vshll.u32 %v7257_v3, 16  ;;  %v3364_v5 = vrot.slane %v3360_v24, 4  ;;  %v7120_v8 = vcombine.low %v3840_v16, %v3798_v9  ;;  %v5195_v35 = vrot.slane %v8193_v36, 1 }
 0x22c   : > { %v3603_v47 = vsel %vm9986_vm8, %v3363_v11, %v3602_v53  ;;  %v3388_v38 = vor.u32 %v3386_v63, %v3385_v6  ;;  %v3390_v54 = vrot.slane %v3385_v6, 4  ;;  %v3368_v21 = vrot.slane %v3366_v34, 7  ;;  %5923 = vmatmul.mubr.bf16.gmra.mxu1 %v10230_v12  ;;  %v8176_v12 = vld [vmem:[%s11087_s3 + $0x238] sm:$0xff]  }
 0x22d   : > { %3604 = vst [vmem:[#allocation3 + $0x6c] sm:$0xf] %v3603_v47  ;;  %7849 = vmatprep.subr.bf16.mxu1 %v8176_v12  ;;  %7801 = vmatprep.subr.bf16.mxu0 %v8176_v12  ;;  %v5194_v49 = vrot.slane %v7120_v8, 1  ;;  %v4275_v31 = vrot.slane %v7027_v60, 1  ;;  %v4276_v53 = vrot.slane %v10238_v19, 1 }
 0x22e   : > { %v3389_v41 = vsel %vm8528_vm7, %v3381_v62, %v3388_v38  ;;  %v3614_v42 = vsel %vm9994_vm0, %v3390_v54, %v3613_v28  ;;  %v3371_v55 = vor.u32 %v3369_v33, %v3368_v21  ;;  %v3373_v2 = vrot.slane %v3368_v21, 4 }
 0x22f   : > { %3612 = vst [vmem:[#allocation3 + $0x7c] sm:$0xf] %v3389_v41  ;;  %3615 = vst [vmem:[#allocation3 + $0x80] sm:$0x1] %v3614_v42  ;;  %v10321_v22 = vsel %vm1499_vm6, %v5194_v49, %v5195_v35  ;;  %v4277_v19 = vsel %vm1499_vm6, %v4275_v31, %v4276_v53 }
 0x230   : > { %v3372_v39 = vsel %vm8528_vm7, %v3364_v5, %v3371_v55  ;;  %v3607_v40 = vsel %vm9994_vm0, %v3373_v2, %v3606_v26 }
 0x231   : > { %3605 = vst [vmem:[#allocation3 + $0x70] sm:$0xf] %v3372_v39  ;;  %3608 = vst [vmem:[#allocation3 + $0x74] sm:$0x1] %v3607_v40 }
 0x232   : > { %v3678_v43 = vld [vmem:[#allocation3 + $0x78] sm:$0xf] }
 0x233   : > { %v3740_v34 = vld [vmem:[#allocation3 + $0x78] sm:$0xf] }
 0x234   : > { %v3738_v24 = vld [vmem:[#allocation3 + $0x6c] sm:$0xf] }
 0x235   : > { %v3676_v1 = vld [vmem:[#allocation3 + $0x6c] sm:$0xf] }
 0x236   : > { %v10312_v51 = vld [vmem:[#allocation3 + $0x7c] sm:$0xf]  ;;  %v10318_v3 = vld [vmem:[#allocation3 + $0x80] ss:$0 sps:$4 sm:$0x11]  }
 0x237   : > { %v10315_v44 = vcombine.low %v3678_v43, %v10312_v51  ;;  %v3715_v17 = vld [vmem:[#allocation3 + $0x6c] sm:$0xe]  ;;  %v3741_v37 = vld [vmem:[#allocation3 + $0x7c] sm:$0xf]  ;;  %v4123_v33 = vshll.u32 %v10318_v3, 16 }
 0x238   : > { %v3739_v50 = vld [vmem:[#allocation3 + $0x70] sm:$0xf]  ;;  %v8113_v45 = vld [vmem:[#allocation3 + $0x74] ss:$0 sps:$4 sm:$0x11]   ;;  %v10328_v47 = vcombine.low %v3740_v34, %v3741_v37 }
 0x239   : > { %v3677_v11 = vld [vmem:[#allocation3 + $0x70] sm:$0xf]  ;;  %v10323_v6 = vcombine.low %v3738_v24, %v3739_v50  ;;  %v4118_v28 = vshll.u32 %v10315_v44, 16  ;;  %v4111_v54 = vshll.u32 %v8113_v45, 16  ;;  %v4116_v42 = vshrl.u32 %v10315_v44, 16 }
 0x23a   : > { %v6996_v63 = vcombine.low %v3676_v1, %v3677_v11  ;;  %v7028_v62 = vcombine.low %v3715_v17, %v3677_v11  ;;  %v4279_v55 = vrot.slane %v8113_v45, 1  ;;  %v4125_v40 = vrot.slane %v4123_v33, 1  ;;  %v3800_v45 = vld [vmem:[#allocation3 + $0x64] sm:$0xf] }
 0x23b   : > { %6083 = vmatprep.mubr.bf16.mxu0 %v10323_v6  ;;  %v4120_v21 = vrot.slane %v4118_v28, 1  ;;  %v4113_v32 = vrot.slane %v4111_v54, 1  ;;  %v3623_v28 = vld [vmem:[#allocation3 + $0x90] sm:$0xf] }
 0x23c   : > { %v4106_v38 = vshll.u32 %v6996_v63, 16  ;;  %6084 = vmatmul.mubr.bf16.gmra.mxu0 %v4277_v19  ;;  %v4104_v29 = vshrl.u32 %v6996_v63, 16  ;;  %v4278_v5 = vrot.slane %v7028_v62, 1 }
 0x23d   : > { %v7791_v30 = vpop.f32.mrf.mxu0  ;;  %6091 = vmatprep.mubr.bf16.mxu0 %v10328_v47  ;;  %v4121_v36 = vor.u32 %v4120_v21, %v4116_v42  ;;  %v3616_v21 = vld [vmem:[#allocation3 + $0x84] sm:$0xf] }
 0x23e   : > { %v3055_v13 = vadd.f32 %v10266_v46, %v7791_v30  ;;  %v4108_v41 = vrot.slane %v4106_v38, 1  ;;  %v4280_v49 = vsel %vm1499_vm6, %v4278_v5, %v4279_v55  ;;  %v3841_v30 = vld [vmem:[#allocation3 + $0x60] sm:$0xe]  ;;  %v8196_v5 = vld [vmem:[#allocation3 + $0x68] ss:$0 sps:$4 sm:$0x11]  }
 0x23f   : > { %v3046_v26 = vpop.f32.mrf.mxu0  ;;  %v4126_v1 = vsel %vm1226_vm4, %v4121_v36, %v4125_v40  ;;  %v7121_v33 = vcombine.low %v3841_v30, %v3800_v45  ;;  %v3802_v36 = vld [vmem:[#allocation3 + $0x70] sm:$0xf]  ;;  %v3843_v45 = vld [vmem:[#allocation3 + $0x78] sm:$0xe] }
 0x240   : > { %v3115_v2 = vmax.f32 %v3055_v13, 0.0  ;;  %v3047_v12 = vadd.f32 %v10266_v46, %v3046_v26  ;;  %v4109_v9 = vor.u32 %v4108_v41, %v4104_v29  ;;  %v3627_v26 = vld [vmem:[#allocation3 + $0x98] sm:$0x1] }
 0x241   : > { %v7792_v39 = vpop.f32.mrf.mxu0 }
 0x242   : > { %v7262_v25 = vpack.c.bf16 %v3115_v2, %v3115_v2  ;;  %v3113_v16 = vmax.f32 %v3047_v12, 0.0  ;;  %v3058_v60 = vadd.f32 %v10266_v46, %v7792_v39  ;;  %v4114_v8 = vsel %vm1226_vm4, %v4109_v9, %v4113_v32 }
 0x243   : > { %5930 = vmatprep.mubr.bf16.mxu1 %v4114_v8  ;;  %v3049_v35 = vpop.f32.mrf.mxu0  ;;  %v3620_v8 = vld [vmem:[#allocation3 + $0x8c] sm:$0x1] }
 0x244   : > { %v3409_v43 = vshrl.u32 %v7262_v25, 16  ;;  %v7260_v24 = vpack.c.bf16 %v3113_v16, %v3113_v16  ;;  %v3116_v31 = vmax.f32 %v3058_v60, 0.0  ;;  %5931 = vmatmul.mubr.bf16.gmra.mxu1 %v6996_v63  ;;  %v3050_v53 = vadd.f32 %v10266_v46, %v3049_v35  ;;  %6092 = vmatmul.mubr.bf16.gmra.mxu0 %v4280_v49 }
 0x245   : > { %5938 = vmatprep.mubr.bf16.mxu1 %v4126_v1  ;;  %v3412_v50 = vshll.u32 %v7262_v25, 16  ;;  %v8200_v25 = vld [vmem:[#allocation3 + $0x74] ss:$0 sps:$4 sm:$0x11]   ;;  %v5197_v35 = vrot.slane %v7121_v33, 1  ;;  %v5198_v1 = vrot.slane %v8196_v5, 1 }
 0x246   : > { %v3411_v17 = vrot.slane %v3409_v43, 7  ;;  %v3392_v37 = vshrl.u32 %v7260_v24, 16  ;;  %v7263_v11 = vpack.c.bf16 %v3116_v31, %v3116_v31  ;;  %v3114_v34 = vmax.f32 %v3050_v53, 0.0  ;;  %v3804_v31 = vld [vmem:[#allocation3 + $0x7c] sm:$0xf] }
 0x247   : > { %v3395_v38 = vshll.u32 %v7260_v24, 16 }
 0x248   : > { %v3414_v62 = vor.u32 %v3412_v50, %v3411_v17  ;;  %v3394_v19 = vrot.slane %v3392_v37, 7  ;;  %v3417_v54 = vshrl.u32 %v7263_v11, 16  ;;  %v7261_v63 = vpack.c.bf16 %v3114_v34, %v3114_v34  ;;  %v8203_v37 = vld [vmem:[#allocation3 + $0x80] ss:$0 sps:$4 sm:$0x11]  }
 0x249   : > { %v3420_v42 = vshll.u32 %v7263_v11, 16  ;;  %v3415_v55 = vrot.slane %v3411_v17, 4  ;;  %v5201_v11 = vrot.slane %v8200_v25, 1  ;;  %v10354_v34 = vsel %vm1499_vm6, %v5197_v35, %v5198_v1 }
 0x24a   : > { %v3624_v13 = vsel %vm9986_vm8, %v3414_v62, %v3623_v28  ;;  %v3397_v29 = vor.u32 %v3395_v38, %v3394_v19  ;;  %v3419_v41 = vrot.slane %v3417_v54, 7  ;;  %v3400_v32 = vshrl.u32 %v7261_v63, 16  ;;  %v3716_v28 = vld [vmem:[#allocation3 + $0x78] sm:$0xe] }
 0x24b   : > { %3625 = vst [vmem:[#allocation3 + $0x90] sm:$0xf] %v3624_v13  ;;  %v3403_v40 = vshll.u32 %v7261_v63, 16  ;;  %v3398_v49 = vrot.slane %v3394_v19, 4  ;;  %v7123_v62 = vcombine.low %v3843_v45, %v3804_v31  ;;  %v7029_v19 = vcombine.low %v3716_v28, %v10312_v51 }
 0x24c   : > { %v3617_v2 = vsel %vm9986_vm8, %v3397_v29, %v3616_v21  ;;  %v3422_v12 = vor.u32 %v3420_v42, %v3419_v41  ;;  %v3424_v9 = vrot.slane %v3419_v41, 4  ;;  %5939 = vmatmul.mubr.bf16.gmra.mxu1 %v10315_v44  ;;  %v3402_v39 = vrot.slane %v3400_v32, 7  ;;  %v3842_v44 = vld [vmem:[#allocation3 + $0x6c] sm:$0xe] }
 0x24d   : > { %3618 = vst [vmem:[#allocation3 + $0x84] sm:$0xf] %v3617_v2  ;;  %v7122_v53 = vcombine.low %v3842_v44, %v3802_v36  ;;  %v5203_v30 = vrot.slane %v7123_v62, 1  ;;  %v5204_v21 = vrot.slane %v8203_v37, 1  ;;  %v4281_v29 = vrot.slane %v7029_v19, 1 }
 0x24e   : > { %v3423_v16 = vsel %vm8528_vm7, %v3415_v55, %v3422_v12  ;;  %v3628_v60 = vsel %vm9994_vm0, %v3424_v9, %v3627_v26  ;;  %v3405_v43 = vor.u32 %v3403_v40, %v3402_v39  ;;  %v3407_v24 = vrot.slane %v3402_v39, 4 }
 0x24f   : > { %3626 = vst [vmem:[#allocation3 + $0x94] sm:$0xf] %v3423_v16  ;;  %3629 = vst [vmem:[#allocation3 + $0x98] sm:$0x1] %v3628_v60  ;;  %v5200_v38 = vrot.slane %v7122_v53, 1  ;;  %v4282_v26 = vrot.slane %v10318_v3, 1  ;;  %v10369_v5 = vsel %vm1499_vm6, %v5203_v30, %v5204_v21 }
 0x250   : > { %v3406_v17 = vsel %vm8528_vm7, %v3398_v49, %v3405_v43  ;;  %v3621_v50 = vsel %vm9994_vm0, %v3407_v24, %v3620_v8  ;;  %11103 = vst [vmem:[#allocation5_spill] sm:$0xff] %v10369_v5  ;;  %v10545_v5 = vld [vmem:[#allocation3 + $0x2c] ss:$0 sps:$4 sm:$0x11]  }
 0x251   : > { %3619 = vst [vmem:[#allocation3 + $0x88] sm:$0xf] %v3406_v17  ;;  %3622 = vst [vmem:[#allocation3 + $0x8c] sm:$0x1] %v3621_v50  ;;  %v10358_v54 = vsel %vm1499_vm6, %v5200_v38, %v5201_v11  ;;  %v4283_v3 = vsel %vm1499_vm6, %v4281_v29, %v4282_v26 }
 0x252   : > { %11102 = vst [vmem:[#allocation4_spill] sm:$0xff] %v10358_v54  ;;  %v3682_v63 = vld [vmem:[#allocation3 + $0x90] sm:$0xf] }
 0x253   : > { %v3744_v25 = vld [vmem:[#allocation3 + $0x90] sm:$0xf] }
 0x254   : > { %v3742_v13 = vld [vmem:[#allocation3 + $0x84] sm:$0xf] }
 0x255   : > { %v3680_v41 = vld [vmem:[#allocation3 + $0x84] sm:$0xf] }
 0x256   : > { %v10360_v33 = vld [vmem:[#allocation3 + $0x94] sm:$0xf]  ;;  %v10366_v32 = vld [vmem:[#allocation3 + $0x98] ss:$0 sps:$4 sm:$0x11]  }
 0x257   : > { %v10363_v42 = vcombine.low %v3682_v63, %v10360_v33  ;;  %v3717_v51 = vld [vmem:[#allocation3 + $0x84] sm:$0xe]  ;;  %v3745_v2 = vld [vmem:[#allocation3 + $0x94] sm:$0xf]  ;;  %v4147_v24 = vshll.u32 %v10366_v32, 16 }
 0x258   : > { %v3743_v55 = vld [vmem:[#allocation3 + $0x88] sm:$0xf]  ;;  %v8129_v39 = vld [vmem:[#allocation3 + $0x8c] ss:$0 sps:$4 sm:$0x11]   ;;  %v10376_v60 = vcombine.low %v3744_v25, %v3745_v2 }
 0x259   : > { %v3681_v12 = vld [vmem:[#allocation3 + $0x88] sm:$0xf]  ;;  %v10371_v9 = vcombine.low %v3742_v13, %v3743_v55  ;;  %v4142_v40 = vshll.u32 %v10363_v42, 16  ;;  %v4135_v35 = vshll.u32 %v8129_v39, 16  ;;  %v4140_v53 = vshrl.u32 %v10363_v42, 16 }
 0x25a   : > { %v6998_v36 = vcombine.low %v3680_v41, %v3681_v12  ;;  %v7030_v16 = vcombine.low %v3717_v51, %v3681_v12  ;;  %v4285_v11 = vrot.slane %v8129_v39, 1  ;;  %v4149_v30 = vrot.slane %v4147_v24, 1 }
 0x25b   : > { %6099 = vmatprep.mubr.bf16.mxu0 %v10371_v9  ;;  %v4144_v43 = vrot.slane %v4142_v40, 1  ;;  %v4137_v50 = vrot.slane %v4135_v35, 1 }
 0x25c   : > { %v4130_v8 = vshll.u32 %v6998_v36, 16  ;;  %6100 = vmatmul.mubr.bf16.gmra.mxu0 %v4283_v3  ;;  %v4128_v44 = vshrl.u32 %v6998_v36, 16  ;;  %v4284_v37 = vrot.slane %v7030_v16, 1 }
 0x25d   : > { %v7795_v49 = vpop.f32.mrf.mxu0  ;;  %6107 = vmatprep.mubr.bf16.mxu0 %v10376_v60  ;;  %v4145_v19 = vor.u32 %v4144_v43, %v4140_v53 }
 0x25e   : > { %v3071_v31 = vadd.f32 %v10266_v46, %v7795_v49  ;;  %v4132_v1 = vrot.slane %v4130_v8, 1  ;;  %v4286_v26 = vsel %vm1499_vm6, %v4284_v37, %v4285_v11  ;;  %v3637_v8 = vld [vmem:[#allocation3 + $0xa8] sm:$0xf]  ;;  %v3641_v37 = vld [vmem:[#allocation3 + $0xb0] sm:$0x1] }
 0x25f   : > { %v3062_v17 = vpop.f32.mrf.mxu0  ;;  %v4150_v12 = vsel %vm1226_vm4, %v4145_v19, %v4149_v30 }
 0x260   : > { %v3119_v45 = vmax.f32 %v3071_v31, 0.0  ;;  %v3063_v28 = vadd.f32 %v10266_v46, %v3062_v17  ;;  %v4133_v62 = vor.u32 %v4132_v1, %v4128_v44  ;;  %v3630_v44 = vld [vmem:[#allocation3 + $0x9c] sm:$0xf] }
 0x261   : > { %v7796_v38 = vpop.f32.mrf.mxu0 }
 0x262   : > { %v7266_v21 = vpack.c.bf16 %v3119_v45, %v3119_v45  ;;  %v3117_v63 = vmax.f32 %v3063_v28, 0.0  ;;  %v3074_v13 = vadd.f32 %v10266_v46, %v7796_v38  ;;  %v4138_v29 = vsel %vm1226_vm4, %v4133_v62, %v4137_v50  ;;  %v3806_v38 = vld [vmem:[#allocation3 + $0x88] sm:$0xf] }
 0x263   : > { %5946 = vmatprep.mubr.bf16.mxu1 %v4138_v29  ;;  %v3065_v41 = vpop.f32.mrf.mxu0 }
 0x264   : > { %v3443_v51 = vshrl.u32 %v7266_v21, 16  ;;  %v7264_v55 = vpack.c.bf16 %v3117_v63, %v3117_v63  ;;  %v3120_v2 = vmax.f32 %v3074_v13, 0.0  ;;  %5947 = vmatmul.mubr.bf16.gmra.mxu1 %v6998_v36  ;;  %v3066_v39 = vadd.f32 %v10266_v46, %v3065_v41  ;;  %6108 = vmatmul.mubr.bf16.gmra.mxu0 %v4286_v26  ;;  %v8207_v63 = vld [vmem:[#allocation3 + $0x8c] ss:$0 sps:$4 sm:$0x11]  }
 0x265   : > { %5954 = vmatprep.mubr.bf16.mxu1 %v4150_v12  ;;  %v3446_v25 = vshll.u32 %v7266_v21, 16  ;;  %v3634_v41 = vld [vmem:[#allocation3 + $0xa4] sm:$0x1]  ;;  %v3808_v26 = vld [vmem:[#allocation3 + $0x94] sm:$0xf] }
 0x266   : > { %v3445_v40 = vrot.slane %v3443_v51, 7  ;;  %v3426_v16 = vshrl.u32 %v7264_v55, 16  ;;  %v7267_v3 = vpack.c.bf16 %v3120_v2, %v3120_v2  ;;  %v3118_v35 = vmax.f32 %v3066_v39, 0.0  ;;  %v3844_v12 = vld [vmem:[#allocation3 + $0x84] sm:$0xe] }
 0x267   : > { %v3429_v24 = vshll.u32 %v7264_v55, 16  ;;  %v3845_v39 = vld [vmem:[#allocation3 + $0x90] sm:$0xe] }
 0x268   : > { %v3448_v49 = vor.u32 %v3446_v25, %v3445_v40  ;;  %v3428_v43 = vrot.slane %v3426_v16, 7  ;;  %v3451_v31 = vshrl.u32 %v7267_v3, 16  ;;  %v7265_v1 = vpack.c.bf16 %v3118_v35, %v3118_v35  ;;  %v8210_v16 = vld [vmem:[#allocation3 + $0x98] ss:$0 sps:$4 sm:$0x11]  }
 0x269   : > { %v3454_v50 = vshll.u32 %v7267_v3, 16  ;;  %v3449_v45 = vrot.slane %v3445_v40, 4  ;;  %v5207_v3 = vrot.slane %v8207_v63, 1  ;;  %v3718_v35 = vld [vmem:[#allocation3 + $0x90] sm:$0xe] }
 0x26a   : > { %v3638_v36 = vsel %vm9986_vm8, %v3448_v49, %v3637_v8  ;;  %v3431_v53 = vor.u32 %v3429_v24, %v3428_v43  ;;  %v3453_v17 = vrot.slane %v3451_v31, 7  ;;  %v3434_v11 = vshrl.u32 %v7265_v1, 16 }
 0x26b   : > { %3639 = vst [vmem:[#allocation3 + $0xa8] sm:$0xf] %v3638_v36  ;;  %v3437_v21 = vshll.u32 %v7265_v1, 16  ;;  %v3432_v51 = vrot.slane %v3428_v43, 4  ;;  %v7125_v8 = vcombine.low %v3845_v39, %v3808_v26  ;;  %v7031_v49 = vcombine.low %v3718_v35, %v10360_v33 }
 0x26c   : > { %v3631_v28 = vsel %vm9986_vm8, %v3431_v53, %v3630_v44  ;;  %v3456_v62 = vor.u32 %v3454_v50, %v3453_v17  ;;  %v3458_v19 = vrot.slane %v3453_v17, 4  ;;  %5955 = vmatmul.mubr.bf16.gmra.mxu1 %v10363_v42  ;;  %v3436_v30 = vrot.slane %v3434_v11, 7 }
 0x26d   : > { %3632 = vst [vmem:[#allocation3 + $0x9c] sm:$0xf] %v3631_v28  ;;  %v7124_v42 = vcombine.low %v3844_v12, %v3806_v38  ;;  %v5209_v31 = vrot.slane %v7125_v8, 1  ;;  %v5210_v44 = vrot.slane %v8210_v16, 1  ;;  %v4287_v17 = vrot.slane %v7031_v49, 1 }
 0x26e   : > { %v3457_v13 = vsel %vm8528_vm7, %v3449_v45, %v3456_v62  ;;  %v3642_v29 = vsel %vm9994_vm0, %v3458_v19, %v3641_v37  ;;  %v3439_v55 = vor.u32 %v3437_v21, %v3436_v30  ;;  %v3441_v2 = vrot.slane %v3436_v30, 4 }
 0x26f   : > { %3640 = vst [vmem:[#allocation3 + $0xac] sm:$0xf] %v3457_v13  ;;  %3643 = vst [vmem:[#allocation3 + $0xb0] sm:$0x1] %v3642_v29  ;;  %v5206_v43 = vrot.slane %v7124_v42, 1  ;;  %v4288_v11 = vrot.slane %v10366_v32, 1  ;;  %v10414_v28 = vsel %vm1499_vm6, %v5209_v31, %v5210_v44 }
 0x270   : > { %v3440_v40 = vsel %vm8528_vm7, %v3432_v51, %v3439_v55  ;;  %v3635_v25 = vsel %vm9994_vm0, %v3441_v2, %v3634_v41  ;;  %11105 = vst [vmem:[#allocation7_spill] sm:$0xff] %v10414_v28  ;;  %v7310_v55 = vpop.f32.mrf.mxu1 }
 0x271   : > { %3633 = vst [vmem:[#allocation3 + $0xa0] sm:$0xf] %v3440_v40  ;;  %3636 = vst [vmem:[#allocation3 + $0xa4] sm:$0x1] %v3635_v25  ;;  %v10403_v24 = vsel %vm1499_vm6, %v5206_v43, %v5207_v3  ;;  %v4289_v32 = vsel %vm1499_vm6, %v4287_v17, %v4288_v11 }
 0x272   : > { %11104 = vst [vmem:[#allocation6_spill] sm:$0xff] %v10403_v24  ;;  %v3686_v1 = vld [vmem:[#allocation3 + $0xa8] sm:$0xf]  ;;  %v7311_v17 = vpop.f32.mrf.mxu1 }
 0x273   : > { %v3748_v13 = vld [vmem:[#allocation3 + $0xa8] sm:$0xf] }
 0x274   : > { %v3746_v53 = vld [vmem:[#allocation3 + $0x9c] sm:$0xf]  ;;  %v3847_v52 = vld [vmem:[#allocation3 + $0xa8] sm:$0xe] }
 0x275   : > { %v3684_v50 = vld [vmem:[#allocation3 + $0x9c] sm:$0xf] }
 0x276   : > { %v10405_v36 = vld [vmem:[#allocation3 + $0xac] sm:$0xf]  ;;  %v10411_v45 = vld [vmem:[#allocation3 + $0xb0] ss:$0 sps:$4 sm:$0x11]  }
 0x277   : > { %v10408_v37 = vcombine.low %v3686_v1, %v10405_v36  ;;  %v3719_v33 = vld [vmem:[#allocation3 + $0x9c] sm:$0xe]  ;;  %v3749_v19 = vld [vmem:[#allocation3 + $0xac] sm:$0xf]  ;;  %v4171_v16 = vshll.u32 %v10411_v45, 16 }
 0x278   : > { %v3747_v62 = vld [vmem:[#allocation3 + $0xa0] sm:$0xf]  ;;  %v8147_v63 = vld [vmem:[#allocation3 + $0xa4] ss:$0 sps:$4 sm:$0x11]   ;;  %v10421_v26 = vcombine.low %v3748_v13, %v3749_v19 }
 0x279   : > { %v3685_v38 = vld [vmem:[#allocation3 + $0xa0] sm:$0xf]  ;;  %v10416_v30 = vcombine.low %v3746_v53, %v3747_v62  ;;  %v4166_v29 = vshll.u32 %v10408_v37, 16  ;;  %v4159_v2 = vshll.u32 %v8147_v63, 16  ;;  %v4164_v25 = vshrl.u32 %v10408_v37, 16 }
 0x27a   : > { %v7000_v21 = vcombine.low %v3684_v50, %v3685_v38  ;;  %v7032_v41 = vcombine.low %v3719_v33, %v3685_v38  ;;  %v4291_v44 = vrot.slane %v8147_v63, 1  ;;  %v4173_v33 = vrot.slane %v4171_v16, 1 }
 0x27b   : > { %6115 = vmatprep.mubr.bf16.mxu0 %v10416_v30  ;;  %v4168_v12 = vrot.slane %v4166_v29, 1  ;;  %v4161_v43 = vrot.slane %v4159_v2, 1 }
 0x27c   : > { %v4154_v51 = vshll.u32 %v7000_v21, 16  ;;  %6116 = vmatmul.mubr.bf16.gmra.mxu0 %v4289_v32  ;;  %v4152_v39 = vshrl.u32 %v7000_v21, 16  ;;  %v4290_v8 = vrot.slane %v7032_v41, 1 }
 0x27d   : > { %v7799_v42 = vpop.f32.mrf.mxu0  ;;  %6123 = vmatprep.mubr.bf16.mxu0 %v10421_v26  ;;  %v4169_v31 = vor.u32 %v4168_v12, %v4164_v25  ;;  %v7312_v12 = vadd.f32 %v7311_v17, %v7310_v55 }
 0x27e   : > { %v4156_v40 = vrot.slane %v4154_v51, 1  ;;  %v3087_v3 = vadd.f32 %v10266_v46, %v7799_v42  ;;  %v4292_v41 = vsel %vm1499_vm6, %v4290_v8, %v4291_v44 }
 0x27f   : > { %v3078_v35 = vpop.f32.mrf.mxu0  ;;  %v4174_v29 = vsel %vm1226_vm4, %v4169_v31, %v4173_v33 }
 0x280   : > { %v4157_v49 = vor.u32 %v4156_v40, %v4152_v39  ;;  %v3123_v1 = vmax.f32 %v3087_v3, 0.0  ;;  %v3079_v53 = vadd.f32 %v10266_v46, %v3078_v35  ;;  %v3651_v35 = vld [vmem:[#allocation3 + $0xc0] sm:$0xf] }
 0x281   : > { %v7800_v50 = vpop.f32.mrf.mxu0 }
 0x282   : > { %v4162_v11 = vsel %vm1226_vm4, %v4157_v49, %v4161_v43  ;;  %v7270_v62 = vpack.c.bf16 %v3123_v1, %v3123_v1  ;;  %v3121_v19 = vmax.f32 %v3079_v53, 0.0  ;;  %v3090_v38 = vadd.f32 %v10266_v46, %v7800_v50  ;;  %v3644_v50 = vld [vmem:[#allocation3 + $0xb4] sm:$0xf] }
 0x283   : > { %5962 = vmatprep.mubr.bf16.mxu1 %v4162_v11  ;;  %v3081_v13 = vpop.f32.mrf.mxu0 }
 0x284   : > { %5963 = vmatmul.mubr.bf16.gmra.mxu1 %v7000_v21  ;;  %v3477_v63 = vshrl.u32 %v7270_v62, 16  ;;  %v7268_v32 = vpack.c.bf16 %v3121_v19, %v3121_v19  ;;  %v3124_v51 = vmax.f32 %v3090_v38, 0.0  ;;  %6124 = vmatmul.mubr.bf16.gmra.mxu0 %v4292_v41  ;;  %v3082_v42 = vadd.f32 %v10266_v46, %v3081_v13  ;;  %v10436_v21 = vld [vmem:[%s11088_s4] ss:$0 sm:$0xff] }
 0x285   : > { %v7313_v2 = vpop.f32.mrf.mxu1  ;;  %5970 = vmatprep.mubr.bf16.mxu1 %v4174_v29  ;;  %v7419_v39 = vpop.f32.mrf.mxu0  ;;  %v3480_v25 = vshll.u32 %v7270_v62, 16  ;;  %v5861_v49 = vadd.f32 %v10203_v56, %v10436_v21  ;;  %v5864_v11 = vadd.f32 %v7312_v12, %v10436_v21 }
 0x286   : > { %v3479_v40 = vrot.slane %v3477_v63, 7  ;;  %v3460_v16 = vshrl.u32 %v7268_v32, 16  ;;  %v7271_v3 = vpack.c.bf16 %v3124_v51, %v3124_v51  ;;  %v3122_v43 = vmax.f32 %v3082_v42, 0.0  ;;  %v3655_v51 = vld [vmem:[#allocation3 + $0xc8] sm:$0x1] }
 0x287   : > { %v7314_v8 = vpop.f32.mrf.mxu1  ;;  %v7420_v55 = vpop.f32.mrf.mxu0  ;;  %v3463_v1 = vshll.u32 %v7268_v32, 16 }
 0x288   : > { %v7315_v31 = vadd.f32 %v7314_v8, %v7313_v2  ;;  %v3482_v44 = vor.u32 %v3480_v25, %v3479_v40  ;;  %v3462_v46 = vrot.slane %v3460_v16, 7  ;;  %v3485_v53 = vshrl.u32 %v7271_v3, 16 }
 0x289   : > { %v7316_v17 = vpop.f32.mrf.mxu1  ;;  %v7269_v33 = vpack.c.bf16 %v3122_v43, %v3122_v43  ;;  %v7421_v62 = vadd.f32 %v7420_v55, %v7419_v39  ;;  %v7422_v19 = vpop.f32.mrf.mxu0  ;;  %v3488_v56 = vshll.u32 %v7271_v3, 16  ;;  %v3483_v63 = vrot.slane %v3479_v40, 4  ;;  %v3648_v55 = vld [vmem:[#allocation3 + $0xbc] sm:$0x1] }
 0x28a   : > { %v3652_v38 = vsel %vm9986_vm8, %v3482_v44, %v3651_v35  ;;  %v3465_v13 = vor.u32 %v3463_v1, %v3462_v46  ;;  %v3487_v29 = vrot.slane %v3485_v53, 7  ;;  %v3466_v27 = vrot.slane %v3462_v46, 4 }
 0x28b   : > { %v7317_v41 = vpop.f32.mrf.mxu1  ;;  %3653 = vst [vmem:[#allocation3 + $0xc0] sm:$0xf] %v3652_v38  ;;  %v3468_v2 = vshrl.u32 %v7269_v33, 16  ;;  %v10443_v32 = vadd.f32 %v7421_v62, %v5861_v49  ;;  %v7423_v42 = vpop.f32.mrf.mxu0  ;;  %v3471_v3 = vshll.u32 %v7269_v33, 16  ;;  %v5869_v33 = vadd.f32 %v7315_v31, %v10436_v21  ;;  %v3720_v31 = vld [vmem:[#allocation3 + $0xa8] sm:$0xe] }
 0x28c   : > { %5971 = vmatmul.mubr.bf16.gmra.mxu1 %v10408_v37  ;;  %v3645_v12 = vsel %vm9986_vm8, %v3465_v13, %v3644_v50  ;;  %v3490_v39 = vor.u32 %v3488_v56, %v3487_v29  ;;  %v3492_v25 = vrot.slane %v3487_v29, 4  ;;  %v7424_v16 = vadd.f32 %v7423_v42, %v7422_v19  ;;  %v10457_v13 = vld [vmem:[#allocation3 + $0xa0] sm:$0xf]  ;;  %v10459_v29 = vld [vmem:[#allocation3 + $0xa4] ss:$0 sps:$4 sm:$0x11]  }
 0x28d   : > { %11106 = vst [vmem:[#allocation8_spill] sm:$0xff] %v10443_v32  ;;  %v7319_v8 = vpop.f32.mrf.mxu1  ;;  %3646 = vst [vmem:[#allocation3 + $0xb4] sm:$0xf] %v3645_v12  ;;  %v3470_v35 = vrot.slane %v3468_v2, 7  ;;  %v7425_v43 = vpop.f32.mrf.mxu0  ;;  %v7318_v19 = vadd.f32 %v7317_v41, %v7316_v17  ;;  %v8246_v17 = vld [vmem:[#allocation3 + $0x1c] sm:$0xf]  ;;  %v7033_v23 = vcombine.low %v3720_v31, %v10405_v36 }
 0x28e   : > { %v3491_v40 = vsel %vm8528_vm7, %v3483_v63, %v3490_v39  ;;  %v3656_v49 = vsel %vm9994_vm0, %v3492_v25, %v3655_v51  ;;  %v10452_v37 = vadd.f32 %v7424_v16, %v5864_v11  ;;  %v3787_v63 = vld [vmem:[#allocation3 + $0x18] sm:$0xf]  ;;  %v10465_v51 = vld [vmem:[#allocation3 + $0xac] sm:$0xf]  ;;  %v3846_v42 = vld [vmem:[#allocation3 + $0x9c] sm:$0xe] }
 0x28f   : > { %v7320_v44 = vpop.f32.mrf.mxu1  ;;  %3654 = vst [vmem:[#allocation3 + $0xc4] sm:$0xf] %v3491_v40  ;;  %3657 = vst [vmem:[#allocation3 + $0xc8] sm:$0x1] %v3656_v49  ;;  %v3473_v1 = vor.u32 %v3471_v3, %v3470_v35  ;;  %v3475_v53 = vrot.slane %v3470_v35, 4  ;;  %v7426_v62 = vpop.f32.mrf.mxu0  ;;  %v10469_v41 = vcombine.low %v3787_v63, %v8246_v17  ;;  %v7126_v39 = vcombine.low %v3846_v42, %v10457_v13 }
 0x290   : > { %11107 = vst [vmem:[#allocation9_spill] sm:$0xff] %v10452_v37  ;;  %v10454_v50 = vadd.f32 %v7320_v44, %v7319_v8  ;;  %v7427_v38 = vadd.f32 %v7426_v62, %v7425_v43  ;;  %v5872_v25 = vadd.f32 %v7318_v19, %v10436_v21  ;;  %v8217_v8 = vld [vmem:[#allocation3 + $0xb0] ss:$0 sps:$4 sm:$0x11]   ;;  %v5213_v35 = vrot.slane %v10459_v29, 1 }
 0x291   : > { %v3474_v11 = vsel %vm8528_vm7, %v3466_v27, %v3473_v1  ;;  %v3649_v46 = vsel %vm9994_vm0, %v3475_v53, %v3648_v55  ;;  %v7428_v56 = vpop.f32.mrf.mxu0  ;;  %v7127_v3 = vcombine.low %v3847_v52, %v10465_v51  ;;  %v5212_v43 = vrot.slane %v7126_v39, 1  ;;  %v3770_v40 = vld [vmem:[#allocation3 + $0xc] sm:$0xe]  ;;  %v10481_v53 = vld [vmem:[#allocation3 + $0x14] ss:$0 sps:$4 sm:$0x11]   ;;  %v7322_v62 = vpop.f32.mrf.mxu1 }
 0x292   : > { %3647 = vst [vmem:[#allocation3 + $0xb8] sm:$0xf] %v3474_v11  ;;  %3650 = vst [vmem:[#allocation3 + $0xbc] sm:$0x1] %v3649_v46  ;;  %v10467_v2 = vadd.f32 %v7427_v38, %v5869_v33  ;;  %v4462_v49 = vshll.u32 %v10053_v10, 16  ;;  %v4926_v44 = vshll.u32 %v10469_v41, 16 }
 0x293   : > { %v7429_v12 = vpop.f32.mrf.mxu0  ;;  %v4293_v27 = vrot.slane %v7033_v23, 1  ;;  %v4294_v1 = vrot.slane %v10411_v45, 1  ;;  %v10484_v38 = vsel %vm1499_vm6, %v5212_v43, %v5213_v35  ;;  %v5215_v11 = vrot.slane %v7127_v3, 1  ;;  %v3752_v45 = vld [vmem:[#allocation3 + $0xc0] sm:$0xf] }
 0x294   : > { %11108 = vst [vmem:[#allocation10_spill] sm:$0xff] %v10467_v2  ;;  %v7430_v16 = vadd.f32 %v7429_v12, %v7428_v56  ;;  %v3750_v36 = vld [vmem:[#allocation3 + $0xb4] sm:$0xf]  ;;  %11110 = vst [vmem:[#allocation12_spill] sm:$0xff] %v10484_v38  ;;  %v5216_v46 = vrot.slane %v8217_v8, 1 }
 0x295   : > { %v3688_v33 = vld [vmem:[#allocation3 + $0xb4] sm:$0xf]  ;;  %v8247_v56 = vld [vmem:[#allocation3 + $0x10] sm:$0xf]  ;;  %v4295_v8 = vsel %vm1499_vm6, %v4293_v27, %v4294_v1  ;;  %v5877_v27 = vadd.f32 %v10454_v50, %v10436_v21  ;;  %v4467_v50 = vshll.u32 %v10481_v53, 16 }
 0x296   : > { %v10477_v55 = vadd.f32 %v7430_v16, %v5872_v25  ;;  %v3721_v19 = vld [vmem:[#allocation3 + $0xb4] sm:$0xe]  ;;  %v7067_v63 = vcombine.low %v3770_v40, %v8247_v56  ;;  %v3753_v17 = vld [vmem:[#allocation3 + $0xc4] sm:$0xf]  ;;  %v10489_v25 = vsel %vm1499_vm6, %v5215_v11, %v5216_v46  ;;  %v4464_v16 = vrot.slane %v4462_v49, 1 }
 0x297   : > { %11111 = vst [vmem:[#allocation13_spill] sm:$0xff] %v10489_v25  ;;  %v10493_v35 = vcombine.low %v3752_v45, %v3753_v17  ;;  %v4928_v56 = vrot.slane %v4926_v44, 1  ;;  %v4924_v46 = vshrl.u32 %v10469_v41, 16  ;;  %v4460_v25 = vshrl.u32 %v10053_v10, 16 }
 0x298   : > { %11109 = vst [vmem:[#allocation11_spill] sm:$0xff] %v10477_v55  ;;  %v7323_v55 = vpop.f32.mrf.mxu1 }
 0x299   : > { %v3751_v31 = vld [vmem:[#allocation3 + $0xb8] sm:$0xf]  ;;  %v8167_v39 = vld [vmem:[#allocation3 + $0xbc] ss:$0 sps:$4 sm:$0x11]   ;;  %v7324_v1 = vadd.f32 %v7323_v55, %v7322_v62  ;;  %v4929_v28 = vor.u32 %v4928_v56, %v4924_v46  ;;  %v4465_v46 = vor.u32 %v4464_v16, %v4460_v25  ;;  %v4469_v25 = vrot.slane %v4467_v50, 1 }
 0x29a   : > { %v3689_v42 = vld [vmem:[#allocation3 + $0xb8] sm:$0xf]  ;;  %v10486_v12 = vcombine.low %v3750_v36, %v3751_v31  ;;  %v4183_v40 = vshll.u32 %v8167_v39, 16  ;;  %v4715_v36 = vrot.slane %v7067_v63, 1  ;;  %v8248_v31 = vld [vmem:[#allocation3 + $0x28] sm:$0xf] }
 0x29b   : > { %v7002_v23 = vcombine.low %v3688_v33, %v3689_v42  ;;  %v7034_v52 = vcombine.low %v3721_v19, %v3689_v42  ;;  %v4716_v33 = vrot.slane %v10481_v53, 1  ;;  %v3789_v19 = vld [vmem:[#allocation3 + $0x24] sm:$0xf]  ;;  %v8249_v63 = vld [vmem:[#allocation3 + $0x20] ss:$0 sps:$4 sm:$0x11]  }
 0x29c   : > { %6131 = vmatprep.mubr.bf16.mxu0 %v10486_v12  ;;  %v7431_v43 = vpop.f32.mrf.mxu0  ;;  %v10498_v42 = vcombine.low %v3789_v19, %v8248_v31  ;;  %v4185_v37 = vrot.slane %v4183_v40, 1  ;;  %v4297_v32 = vrot.slane %v8167_v39, 1  ;;  %v10508_v62 = vld [vmem:[#allocation3 + $0xb8] sm:$0xf]  ;;  %v3848_v31 = vld [vmem:[#allocation3 + $0xb4] sm:$0xe] }
 0x29d   : > { %v4178_v3 = vshll.u32 %v7002_v23, 16  ;;  %6132 = vmatmul.mubr.bf16.gmra.mxu0 %v4295_v8  ;;  %v4176_v11 = vshrl.u32 %v7002_v23, 16  ;;  %v4296_v45 = vrot.slane %v7034_v52, 1  ;;  %v4931_v8 = vshll.u32 %v8249_v63, 16  ;;  %v10510_v52 = vld [vmem:[#allocation3 + $0xc4] sm:$0xf] }
 0x29e   : > { %6139 = vmatprep.mubr.bf16.mxu0 %v10493_v35  ;;  %v7432_v17 = vpop.f32.mrf.mxu0  ;;  %v4938_v55 = vshll.u32 %v10498_v42, 16  ;;  %v4717_v10 = vsel %vm1499_vm6, %v4715_v36, %v4716_v33  ;;  %v10513_v56 = vld [vmem:[#allocation3 + $0x20] ss:$0 sps:$4 sm:$0x11]   ;;  %v3791_v33 = vld [vmem:[#allocation3 + $0x30] sm:$0xf] }
 0x29f   : > { %v4180_v49 = vrot.slane %v4178_v3, 1  ;;  %v7433_v2 = vadd.f32 %v7432_v17, %v7431_v43  ;;  %v3771_v3 = vld [vmem:[#allocation3 + $0x18] sm:$0xe]  ;;  %v8250_v43 = vld [vmem:[#allocation3 + $0x1c] sm:$0xf]  ;;  %v4298_v53 = vsel %vm1499_vm6, %v4296_v45, %v4297_v32  ;;  %v4474_v17 = vshll.u32 %v10064_v14, 16 }
 0x2a0   : > { %v7434_v38 = vpop.f32.mrf.mxu0  ;;  %v7068_v40 = vcombine.low %v3771_v3, %v8250_v43  ;;  %v4940_v16 = vrot.slane %v4938_v55, 1  ;;  %v8251_v45 = vld [vmem:[#allocation3 + $0x34] sm:$0xf]  ;;  %v10527_v3 = vld [vmem:[#allocation3 + $0xc8] ss:$0 sps:$4 sm:$0x11]  }
 0x2a1   : > { %v4181_v44 = vor.u32 %v4180_v49, %v4176_v11  ;;  %v10503_v24 = vadd.f32 %v7433_v2, %v5877_v27  ;;  %v4933_v11 = vrot.slane %v4931_v8, 1  ;;  %v5880_v2 = vadd.f32 %v7324_v1, %v10436_v21  ;;  %v3849_v27 = vld [vmem:[#allocation3 + $0xc0] sm:$0xe]  ;;  %v10519_v8 = vld [vmem:[#allocation3 + $0xbc] ss:$0 sps:$4 sm:$0x11]  }
 0x2a2   : > { %v7435_v39 = vpop.f32.mrf.mxu0  ;;  %v7128_v1 = vcombine.low %v3848_v31, %v10508_v62  ;;  %v4718_v43 = vrot.slane %v7068_v40, 1  ;;  %v4476_v40 = vrot.slane %v4474_v17, 1 }
 0x2a3   : > { %11112 = vst [vmem:[#allocation14_spill] sm:$0xff] %v10503_v24  ;;  %v4186_v19 = vsel %vm1226_vm4, %v4181_v44, %v4185_v37  ;;  %v7436_v37 = vadd.f32 %v7435_v39, %v7434_v38  ;;  %v4934_v36 = vsel %vm1226_vm4, %v4929_v28, %v4933_v11  ;;  %v7129_v38 = vcombine.low %v3849_v27, %v10510_v52 }
 0x2a4   : > { %5978 = vmatprep.mubr.bf16.mxu1 %v4186_v19  ;;  %v7325_v49 = vpop.f32.mrf.mxu1  ;;  %v7437_v63 = vpop.f32.mrf.mxu0  ;;  %v10525_v44 = vcombine.low %v3791_v33, %v8251_v45  ;;  %v4719_v39 = vrot.slane %v10513_v56, 1  ;;  %v4470_v27 = vsel %vm1226_vm4, %v4465_v46, %v4469_v25  ;;  %v8253_v25 = vld [vmem:[#allocation3 + $0x28] sm:$0xf] }
 0x2a5   : > { %5979 = vmatmul.mubr.bf16.gmra.mxu1 %v7002_v23  ;;  %6140 = vmatmul.mubr.bf16.gmra.mxu0 %v4298_v53  ;;  %v10523_v23 = vadd.f32 %v7436_v37, %v5880_v2  ;;  %v4936_v2 = vshrl.u32 %v10498_v42, 16  ;;  %v8252_v37 = vld [vmem:[#allocation3 + $0x2c] ss:$0 sps:$4 sm:$0x11]   ;;  %v5221_v33 = vrot.slane %v7129_v38, 1 }
 0x2a6   : > { %6180 = vmatprep.mubr.bf16.mxu1 %v4717_v10  ;;  %v7326_v32 = vpop.f32.mrf.mxu1  ;;  %6341 = vmatprep.mubr.bf16.mxu0 %v4934_v36  ;;  %v7438_v28 = vpop.f32.mrf.mxu0  ;;  %v5218_v10 = vrot.slane %v7128_v1, 1  ;;  %v4943_v31 = vshll.u32 %v8252_v37, 16  ;;  %v5219_v36 = vrot.slane %v10519_v8, 1  ;;  %v4950_v45 = vshll.u32 %v10525_v44, 16 }
 0x2a7   : > { %11113 = vst [vmem:[#allocation15_spill] sm:$0xff] %v10523_v23  ;;  %v7327_v19 = vadd.f32 %v7326_v32, %v7325_v49  ;;  %v7439_v11 = vadd.f32 %v7438_v28, %v7437_v63  ;;  %v4941_v32 = vor.u32 %v4940_v16, %v4936_v2  ;;  %v8183_v63 = vld [vmem:[%s11087_s3 + $0x230] sm:$0xff]   ;;  %v5222_v1 = vrot.slane %v10527_v3, 1  ;;  %v3772_v28 = vld [vmem:[#allocation3 + $0x24] sm:$0xe] }
 0x2a8   : > { %v7328_v53 = vpop.f32.mrf.mxu1  ;;  %v7440_v55 = vpop.f32.mrf.mxu0  ;;  %v4720_v46 = vsel %vm1499_vm6, %v4718_v43, %v4719_v39  ;;  %v10543_v38 = vsel %vm1499_vm6, %v5218_v10, %v5219_v36  ;;  %v7069_v17 = vcombine.low %v3772_v28, %v8253_v25  ;;  %v4945_v24 = vrot.slane %v4943_v31, 1  ;;  %v8254_v43 = vld [vmem:[%s11087_s3 + $0x238] sm:$0xff]   ;;  %v3793_v10 = vld [vmem:[#allocation3 + $0x3c] sm:$0xf]  ;;  %v8190_v36 = vld [vmem:[%s11087_s3 + $0x228] sm:$0xff]  }
 0x2a9   : > { %v5885_v50 = vadd.f32 %v7327_v19, %v10436_v21  ;;  %v10548_v54 = vsel %vm1499_vm6, %v5221_v33, %v5222_v1  ;;  %v4472_v39 = vshrl.u32 %v10064_v14, 16  ;;  %v4486_v33 = vshll.u32 %v10109_v0, 16  ;;  %v8197_v25 = vld [vmem:[%s11087_s3 + $0x220] sm:$0xff]  }
 0x2aa   : > { %v7329_v49 = vpop.f32.mrf.mxu1  ;;  %v7441_v23 = vpop.f32.mrf.mxu0  ;;  %v4946_v31 = vsel %vm1226_vm4, %v4941_v32, %v4945_v24  ;;  %v4722_v24 = vrot.slane %v10545_v5, 1  ;;  %v4948_v32 = vshrl.u32 %v10525_v44, 16 }
 0x2ab   : > { %v10539_v37 = vadd.f32 %v7439_v11, %v5885_v50  ;;  %v7330_v19 = vadd.f32 %v7329_v49, %v7328_v53  ;;  %v7442_v16 = vadd.f32 %v7441_v23, %v7440_v55  ;;  %v4479_v23 = vshll.u32 %v10513_v56, 16  ;;  %v8255_v55 = vld [vmem:[#allocation3 + $0x40] sm:$0xf] }
 0x2ac   : > { %v7331_v2 = vpop.f32.mrf.mxu1  ;;  %v4952_v50 = vrot.slane %v4950_v45, 1  ;;  %v4721_v49 = vrot.slane %v7069_v17, 1  ;;  %v8256_v45 = vld [vmem:[#allocation3 + $0x38] ss:$0 sps:$4 sm:$0x11]  }
 0x2ad   : > { %6181 = vmatmul.mubr.bf16.vlgmr.msra.gmra.mxu1 %v4470_v27  ;;  %v5888_v11 = vadd.f32 %v7330_v19, %v10436_v21  ;;  %6342 = vmatmul.mubr.bf16.vlgmr.msra.gmra.mxu0 %v10469_v41  ;;  %v10558_v27 = vcombine.low %v3793_v10, %v8255_v55  ;;  %v4477_v41 = vor.u32 %v4476_v40, %v4472_v39  ;;  %v4955_v1 = vshll.u32 %v8256_v45, 16  ;;  %v3773_v40 = vld [vmem:[#allocation3 + $0x30] sm:$0xe] }
 0x2ae   : > { %7857 = vmatpush3.bf16.msra.mxu1 %v8254_v43  ;;  %6188 = vmatprep.mubr.bf16.mxu1 %v4720_v46  ;;  %v7332_v53 = vpop.f32.mrf.mxu1  ;;  %v4481_v28 = vrot.slane %v4479_v23, 1  ;;  %v4953_v19 = vor.u32 %v4952_v50, %v4948_v32  ;;  %v10576_v23 = vld [vmem:[#allocation3 + $0x38] ss:$0 sps:$4 sm:$0x11]   ;;  %v4484_v10 = vshrl.u32 %v10109_v0, 16  ;;  %v4498_v50 = vshll.u32 %v10120_v7, 16 }
 0x2af   : > { %7850 = vmatprep.subr.bf16.mxu1 %v8183_v63  ;;  %v10564_v14 = vadd.f32 %v7442_v16, %v5888_v11  ;;  %v10566_v56 = vadd.f32 %v7332_v53, %v7331_v2  ;;  %6349 = vmatprep.mubr.bf16.mxu0 %v4946_v31  ;;  %v4962_v46 = vshll.u32 %v10558_v27, 16  ;;  %v4488_v16 = vrot.slane %v4486_v33, 1  ;;  %v8257_v2 = vld [vmem:[#allocation3 + $0x34] sm:$0xf]  ;;  %v3795_v31 = vld [vmem:[#allocation3 + $0x48] sm:$0xf] }
 0x2b0   : > { %7802 = vmatpush3.bf16.msra.mxu0 %v8254_v43  ;;  %v4482_v17 = vsel %vm1226_vm4, %v4477_v41, %v4481_v28  ;;  %v7070_v11 = vcombine.low %v3773_v40, %v8257_v2  ;;  %v4723_v43 = vsel %vm1499_vm6, %v4721_v49, %v4722_v24  ;;  %v4957_v39 = vrot.slane %v4955_v1, 1  ;;  %v8258_v33 = vld [vmem:[#allocation3 + $0x4c] sm:$0xf]  ;;  %v8204_v49 = vld [vmem:[%s11087_s3 + $0x218] sm:$0xff]   ;;  %v7334_v1 = vpop.f32.mrf.mxu1 }
 0x2b1   : > { %7803 = vmatprep.subr.bf16.mxu0 %v8183_v63  ;;  %v4491_v53 = vshll.u32 %v10545_v5, 16  ;;  %v4964_v55 = vrot.slane %v4962_v46, 1  ;;  %v10583_v41 = vcombine.low %v3795_v31, %v8258_v33  ;;  %v4489_v0 = vor.u32 %v4488_v16, %v4484_v10  ;;  %v8260_v16 = vld [vmem:[#allocation3 + $0x40] sm:$0xf] }
 0x2b2   : > { %7858 = vmatpush3.bf16.msra.mxu1 %v8183_v63  ;;  %v4724_v5 = vrot.slane %v7070_v11, 1  ;;  %v4725_v24 = vrot.slane %v10576_v23, 1  ;;  %v4960_v32 = vshrl.u32 %v10558_v27, 16  ;;  %v4500_v40 = vrot.slane %v4498_v50, 1  ;;  %v7335_v31 = vpop.f32.mrf.mxu1 }
 0x2b3   : > { %7851 = vmatprep.subr.bf16.mxu1 %v8190_v36  ;;  %v4493_v28 = vrot.slane %v4491_v53, 1  ;;  %v4496_v53 = vshrl.u32 %v10120_v7, 16  ;;  %v8218_v7 = vld [vmem:[%s11087_s3 + $0x208] sm:$0xff]  }
 0x2b4   : > { %7804 = vmatpush3.bf16.msra.mxu0 %v8183_v63  ;;  %v4958_v63 = vsel %vm1226_vm4, %v4953_v19, %v4957_v39  ;;  %v3774_v19 = vld [vmem:[#allocation3 + $0x3c] sm:$0xe]  ;;  %v4965_v46 = vor.u32 %v4964_v55, %v4960_v32  ;;  %v4726_v39 = vsel %vm1499_vm6, %v4724_v5, %v4725_v24  ;;  %v3797_v55 = vld [vmem:[#allocation3 + $0x54] sm:$0xf]  ;;  %v8261_v32 = vld [vmem:[#allocation3 + $0x58] sm:$0xf] }
 0x2b5   : > { %6189 = vmatmul.mubr.bf16.gmra.mxu1 %v4482_v17  ;;  %7805 = vmatprep.subr.bf16.mxu0 %v8190_v36  ;;  %v4974_v17 = vshll.u32 %v10583_v41, 16  ;;  %v7071_v2 = vcombine.low %v3774_v19, %v8260_v16  ;;  %v4494_v11 = vsel %vm1226_vm4, %v4489_v0, %v4493_v28  ;;  %v4501_v0 = vor.u32 %v4500_v40, %v4496_v53  ;;  %v8262_v40 = vld [vmem:[#allocation3 + $0x50] ss:$0 sps:$4 sm:$0x11]  }
 0x2b6   : > { %6196 = vmatprep.mubr.bf16.mxu1 %v4723_v43  ;;  %7859 = vmatpush3.bf16.msra.mxu1 %v8190_v36  ;;  %v10595_v43 = vld [vmem:[#allocation3 + $0x44] ss:$0 sps:$4 sm:$0x11]   ;;  %v4510_v5 = vshll.u32 %v10178_v59, 16  ;;  %v5893_v28 = vadd.f32 %v10566_v56, %v10436_v21  ;;  %v7336_v19 = vadd.f32 %v7335_v31, %v7334_v1  ;;  %v8263_v56 = vld [vmem:[#allocation3 + $0x4c] sm:$0xf] }
 0x2b7   : > { %6350 = vmatmul.mubr.bf16.gmra.mxu0 %v10498_v42  ;;  %7852 = vmatprep.subr.bf16.mxu1 %v8197_v25  ;;  %v8259_v42 = vld [vmem:[#allocation3 + $0x44] ss:$0 sps:$4 sm:$0x11]   ;;  %v4727_v24 = vrot.slane %v7071_v2, 1 }
 0x2b8   : > { %6357 = vmatprep.mubr.bf16.mxu0 %v4958_v63  ;;  %7806 = vmatpush3.bf16.msra.mxu0 %v8190_v36  ;;  %v4967_v45 = vshll.u32 %v8259_v42, 16  ;;  %v8211_v36 = vld [vmem:[%s11087_s3 + $0x210] sm:$0xff]   ;;  %v4503_v63 = vshll.u32 %v10576_v23, 16  ;;  %v10602_v42 = vcombine.low %v3797_v55, %v8261_v32  ;;  %v4512_v55 = vrot.slane %v4510_v5, 1  ;;  %v8264_v5 = vld [vmem:[#allocation3 + $0x64] sm:$0xf] }
 0x2b9   : > { %7807 = vmatprep.subr.bf16.mxu0 %v8197_v25 }
 0x2ba   : > { %7860 = vmatpush3.bf16.msra.mxu1 %v8197_v25  ;;  %v4969_v10 = vrot.slane %v4967_v45, 1  ;;  %v4728_v45 = vrot.slane %v10595_v43, 1  ;;  %v4986_v53 = vshll.u32 %v10602_v42, 16 }
 0x2bb   : > { %7853 = vmatprep.subr.bf16.mxu1 %v8204_v49 }
 0x2bc   : > { %7808 = vmatpush3.bf16.msra.mxu0 %v8197_v25  ;;  %v7443_v50 = vpop.f32.mrf.mxu0  ;;  %v4970_v33 = vsel %vm1226_vm4, %v4965_v46, %v4969_v10  ;;  %v4976_v25 = vrot.slane %v4974_v17, 1  ;;  %v4979_v17 = vshll.u32 %v8262_v40, 16  ;;  %v4508_v40 = vshrl.u32 %v10178_v59, 16 }
 0x2bd   : > { %6197 = vmatmul.mubr.bf16.gmra.mxu1 %v4494_v11  ;;  %7809 = vmatprep.subr.bf16.mxu0 %v8204_v49  ;;  %v4505_v11 = vrot.slane %v4503_v63, 1  ;;  %v5896_v63 = vadd.f32 %v7336_v19, %v10436_v21 }
 0x2be   : > { %6204 = vmatprep.mubr.bf16.mxu1 %v4726_v39  ;;  %7861 = vmatpush3.bf16.msra.mxu1 %v8204_v49  ;;  %v7444_v23 = vpop.f32.mrf.mxu0  ;;  %v3775_v39 = vld [vmem:[#allocation3 + $0x48] sm:$0xe] }
 0x2bf   : > { %6358 = vmatmul.mubr.bf16.gmra.mxu0 %v10525_v44  ;;  %7854 = vmatprep.subr.bf16.mxu1 %v8211_v36  ;;  %v4972_v44 = vshrl.u32 %v10583_v41, 16  ;;  %v7445_v46 = vadd.f32 %v7444_v23, %v7443_v50  ;;  %v7072_v1 = vcombine.low %v3775_v39, %v8263_v56  ;;  %v4506_v50 = vsel %vm1226_vm4, %v4501_v0, %v4505_v11 }
 0x2c0   : > { %6365 = vmatprep.mubr.bf16.mxu0 %v4970_v33  ;;  %7810 = vmatpush3.bf16.msra.mxu0 %v8204_v49  ;;  %v7446_v16 = vpop.f32.mrf.mxu0  ;;  %v8225_v49 = vld [vmem:[%s11087_s3 + $0x200] sm:$0xff]   ;;  %v10619_v33 = vld [vmem:[#allocation3 + $0x50] ss:$0 sps:$4 sm:$0x11]   ;;  %v4729_v23 = vsel %vm1499_vm6, %v4727_v24, %v4728_v45  ;;  %v4515_v0 = vshll.u32 %v10595_v43, 16  ;;  %v4513_v39 = vor.u32 %v4512_v55, %v4508_v40 }
 0x2c1   : > { %7811 = vmatprep.subr.bf16.mxu0 %v8211_v36  ;;  %v10612_v10 = vadd.f32 %v7445_v46, %v5893_v28  ;;  %v4977_v2 = vor.u32 %v4976_v25, %v4972_v44  ;;  %v4981_v44 = vrot.slane %v4979_v17, 1  ;;  %v3799_v28 = vld [vmem:[#allocation3 + $0x60] sm:$0xf]  ;;  %v4988_v17 = vrot.slane %v4986_v53, 1 }
 0x2c2   : > { %7862 = vmatpush3.bf16.msra.mxu1 %v8211_v36  ;;  %v7447_v31 = vpop.f32.mrf.mxu0  ;;  %v10625_v11 = vcombine.low %v3799_v28, %v8264_v5  ;;  %v4730_v43 = vrot.slane %v7072_v1, 1  ;;  %v4731_v56 = vrot.slane %v10619_v33, 1  ;;  %v4517_v53 = vrot.slane %v4515_v0, 1  ;;  %v3776_v28 = vld [vmem:[#allocation3 + $0x54] sm:$0xe] }
 0x2c3   : > { %7855 = vmatprep.subr.bf16.mxu1 %v8218_v7  ;;  %v7448_v32 = vadd.f32 %v7447_v31, %v7446_v16  ;;  %v4982_v45 = vsel %vm1226_vm4, %v4977_v2, %v4981_v44 }
 0x2c4   : > { %7812 = vmatpush3.bf16.msra.mxu0 %v8211_v36  ;;  %v7337_v25 = vpop.f32.mrf.mxu1  ;;  %v7449_v46 = vpop.f32.mrf.mxu0  ;;  %v4522_v36 = vshll.u32 %v10183_v4, 16  ;;  %v4518_v5 = vsel %vm1226_vm4, %v4513_v39, %v4517_v53  ;;  %v4534_v39 = vshll.u32 %v10246_v48, 16  ;;  %v8268_v53 = vld [vmem:[#allocation3 + $0x68] ss:$0 sps:$4 sm:$0x11]  }
 0x2c5   : > { %6205 = vmatmul.mubr.bf16.gmra.mxu1 %v4506_v50  ;;  %7813 = vmatprep.subr.bf16.mxu0 %v8218_v7  ;;  %v10628_v19 = vadd.f32 %v7448_v32, %v5896_v63  ;;  %v4984_v63 = vshrl.u32 %v10602_v42, 16  ;;  %v8265_v32 = vld [vmem:[#allocation3 + $0x5c] ss:$0 sps:$4 sm:$0x11]  }
 0x2c6   : > { %6212 = vmatprep.mubr.bf16.mxu1 %v4729_v23  ;;  %7863 = vmatpush3.bf16.msra.mxu1 %v8218_v7  ;;  %v7338_v24 = vpop.f32.mrf.mxu1  ;;  %v7450_v59 = vpop.f32.mrf.mxu0  ;;  %v4991_v23 = vshll.u32 %v8265_v32, 16  ;;  %v4524_v1 = vrot.slane %v4522_v36, 1 }
 0x2c7   : > { %11114 = vst [vmem:[#allocation16_spill] sm:$0xff] %v10628_v19  ;;  %6366 = vmatmul.mubr.bf16.gmra.mxu0 %v10558_v27  ;;  %7856 = vmatprep.subr.bf16.mxu1 %v8225_v49  ;;  %v7339_v16 = vadd.f32 %v7338_v24, %v7337_v25  ;;  %v7451_v31 = vadd.f32 %v7450_v59, %v7449_v46  ;;  %v4998_v25 = vshll.u32 %v10625_v11, 16  ;;  %v4520_v19 = vshrl.u32 %v10183_v4, 16 }
 0x2c8   : > { %6373 = vmatprep.mubr.bf16.mxu0 %v4982_v45  ;;  %7814 = vmatpush3.bf16.msra.mxu0 %v8218_v7  ;;  %v7340_v50 = vpop.f32.mrf.mxu1  ;;  %v7452_v2 = vpop.f32.mrf.mxu0  ;;  %v4989_v55 = vor.u32 %v4988_v17, %v4984_v63  ;;  %v4732_v24 = vsel %vm1499_vm6, %v4730_v43, %v4731_v56  ;;  %v8266_v45 = vld [vmem:[#allocation3 + $0x58] sm:$0xf]  ;;  %v4993_v32 = vrot.slane %v4991_v23, 1  ;;  %v8194_v17 = vld [vmem:[#allocation3 + $0x5c] ss:$0 sps:$4 sm:$0x11]  }
 0x2c9   : > { %7815 = vmatprep.subr.bf16.mxu0 %v8225_v49  ;;  %v5901_v27 = vadd.f32 %v7339_v16, %v10436_v21  ;;  %v7073_v16 = vcombine.low %v3776_v28, %v8266_v45  ;;  %v3801_v63 = vld [vmem:[#allocation3 + $0x6c] sm:$0xf]  ;;  %v4525_v56 = vor.u32 %v4524_v1, %v4520_v19  ;;  %v4734_v28 = vrot.slane %v8194_v17, 1  ;;  %v8269_v19 = vld [vmem:[#allocation3 + $0x64] sm:$0xf] }
 0x2ca   : > { %7864 = vmatpush3.bf16.msra.mxu1 %v8225_v49  ;;  %v7341_v44 = vpop.f32.mrf.mxu1  ;;  %v7453_v46 = vpop.f32.mrf.mxu0  ;;  %v4994_v43 = vsel %vm1226_vm4, %v4989_v55, %v4993_v32  ;;  %v4536_v45 = vrot.slane %v4534_v39, 1 }
 0x2cb   : > { %v10636_v40 = vadd.f32 %v7451_v31, %v5901_v27  ;;  %v7342_v7 = vadd.f32 %v7341_v44, %v7340_v50  ;;  %v7454_v59 = vadd.f32 %v7453_v46, %v7452_v2  ;;  %v4527_v31 = vshll.u32 %v10619_v33, 16  ;;  %v8267_v27 = vld [vmem:[#allocation3 + $0x70] sm:$0xf]  ;;  %v3777_v46 = vld [vmem:[#allocation3 + $0x60] sm:$0xe] }
 0x2cc   : > { %7816 = vmatpush3.bf16.msra.mxu0 %v8225_v49  ;;  %v7343_v0 = vpop.f32.mrf.mxu1  ;;  %v5000_v50 = vrot.slane %v4998_v25, 1  ;;  %v10646_v23 = vcombine.low %v3801_v63, %v8267_v27  ;;  %v4996_v33 = vshrl.u32 %v10625_v11, 16  ;;  %v5003_v25 = vshll.u32 %v8268_v53, 16  ;;  %v3803_v63 = vld [vmem:[#allocation3 + $0x78] sm:$0xf] }
 0x2cd   : > { %6213 = vmatmul.mubr.bf16.gmra.mxu1 %v4518_v5  ;;  %v5904_v36 = vadd.f32 %v7342_v7, %v10436_v21  ;;  %v4733_v44 = vrot.slane %v7073_v16, 1  ;;  %v4529_v7 = vrot.slane %v4527_v31, 1  ;;  %v7074_v1 = vcombine.low %v3777_v46, %v8269_v19  ;;  %v10660_v31 = vld [vmem:[#allocation3 + $0xd4] ss:$0 sps:$4 sm:$0x11]  }
 0x2ce   : > { %6220 = vmatprep.mubr.bf16.mxu1 %v4732_v24  ;;  %v7344_v49 = vpop.f32.mrf.mxu1  ;;  %v5010_v55 = vshll.u32 %v10646_v23, 16  ;;  %v5005_v24 = vrot.slane %v5003_v25, 1  ;;  %v4532_v16 = vshrl.u32 %v10246_v48, 16  ;;  %v5225_v48 = vrot.slane %v10660_v31, 1 }
 0x2cf   : > { %6374 = vmatmul.mubr.bf16.gmra.mxu0 %v10583_v41  ;;  %v10648_v4 = vadd.f32 %v7454_v59, %v5904_v36  ;;  %v10650_v2 = vadd.f32 %v7344_v49, %v7343_v0  ;;  %v5001_v41 = vor.u32 %v5000_v50, %v4996_v33  ;;  %v4530_v5 = vsel %vm1226_vm4, %v4525_v56, %v4529_v7  ;;  %v10655_v59 = vld [vmem:[#allocation3 + $0x68] ss:$0 sps:$4 sm:$0x11]   ;;  %v10663_v49 = vld [vmem:[#allocation3 + $0xd0] sm:$0xf] }
 0x2d0   : > { %6381 = vmatprep.mubr.bf16.mxu0 %v4994_v43  ;;  %v4546_v0 = vshll.u32 %v10251_v18, 16  ;;  %v4735_v32 = vsel %vm1499_vm6, %v4733_v44, %v4734_v28  ;;  %v4539_v36 = vshll.u32 %v8194_v17, 16  ;;  %v3850_v43 = vld [vmem:[#allocation3 + $0xcc] sm:$0xe]  ;;  %v5012_v39 = vrot.slane %v5010_v55, 1  ;;  %v7346_v46 = vpop.f32.mrf.mxu1 }
 0x2d1   : > { %11115 = vst [vmem:[#allocation17_spill] sm:$0xff] %v10648_v4  ;;  %v5006_v50 = vsel %vm1226_vm4, %v5001_v41, %v5005_v24  ;;  %v8270_v56 = vld [vmem:[#allocation3 + $0x7c] sm:$0xf]  ;;  %v7130_v33 = vcombine.low %v3850_v43, %v10663_v49  ;;  %v4537_v17 = vor.u32 %v4536_v45, %v4532_v16  ;;  %v4736_v53 = vrot.slane %v7074_v1, 1  ;;  %v3778_v55 = vld [vmem:[#allocation3 + $0x6c] sm:$0xe] }
 0x2d2   : > { %v10666_v27 = vcombine.low %v3803_v63, %v8270_v56  ;;  %v4737_v25 = vrot.slane %v10655_v59, 1  ;;  %v5008_v44 = vshrl.u32 %v10646_v23, 16  ;;  %v8271_v28 = vld [vmem:[#allocation3 + $0x74] ss:$0 sps:$4 sm:$0x11]   ;;  %v7347_v56 = vpop.f32.mrf.mxu1 }
 0x2d3   : > { %v5015_v7 = vshll.u32 %v8271_v28, 16  ;;  %v5224_v41 = vrot.slane %v7130_v33, 1  ;;  %v10677_v16 = vld [vmem:[#allocation3 + $0x74] ss:$0 sps:$4 sm:$0x11]  }
 0x2d4   : > { %v5013_v19 = vor.u32 %v5012_v39, %v5008_v44  ;;  %v5022_v24 = vshll.u32 %v10666_v27, 16  ;;  %v4738_v63 = vsel %vm1499_vm6, %v4736_v53, %v4737_v25  ;;  %v3805_v33 = vld [vmem:[#allocation3 + $0x84] sm:$0xf]  ;;  %v8273_v28 = vld [vmem:[#allocation3 + $0x88] sm:$0xf]  ;;  %v4558_v53 = vshll.u32 %v10323_v6, 16 }
 0x2d5   : > { %6221 = vmatmul.mubr.bf16.gmra.mxu1 %v4530_v5  ;;  %v4548_v5 = vrot.slane %v4546_v0, 1  ;;  %v5017_v43 = vrot.slane %v5015_v7, 1  ;;  %v4551_v0 = vshll.u32 %v10655_v59, 16  ;;  %v4740_v7 = vrot.slane %v10677_v16, 1 }
 0x2d6   : > { %6228 = vmatprep.mubr.bf16.mxu1 %v4735_v32  ;;  %v10674_v32 = vsel %vm1499_vm6, %v5224_v41, %v5225_v48  ;;  %v10684_v41 = vcombine.low %v3805_v33, %v8273_v28  ;;  %v5909_v59 = vadd.f32 %v10650_v2, %v10436_v21  ;;  %v4560_v4 = vrot.slane %v4558_v53, 1 }
 0x2d7   : > { %6382 = vmatmul.mubr.bf16.gmra.mxu0 %v10602_v42  ;;  %v4541_v42 = vrot.slane %v4539_v36, 1  ;;  %v4544_v36 = vshrl.u32 %v10251_v18, 16  ;;  %v5018_v48 = vsel %vm1226_vm4, %v5013_v19, %v5017_v43  ;;  %v8274_v19 = vld [vmem:[#allocation3 + $0x80] ss:$0 sps:$4 sm:$0x11]  }
 0x2d8   : > { %6389 = vmatprep.mubr.bf16.mxu0 %v5006_v50  ;;  %v8272_v50 = vld [vmem:[#allocation3 + $0x70] sm:$0xf] }
 0x2d9   : > { %v7075_v45 = vcombine.low %v3778_v55, %v8272_v50  ;;  %v4542_v1 = vsel %vm1226_vm4, %v4537_v17, %v4541_v42  ;;  %v4549_v44 = vor.u32 %v4548_v5, %v4544_v36  ;;  %v5024_v17 = vrot.slane %v5022_v24, 1 }
 0x2da   : > { %v5020_v42 = vshrl.u32 %v10666_v27, 16  ;;  %v5027_v5 = vshll.u32 %v8274_v19, 16  ;;  %v4553_v50 = vrot.slane %v4551_v0, 1  ;;  %v5034_v36 = vshll.u32 %v10684_v41, 16 }
 0x2db   : > { %v4739_v18 = vrot.slane %v7075_v45, 1  ;;  %v8275_v45 = vld [vmem:[#allocation3 + $0x7c] sm:$0xf] }
 0x2dc   : > { %v7455_v39 = vpop.f32.mrf.mxu0  ;;  %v5025_v43 = vor.u32 %v5024_v17, %v5020_v42  ;;  %v4554_v28 = vsel %vm1226_vm4, %v4549_v44, %v4553_v50  ;;  %v5029_v0 = vrot.slane %v5027_v5, 1  ;;  %v4556_v17 = vshrl.u32 %v10323_v6, 16 }
 0x2dd   : > { %6229 = vmatmul.mubr.bf16.gmra.mxu1 %v4542_v1  ;;  %v3779_v1 = vld [vmem:[#allocation3 + $0x78] sm:$0xe]  ;;  %v4563_v42 = vshll.u32 %v10677_v16, 16 }
 0x2de   : > { %6236 = vmatprep.mubr.bf16.mxu1 %v4738_v63  ;;  %v7456_v25 = vpop.f32.mrf.mxu0  ;;  %v7076_v33 = vcombine.low %v3779_v1, %v8275_v45  ;;  %v5030_v53 = vsel %vm1226_vm4, %v5025_v43, %v5029_v0  ;;  %v4561_v6 = vor.u32 %v4560_v4, %v4556_v17 }
 0x2df   : > { %6390 = vmatmul.mubr.bf16.gmra.mxu0 %v10625_v11  ;;  %v7348_v11 = vadd.f32 %v7347_v56, %v7346_v46  ;;  %v7457_v55 = vadd.f32 %v7456_v25, %v7455_v39  ;;  %v4741_v39 = vsel %vm1499_vm6, %v4739_v18, %v4740_v7  ;;  %v10697_v25 = vld [vmem:[#allocation3 + $0x80] ss:$0 sps:$4 sm:$0x11]   ;;  %v4570_v7 = vshll.u32 %v10328_v47, 16 }
 0x2e0   : > { %6397 = vmatprep.mubr.bf16.mxu0 %v5018_v48  ;;  %v7458_v24 = vpop.f32.mrf.mxu0  ;;  %v4742_v1 = vrot.slane %v7076_v33, 1 }
 0x2e1   : > { %v10691_v63 = vadd.f32 %v7457_v55, %v5909_v59  ;;  %v5912_v2 = vadd.f32 %v7348_v11, %v10436_v21  ;;  %v3807_v55 = vld [vmem:[#allocation3 + $0x90] sm:$0xf]  ;;  %v5036_v11 = vrot.slane %v5034_v36, 1  ;;  %v4572_v17 = vrot.slane %v4570_v7, 1 }
 0x2e2   : > { %v7459_v48 = vpop.f32.mrf.mxu0  ;;  %v4575_v7 = vshll.u32 %v10697_v25, 16 }
 0x2e3   : > { %v7460_v46 = vadd.f32 %v7459_v48, %v7458_v24  ;;  %v8276_v24 = vld [vmem:[#allocation3 + $0x94] sm:$0xf]  ;;  %v4743_v48 = vrot.slane %v10697_v25, 1 }
 0x2e4   : > { %v7349_v56 = vpop.f32.mrf.mxu1  ;;  %v7461_v59 = vpop.f32.mrf.mxu0  ;;  %v10705_v18 = vcombine.low %v3807_v55, %v8276_v24  ;;  %v3780_v55 = vld [vmem:[#allocation3 + $0x84] sm:$0xe] }
 0x2e5   : > { %6237 = vmatmul.mubr.bf16.gmra.mxu1 %v4554_v28  ;;  %v10701_v19 = vadd.f32 %v7460_v46, %v5912_v2  ;;  %v8277_v28 = vld [vmem:[#allocation3 + $0x8c] ss:$0 sps:$4 sm:$0x11]   ;;  %v4565_v46 = vrot.slane %v4563_v42, 1 }
 0x2e6   : > { %6244 = vmatprep.mubr.bf16.mxu1 %v4741_v39  ;;  %v7350_v44 = vpop.f32.mrf.mxu1  ;;  %v7462_v50 = vpop.f32.mrf.mxu0  ;;  %v5039_v2 = vshll.u32 %v8277_v28, 16  ;;  %v5044_v25 = vshrl.u32 %v10705_v18, 16 }
 0x2e7   : > { %6398 = vmatmul.mubr.bf16.gmra.mxu0 %v10646_v23  ;;  %v7351_v5 = vadd.f32 %v7350_v44, %v7349_v56  ;;  %v7463_v16 = vadd.f32 %v7462_v50, %v7461_v59  ;;  %v5032_v23 = vshrl.u32 %v10684_v41, 16  ;;  %v5046_v56 = vshll.u32 %v10705_v18, 16 }
 0x2e8   : > { %6405 = vmatprep.mubr.bf16.mxu0 %v5030_v53  ;;  %v7352_v45 = vpop.f32.mrf.mxu1  ;;  %v7464_v36 = vpop.f32.mrf.mxu0  ;;  %v4566_v59 = vsel %vm1226_vm4, %v4561_v6, %v4565_v46  ;;  %v8278_v53 = vld [vmem:[#allocation3 + $0x88] sm:$0xf]  ;;  %v5041_v42 = vrot.slane %v5039_v2, 1  ;;  %v4568_v6 = vshrl.u32 %v10328_v47, 16 }
 0x2e9   : > { %v5917_v43 = vadd.f32 %v7351_v5, %v10436_v21  ;;  %v5037_v0 = vor.u32 %v5036_v11, %v5032_v23  ;;  %v7077_v24 = vcombine.low %v3780_v55, %v8278_v53  ;;  %v4744_v21 = vsel %vm1499_vm6, %v4742_v1, %v4743_v48  ;;  %v8208_v5 = vld [vmem:[#allocation3 + $0x8c] ss:$0 sps:$4 sm:$0x11]   ;;  %v10719_v11 = vld [vmem:[%s11088_s4] ss:$0 sm:$0xff] }
 0x2ea   : > { %v7353_v39 = vpop.f32.mrf.mxu1  ;;  %v7465_v33 = vpop.f32.mrf.mxu0  ;;  %v5048_v48 = vrot.slane %v5046_v56, 1  ;;  %v4746_v55 = vrot.slane %v8208_v5, 1  ;;  %v3781_v56 = vld [vmem:[#allocation3 + $0x90] sm:$0xe] }
 0x2eb   : > { %v10712_v44 = vadd.f32 %v7463_v16, %v5917_v43  ;;  %v7354_v4 = vadd.f32 %v7353_v39, %v7352_v45  ;;  %v7466_v50 = vadd.f32 %v7465_v33, %v7464_v36  ;;  %v3809_v45 = vld [vmem:[#allocation3 + $0x9c] sm:$0xf]  ;;  %v5042_v1 = vsel %vm1226_vm4, %v5037_v0, %v5041_v42 }
 0x2ec   : > { %v7355_v28 = vpop.f32.mrf.mxu1  ;;  %v10727_v2 = vcombine.low %v3809_v45, %v10457_v13  ;;  %v4582_v43 = vshll.u32 %v10371_v9, 16  ;;  %v4573_v39 = vor.u32 %v4572_v17, %v4568_v6  ;;  %v4745_v47 = vrot.slane %v7077_v24, 1  ;;  %v8212_v24 = vld [vmem:[#allocation3 + $0x98] ss:$0 sps:$4 sm:$0x11]  }
 0x2ed   : > { %6245 = vmatmul.mubr.bf16.gmra.mxu1 %v4566_v59  ;;  %v5920_v16 = vadd.f32 %v10719_v11, %v7354_v4  ;;  %v8280_v4 = vld [vmem:[#allocation3 + $0x98] ss:$0 sps:$4 sm:$0x11]   ;;  %v4577_v33 = vrot.slane %v4575_v7, 1  ;;  %v5049_v59 = vor.u32 %v5048_v48, %v5044_v25  ;;  %v4594_v42 = vshll.u32 %v10376_v60, 16 }
 0x2ee   : > { %6252 = vmatprep.mubr.bf16.mxu1 %v4744_v21  ;;  %v7356_v23 = vpop.f32.mrf.mxu1  ;;  %v5058_v0 = vshll.u32 %v10727_v2, 16  ;;  %v4584_v53 = vrot.slane %v4582_v43, 1  ;;  %v8281_v21 = vld [vmem:[#allocation3 + $0x94] sm:$0xf]  ;;  %v4587_v6 = vshll.u32 %v8208_v5, 16  ;;  %v5063_v25 = vshll.u32 %v10459_v29, 16 }
 0x2ef   : > { %6406 = vmatmul.mubr.bf16.gmra.mxu0 %v10666_v27  ;;  %v10730_v36 = vadd.f32 %v7466_v50, %v5920_v16  ;;  %v7357_v46 = vadd.f32 %v7356_v23, %v7355_v28  ;;  %v5051_v27 = vshll.u32 %v8280_v4, 16  ;;  %v4578_v13 = vsel %vm1226_vm4, %v4573_v39, %v4577_v33  ;;  %v3811_v7 = vld [vmem:[#allocation3 + $0xa8] sm:$0xf]  ;;  %v3782_v33 = vld [vmem:[#allocation3 + $0x9c] sm:$0xe] }
 0x2f0   : > { %6413 = vmatprep.mubr.bf16.mxu0 %v5042_v1  ;;  %v7078_v50 = vcombine.low %v3781_v56, %v8281_v21  ;;  %v4747_v28 = vsel %vm1499_vm6, %v4745_v47, %v4746_v55  ;;  %v4580_v16 = vshrl.u32 %v10371_v9, 16  ;;  %v5060_v23 = vrot.slane %v5058_v0, 1  ;;  %v7358_v43 = vpop.f32.mrf.mxu1  ;;  %v8282_v0 = vld [vmem:[#allocation3 + $0xa0] sm:$0xf] }
 0x2f1   : > { %v5053_v17 = vrot.slane %v5051_v27, 1  ;;  %v10741_v1 = vcombine.low %v3811_v7, %v10465_v51  ;;  %v4749_v47 = vrot.slane %v8212_v24, 1  ;;  %v5056_v55 = vshrl.u32 %v10727_v2, 16  ;;  %v8215_v29 = vld [vmem:[#allocation3 + $0xa4] ss:$0 sps:$4 sm:$0x11]  }
 0x2f2   : > { %v4585_v48 = vor.u32 %v4584_v53, %v4580_v16  ;;  %v4748_v39 = vrot.slane %v7078_v50, 1  ;;  %v4589_v9 = vrot.slane %v4587_v6, 1  ;;  %v4596_v5 = vrot.slane %v4594_v42, 1 }
 0x2f3   : > { %v5054_v45 = vsel %vm1226_vm4, %v5049_v59, %v5053_v17  ;;  %v5061_v4 = vor.u32 %v5060_v23, %v5056_v55  ;;  %v4599_v27 = vshll.u32 %v8212_v24, 16  ;;  %v4592_v51 = vshrl.u32 %v10376_v60, 16  ;;  %v3813_v17 = vld [vmem:[#allocation3 + $0xb4] sm:$0xf] }
 0x2f4   : > { %v4590_v59 = vsel %vm1226_vm4, %v4585_v48, %v4589_v9  ;;  %v7079_v56 = vcombine.low %v3782_v33, %v8282_v0  ;;  %v4750_v21 = vsel %vm1499_vm6, %v4748_v39, %v4749_v47  ;;  %v5065_v50 = vrot.slane %v5063_v25, 1  ;;  %v8283_v25 = vld [vmem:[#allocation3 + $0xb0] ss:$0 sps:$4 sm:$0x11]  }
 0x2f5   : > { %6253 = vmatmul.mubr.bf16.gmra.mxu1 %v4578_v13  ;;  %v7359_v13 = vpop.f32.mrf.mxu1  ;;  %v4601_v16 = vrot.slane %v4599_v27, 1  ;;  %v10752_v60 = vcombine.low %v3813_v17, %v10508_v62  ;;  %v4606_v7 = vshll.u32 %v10416_v30, 16  ;;  %v4752_v55 = vrot.slane %v8215_v29, 1 }
 0x2f6   : > { %6260 = vmatprep.mubr.bf16.mxu1 %v4747_v28  ;;  %v4597_v28 = vor.u32 %v4596_v5, %v4592_v51  ;;  %v5066_v24 = vsel %vm1226_vm4, %v5061_v4, %v5065_v50  ;;  %v7360_v23 = vadd.f32 %v7359_v13, %v7358_v43  ;;  %v4751_v47 = vrot.slane %v7079_v56, 1  ;;  %v3783_v4 = vld [vmem:[#allocation3 + $0xa8] sm:$0xe]  ;;  %v8284_v43 = vld [vmem:[#allocation3 + $0xac] sm:$0xf] }
 0x2f7   : > { %6414 = vmatmul.mubr.bf16.gmra.mxu0 %v10684_v41  ;;  %v5070_v41 = vshll.u32 %v10741_v1, 16  ;;  %v5075_v9 = vshll.u32 %v8283_v25, 16  ;;  %v5082_v33 = vshll.u32 %v10752_v60, 16  ;;  %v8219_v50 = vld [vmem:[#allocation3 + $0xb0] ss:$0 sps:$4 sm:$0x11]  }
 0x2f8   : > { %6421 = vmatprep.mubr.bf16.mxu0 %v5054_v45  ;;  %v5925_v45 = vadd.f32 %v10719_v11, %v7357_v46  ;;  %v4602_v62 = vsel %vm1226_vm4, %v4597_v28, %v4601_v16  ;;  %v4608_v46 = vrot.slane %v4606_v7, 1  ;;  %v5928_v51 = vadd.f32 %v10719_v11, %v7360_v23  ;;  %v3815_v16 = vld [vmem:[#allocation3 + $0xc0] sm:$0xf] }
 0x2f9   : > { %v5072_v6 = vrot.slane %v5070_v41, 1  ;;  %v4604_v17 = vshrl.u32 %v10416_v30, 16  ;;  %v5084_v23 = vrot.slane %v5082_v33, 1 }
 0x2fc   : > { %v7467_v53 = vpop.f32.mrf.mxu0 }
 0x2fd   : > { %6261 = vmatmul.mubr.bf16.gmra.mxu1 %v4590_v59  ;;  %v7080_v59 = vcombine.low %v3783_v4, %v8284_v43  ;;  %v5087_v4 = vshll.u32 %v10519_v8, 16 }
 0x2fe   : > { %6268 = vmatprep.mubr.bf16.mxu1 %v4750_v21  ;;  %v7468_v42 = vpop.f32.mrf.mxu0  ;;  %v5077_v21 = vrot.slane %v5075_v9, 1  ;;  %v4755_v9 = vrot.slane %v8219_v50, 1 }
 0x2ff   : > { %6422 = vmatmul.mubr.bf16.gmra.mxu0 %v10705_v18  ;;  %v7469_v48 = vadd.f32 %v7468_v42, %v7467_v53  ;;  %v5068_v18 = vshrl.u32 %v10741_v1, 16  ;;  %v4753_v53 = vsel %vm1499_vm6, %v4751_v47, %v4752_v55  ;;  %v4611_v42 = vshll.u32 %v8215_v29, 16 }
 0x300   : > { %6429 = vmatprep.mubr.bf16.mxu0 %v5066_v24  ;;  %v7470_v39 = vpop.f32.mrf.mxu0  ;;  %v4609_v55 = vor.u32 %v4608_v46, %v4604_v17 }
 0x301   : > { %v10757_v5 = vadd.f32 %v7469_v48, %v5925_v45  ;;  %v5073_v41 = vor.u32 %v5072_v6, %v5068_v18  ;;  %v10769_v48 = vcombine.low %v3815_v16, %v10510_v52  ;;  %v4754_v18 = vrot.slane %v7080_v59, 1  ;;  %v3784_v52 = vld [vmem:[#allocation3 + $0xb4] sm:$0xe] }
 0x302   : > { %v7471_v27 = vpop.f32.mrf.mxu0  ;;  %v5089_v16 = vrot.slane %v5087_v4, 1  ;;  %v3785_v4 = vld [vmem:[#allocation3 + $0xc0] sm:$0xe] }
 0x303   : > { %v7472_v0 = vadd.f32 %v7471_v27, %v7470_v39  ;;  %v5078_v7 = vsel %vm1226_vm4, %v5073_v41, %v5077_v21  ;;  %v4618_v39 = vshll.u32 %v10421_v26, 16  ;;  %v3817_v41 = vld [vmem:[#allocation3 + $0xcc] sm:$0xf]  ;;  %v5094_v46 = vshll.u32 %v10769_v48, 16 }
 0x304   : > { %v7361_v56 = vpop.f32.mrf.mxu1  ;;  %v7473_v13 = vpop.f32.mrf.mxu0 }
 0x305   : > { %6269 = vmatmul.mubr.bf16.gmra.mxu1 %v4602_v62  ;;  %v10764_v24 = vadd.f32 %v7472_v0, %v5928_v51  ;;  %v4613_v62 = vrot.slane %v4611_v42, 1  ;;  %v4620_v59 = vrot.slane %v4618_v39, 1  ;;  %v4756_v42 = vsel %vm1499_vm6, %v4754_v18, %v4755_v9 }
 0x306   : > { %6276 = vmatprep.mubr.bf16.mxu1 %v4753_v53  ;;  %v7362_v28 = vpop.f32.mrf.mxu1  ;;  %v7474_v45 = vpop.f32.mrf.mxu0  ;;  %v5092_v9 = vshrl.u32 %v10769_v48, 16 }
 0x307   : > { %6430 = vmatmul.mubr.bf16.gmra.mxu0 %v10727_v2  ;;  %v7363_v6 = vadd.f32 %v7362_v28, %v7361_v56  ;;  %v7475_v30 = vadd.f32 %v7474_v45, %v7473_v13  ;;  %v5080_v2 = vshrl.u32 %v10752_v60, 16  ;;  %v8285_v56 = vld [vmem:[#allocation3 + $0xb8] sm:$0xf]  ;;  %v4614_v17 = vsel %vm1226_vm4, %v4609_v55, %v4613_v62  ;;  %v8222_v28 = vld [vmem:[#allocation3 + $0xbc] ss:$0 sps:$4 sm:$0x11]  }
 0x308   : > { %6437 = vmatprep.mubr.bf16.mxu0 %v5078_v7  ;;  %v7364_v47 = vpop.f32.mrf.mxu1  ;;  %v7476_v25 = vpop.f32.mrf.mxu0  ;;  %v7081_v13 = vcombine.low %v3784_v52, %v8285_v56  ;;  %v4616_v7 = vshrl.u32 %v10421_v26, 16  ;;  %v5096_v55 = vrot.slane %v5094_v46, 1  ;;  %v5099_v26 = vshll.u32 %v10527_v3, 16  ;;  %v8286_v62 = vld [vmem:[#allocation3 + $0xc4] sm:$0xf] }
 0x309   : > { %v5933_v29 = vadd.f32 %v10719_v11, %v7363_v6  ;;  %v5085_v0 = vor.u32 %v5084_v23, %v5080_v2  ;;  %v10782_v6 = vcombine.low %v3817_v41, %v10663_v49  ;;  %v4623_v23 = vshll.u32 %v8219_v50, 16 }
 0x30a   : > { %v7365_v27 = vpop.f32.mrf.mxu1  ;;  %v7477_v51 = vpop.f32.mrf.mxu0  ;;  %v4621_v18 = vor.u32 %v4620_v59, %v4616_v7  ;;  %v4758_v49 = vrot.slane %v8222_v28, 1  ;;  %v7082_v41 = vcombine.low %v3785_v4, %v8286_v62  ;;  %v5111_v3 = vshll.u32 %v10660_v31, 16 }
 0x30b   : > { %v10775_v33 = vadd.f32 %v7475_v30, %v5933_v29  ;;  %v7366_v43 = vadd.f32 %v7365_v27, %v7364_v47  ;;  %v7478_v53 = vadd.f32 %v7477_v51, %v7476_v25  ;;  %v5090_v47 = vsel %vm1226_vm4, %v5085_v0, %v5089_v16  ;;  %v8226_v51 = vld [vmem:[#allocation3 + $0xc8] ss:$0 sps:$4 sm:$0x11]  }
 0x30c   : > { %v7367_v21 = vpop.f32.mrf.mxu1  ;;  %v4630_v29 = vshll.u32 %v10486_v12, 16  ;;  %v4757_v25 = vrot.slane %v7081_v13, 1  ;;  %v5106_v50 = vshll.u32 %v10782_v6, 16  ;;  %v4625_v2 = vrot.slane %v4623_v23, 1 }
 0x30d   : > { %v5936_v8 = vadd.f32 %v10719_v11, %v7366_v43  ;;  %6277 = vmatmul.mubr.bf16.gmra.mxu1 %v4614_v17  ;;  %v5097_v27 = vor.u32 %v5096_v55, %v5092_v9  ;;  %v5101_v0 = vrot.slane %v5099_v26, 1  ;;  %v5104_v46 = vshrl.u32 %v10782_v6, 16 }
 0x30e   : > { %6284 = vmatprep.mubr.bf16.mxu1 %v4756_v42  ;;  %v7368_v45 = vpop.f32.mrf.mxu1  ;;  %v4626_v52 = vsel %vm1226_vm4, %v4621_v18, %v4625_v2  ;;  %v4759_v43 = vsel %vm1499_vm6, %v4757_v25, %v4758_v49  ;;  %v5108_v59 = vrot.slane %v5106_v50, 1  ;;  %v4628_v56 = vshrl.u32 %v10486_v12, 16 }
 0x30f   : > { %v10785_v39 = vadd.f32 %v7478_v53, %v5936_v8  ;;  %6438 = vmatmul.mubr.bf16.gmra.mxu0 %v10741_v1  ;;  %v7369_v30 = vadd.f32 %v7368_v45, %v7367_v21  ;;  %v4632_v1 = vrot.slane %v4630_v29, 1  ;;  %v4635_v13 = vshll.u32 %v8222_v28, 16 }
 0x310   : > { %6445 = vmatprep.mubr.bf16.mxu0 %v5090_v47  ;;  %v5102_v53 = vsel %vm1226_vm4, %v5097_v27, %v5101_v0  ;;  %v4642_v21 = vshll.u32 %v10493_v35, 16  ;;  %v7370_v8 = vpop.f32.mrf.mxu1  ;;  %v4760_v42 = vrot.slane %v7082_v41, 1  ;;  %v4761_v16 = vrot.slane %v8226_v51, 1 }
 0x311   : > { %v4633_v17 = vor.u32 %v4632_v1, %v4628_v56  ;;  %v5109_v7 = vor.u32 %v5108_v59, %v5104_v46  ;;  %v5113_v45 = vrot.slane %v5111_v3, 1  ;;  %v4637_v23 = vrot.slane %v4635_v13, 1 }
 0x312   : > { %v4644_v47 = vrot.slane %v4642_v21, 1  ;;  %v7371_v12 = vpop.f32.mrf.mxu1  ;;  %v4640_v29 = vshrl.u32 %v10493_v35, 16  ;;  %v4647_v18 = vshll.u32 %v8226_v51, 16  ;;  %v5941_v49 = vadd.f32 %v10719_v11, %v7369_v30 }
 0x313   : > { %v4638_v31 = vsel %vm1226_vm4, %v4633_v17, %v4637_v23  ;;  %v5114_v55 = vsel %vm1226_vm4, %v5109_v7, %v5113_v45  ;;  %v7372_v9 = vadd.f32 %v7371_v12, %v7370_v8  ;;  %v11117_v12 = vld [vmem:[#allocation5_spill] sm:$0xff] }
 0x314   : > { %v4645_v50 = vor.u32 %v4644_v47, %v4640_v29  ;;  %v4649_v27 = vrot.slane %v4647_v18, 1  ;;  %v11116_v47 = vld [vmem:[#allocation4_spill] sm:$0xff] }
 0x315   : > { %6285 = vmatmul.mubr.bf16.gmra.mxu1 %v4626_v52  ;;  %v5944_v62 = vadd.f32 %v10719_v11, %v7372_v9  ;;  %v11119_v9 = vld [vmem:[#allocation7_spill] sm:$0xff] }
 0x316   : > { %6292 = vmatprep.mubr.bf16.mxu1 %v4759_v43  ;;  %v4650_v52 = vsel %vm1226_vm4, %v4645_v50, %v4649_v27 }
 0x317   : > { %6446 = vmatmul.mubr.bf16.gmra.mxu0 %v10752_v60  ;;  %v4762_v60 = vsel %vm1499_vm6, %v4760_v42, %v4761_v16 }
 0x318   : > { %6453 = vmatprep.mubr.bf16.mxu0 %v5102_v53 }
 0x31c   : > { %v7479_v28 = vpop.f32.mrf.mxu0 }
 0x31d   : > { %6293 = vmatmul.mubr.bf16.gmra.mxu1 %v4638_v31 }
 0x31e   : > { %6300 = vmatprep.mubr.bf16.mxu1 %v4762_v60  ;;  %v7480_v25 = vpop.f32.mrf.mxu0 }
 0x31f   : > { %6454 = vmatmul.mubr.bf16.gmra.mxu0 %v10769_v48  ;;  %v7481_v26 = vadd.f32 %v7480_v25, %v7479_v28 }
 0x320   : > { %6461 = vmatprep.mubr.bf16.mxu0 %v5114_v55  ;;  %v7482_v2 = vpop.f32.mrf.mxu0 }
 0x321   : > { %v10807_v4 = vadd.f32 %v7481_v26, %v5941_v49 }
 0x322   : > { %v7483_v1 = vpop.f32.mrf.mxu0 }
 0x323   : > { %v7484_v41 = vadd.f32 %v7483_v1, %v7482_v2 }
 0x324   : > { %v7373_v35 = vpop.f32.mrf.mxu1  ;;  %v7485_v48 = vpop.f32.mrf.mxu0 }
 0x325   : > { %6301 = vmatmul.mubr.bf16.gmra.mxu1 %v4650_v52  ;;  %v10811_v43 = vadd.f32 %v7484_v41, %v5944_v62 }
 0x326   : > { %7821 = vmatprep.mubr.bf16.mxu1 %v10165_v57  ;;  %v7374_v30 = vpop.f32.mrf.mxu1  ;;  %v7486_v0 = vpop.f32.mrf.mxu0 }
 0x327   : > { %6462 = vmatmul.mubr.bf16.gmra.mxu0 %v10782_v6  ;;  %v7375_v51 = vadd.f32 %v7374_v30, %v7373_v35  ;;  %v7487_v46 = vadd.f32 %v7486_v0, %v7485_v48 }
 0x328   : > { %7817 = vmatprep.mubr.bf16.mxu0 %v10092_v61  ;;  %v7376_v59 = vpop.f32.mrf.mxu1  ;;  %v7488_v56 = vpop.f32.mrf.mxu0 }
 0x329   : > { %v5949_v3 = vadd.f32 %v10719_v11, %v7375_v51 }
 0x32a   : > { %v7377_v13 = vpop.f32.mrf.mxu1  ;;  %v7489_v17 = vpop.f32.mrf.mxu0 }
 0x32b   : > { %v10817_v53 = vadd.f32 %v7487_v46, %v5949_v3  ;;  %v7378_v21 = vadd.f32 %v7377_v13, %v7376_v59  ;;  %v7490_v8 = vadd.f32 %v7489_v17, %v7488_v56  ;;  %v11120_v59 = vld [vmem:[#allocation12_spill] sm:$0xff]  ;;  %v11121_v3 = vld [vmem:[#allocation13_spill] sm:$0xff] }
 0x32c   : > { %v7379_v42 = vpop.f32.mrf.mxu1 }
 0x32d   : > { %v5952_v57 = vadd.f32 %v10719_v11, %v7378_v21  ;;  %7822 = vmatmul.mubr.bf16.vlgmr.msra.gmra.mxu1 %v10244_v15 }
 0x32e   : > { %7825 = vmatprep.mubr.bf16.mxu1 %v10309_v20  ;;  %v7380_v6 = vpop.f32.mrf.mxu1 }
 0x32f   : > { %v10822_v61 = vadd.f32 %v7490_v8, %v5952_v57  ;;  %7818 = vmatmul.mubr.bf16.vlgmr.msra.gmra.mxu0 %v10176_v58  ;;  %v7381_v16 = vadd.f32 %v7380_v6, %v7379_v42 }
 0x330   : > { %v7382_v7 = vpop.f32.mrf.mxu1 }
 0x331   : > { %v5957_v20 = vadd.f32 %v10719_v11, %v7381_v16 }
 0x332   : > { %v7383_v45 = vpop.f32.mrf.mxu1 }
 0x333   : > { %v7384_v23 = vadd.f32 %v7383_v45, %v7382_v7 }
 0x335   : > { %7826 = vmatmul.mubr.bf16.gmra.mxu1 %v10321_v22  ;;  %v5960_v29 = vadd.f32 %v10719_v11, %v7384_v23  ;;  %v11118_v22 = vld [vmem:[#allocation6_spill] sm:$0xff] }
 0x336   : > { %7829 = vmatprep.mubr.bf16.mxu1 %v10354_v34 }
 0x33c   : > { %v7491_v31 = vpop.f32.mrf.mxu0 }
 0x33d   : > { %7830 = vmatmul.mubr.bf16.gmra.mxu1 %v11116_v47 }
 0x33e   : > { %7833 = vmatprep.mubr.bf16.mxu1 %v11117_v12  ;;  %v7492_v15 = vpop.f32.mrf.mxu0 }
 0x33f   : > { %v7493_v28 = vadd.f32 %v7492_v15, %v7491_v31 }
 0x340   : > { %v7494_v60 = vpop.f32.mrf.mxu0 }
 0x341   : > { %v10830_v55 = vadd.f32 %v7493_v28, %v5957_v20 }
 0x342   : > { %v7495_v58 = vpop.f32.mrf.mxu0 }
 0x343   : > { %v7496_v18 = vadd.f32 %v7495_v58, %v7494_v60 }
 0x344   : > { %v7385_v25 = vpop.f32.mrf.mxu1  ;;  %v7497_v34 = vpop.f32.mrf.mxu0 }
 0x345   : > { %7834 = vmatmul.mubr.bf16.gmra.mxu1 %v11118_v22  ;;  %v10834_v49 = vadd.f32 %v7496_v18, %v5960_v29 }
 0x346   : > { %7837 = vmatprep.mubr.bf16.mxu1 %v11119_v9  ;;  %v7386_v26 = vpop.f32.mrf.mxu1  ;;  %v7498_v2 = vpop.f32.mrf.mxu0 }
 0x347   : > { %v7387_v50 = vadd.f32 %v7386_v26, %v7385_v25  ;;  %v7499_v27 = vadd.f32 %v7498_v2, %v7497_v34 }
 0x348   : > { %v7388_v1 = vpop.f32.mrf.mxu1  ;;  %v7500_v41 = vpop.f32.mrf.mxu0 }
 0x349   : > { %v5965_v62 = vadd.f32 %v10719_v11, %v7387_v50 }
 0x34a   : > { %v7389_v35 = vpop.f32.mrf.mxu1  ;;  %v7501_v30 = vpop.f32.mrf.mxu0 }
 0x34b   : > { %v10838_v52 = vadd.f32 %v7499_v27, %v5965_v62  ;;  %v7390_v48 = vadd.f32 %v7389_v35, %v7388_v1  ;;  %v7502_v51 = vadd.f32 %v7501_v30, %v7500_v41  ;;  %v11123_v30 = vld [vmem:[#allocation8_spill] sm:$0xff] }
 0x34c   : > { %v7391_v0 = vpop.f32.mrf.mxu1 }
 0x34d   : > { %v5968_v46 = vadd.f32 %v10719_v11, %v7390_v48  ;;  %7838 = vmatmul.mubr.bf16.gmra.mxu1 %v11120_v59 }
 0x34e   : > { %7841 = vmatprep.mubr.bf16.mxu1 %v11121_v3  ;;  %v7392_v56 = vpop.f32.mrf.mxu1 }
 0x34f   : > { %v10843_v13 = vadd.f32 %v7502_v51, %v5968_v46  ;;  %v7393_v21 = vadd.f32 %v7392_v56, %v7391_v0 }
 0x350   : > { %v7394_v17 = vpop.f32.mrf.mxu1 }
 0x351   : > { %v5973_v16 = vadd.f32 %v10719_v11, %v7393_v21 }
 0x352   : > { %v7395_v8 = vpop.f32.mrf.mxu1 }
 0x353   : > { %v7396_v42 = vadd.f32 %v7395_v8, %v7394_v17  ;;  %v11124_v8 = vld [vmem:[#allocation9_spill] sm:$0xff] }
 0x355   : > { %7842 = vmatmul.mubr.bf16.gmra.mxu1 %v10543_v38  ;;  %v5976_v31 = vadd.f32 %v10719_v11, %v7396_v42 }
 0x356   : > { %7845 = vmatprep.mubr.bf16.mxu1 %v10548_v54 }
 0x35d   : > { %7846 = vmatmul.mubr.bf16.gmra.mxu1 %v10674_v32  ;;  %v7503_v57 = vpop.f32.mrf.mxu0 }
 0x35f   : > { %v7504_v6 = vpop.f32.mrf.mxu0 }
 0x360   : > { %v7505_v7 = vadd.f32 %v7504_v6, %v7503_v57 }
 0x361   : > { %v7506_v45 = vpop.f32.mrf.mxu0 }
 0x362   : > { %v10849_v23 = vadd.f32 %v7505_v7, %v5973_v16 }
 0x363   : > { %v7507_v47 = vpop.f32.mrf.mxu0 }
 0x364   : > { %v7508_v12 = vadd.f32 %v7507_v47, %v7506_v45 }
 0x365   : > { %v7397_v15 = vpop.f32.mrf.mxu1  ;;  %v7509_v20 = vpop.f32.mrf.mxu0 }
 0x366   : > { %v10852_v28 = vadd.f32 %v7508_v12, %v5976_v31  ;;  %v11125_v31 = vld [vmem:[#allocation10_spill] sm:$0xff] }
 0x367   : > { %v7398_v38 = vpop.f32.mrf.mxu1  ;;  %v7510_v60 = vpop.f32.mrf.mxu0 }
 0x368   : > { %11122 = vst [vmem:[#allocation4_spill] sm:$0xff] %v10852_v28  ;;  %v7399_v54 = vadd.f32 %v7398_v38, %v7397_v15  ;;  %v7511_v32 = vadd.f32 %v7510_v60, %v7509_v20 }
 0x369   : > { %v7400_v58 = vpop.f32.mrf.mxu1  ;;  %v7512_v18 = vpop.f32.mrf.mxu0 }
 0x36a   : > { %v5981_v29 = vadd.f32 %v10719_v11, %v7399_v54 }
 0x36b   : > { %v7401_v25 = vpop.f32.mrf.mxu1  ;;  %v7513_v9 = vpop.f32.mrf.mxu0 }
 0x36c   : > { %v10855_v22 = vadd.f32 %v7511_v32, %v5981_v29  ;;  %v7402_v34 = vadd.f32 %v7401_v25, %v7400_v58  ;;  %v7514_v26 = vadd.f32 %v7513_v9, %v7512_v18  ;;  %v11126_v29 = vld [vmem:[#allocation11_spill] sm:$0xff] }
 0x36d   : > { %v7531_v50 = vpop.f32.mrf.mxu1  ;;  %v7643_v27 = vpop.f32.mrf.mxu0 }
 0x36e   : > { %v5984_v2 = vadd.f32 %v10719_v11, %v7402_v34 }
 0x36f   : > { %v7532_v1 = vpop.f32.mrf.mxu1  ;;  %v7644_v35 = vpop.f32.mrf.mxu0 }
 0x370   : > { %v10858_v62 = vadd.f32 %v7514_v26, %v5984_v2  ;;  %v7533_v41 = vadd.f32 %v7532_v1, %v7531_v50  ;;  %v7645_v0 = vadd.f32 %v7644_v35, %v7643_v27  ;;  %v11127_v1 = vld [vmem:[#allocation14_spill] sm:$0xff] }
 0x371   : > { %v7534_v48 = vpop.f32.mrf.mxu1  ;;  %v7646_v46 = vpop.f32.mrf.mxu0 }
 0x372   : > { %v6183_v51 = vadd.f32 %v7533_v41, %v11123_v30 }
 0x373   : > { %v7535_v59 = vpop.f32.mrf.mxu1  ;;  %v7647_v21 = vpop.f32.mrf.mxu0 }
 0x374   : > { %v7536_v3 = vadd.f32 %v7535_v59, %v7534_v48  ;;  %v10861_v56 = vadd.f32 %v7645_v0, %v6183_v51  ;;  %v7648_v11 = vadd.f32 %v7647_v21, %v7646_v46 }
 0x375   : > { %v7537_v17 = vpop.f32.mrf.mxu1 }
 0x376   : > { %v6186_v42 = vadd.f32 %v7536_v3, %v11124_v8  ;;  %v11128_v3 = vld [vmem:[#allocation15_spill] sm:$0xff] }
 0x377   : > { %v7649_v57 = vpop.f32.mrf.mxu0  ;;  %v7538_v6 = vpop.f32.mrf.mxu1 }
 0x378   : > { %v7539_v16 = vadd.f32 %v7538_v6, %v7537_v17  ;;  %v10864_v7 = vadd.f32 %v7648_v11, %v6186_v42 }
 0x379   : > { %v7650_v45 = vpop.f32.mrf.mxu0  ;;  %v7540_v47 = vpop.f32.mrf.mxu1 }
 0x37a   : > { %v6191_v12 = vadd.f32 %v7539_v16, %v11125_v31  ;;  %v7651_v15 = vadd.f32 %v7650_v45, %v7649_v57 }
 0x37b   : > { %v7652_v20 = vpop.f32.mrf.mxu0  ;;  %v7541_v38 = vpop.f32.mrf.mxu1 }
 0x37c   : > { %v7542_v54 = vadd.f32 %v7541_v38, %v7540_v47  ;;  %v10867_v60 = vadd.f32 %v7651_v15, %v6191_v12 }
 0x37d   : > { %v7653_v32 = vpop.f32.mrf.mxu0  ;;  %v7543_v58 = vpop.f32.mrf.mxu1 }
 0x37e   : > { %v6194_v18 = vadd.f32 %v7542_v54, %v11126_v29  ;;  %v7654_v25 = vadd.f32 %v7653_v32, %v7652_v20 }
 0x37f   : > { %v7655_v34 = vpop.f32.mrf.mxu0  ;;  %v7544_v9 = vpop.f32.mrf.mxu1 }
 0x380   : > { %v7545_v26 = vadd.f32 %v7544_v9, %v7543_v58  ;;  %v10870_v50 = vadd.f32 %v7654_v25, %v6194_v18 }
 0x381   : > { %v7656_v2 = vpop.f32.mrf.mxu0  ;;  %v7546_v27 = vpop.f32.mrf.mxu1 }
 0x382   : > { %v6199_v41 = vadd.f32 %v7545_v26, %v11127_v1  ;;  %v7657_v35 = vadd.f32 %v7656_v2, %v7655_v34 }
 0x383   : > { %v7658_v48 = vpop.f32.mrf.mxu0  ;;  %v7547_v30 = vpop.f32.mrf.mxu1 }
 0x384   : > { %v7548_v51 = vadd.f32 %v7547_v30, %v7546_v27  ;;  %v10873_v0 = vadd.f32 %v7657_v35, %v6199_v41 }
 0x385   : > { %v7659_v46 = vpop.f32.mrf.mxu0  ;;  %v7549_v59 = vpop.f32.mrf.mxu1 }
 0x386   : > { %v6202_v21 = vadd.f32 %v7548_v51, %v11128_v3  ;;  %v7660_v17 = vadd.f32 %v7659_v46, %v7658_v48  ;;  %v11129_v51 = vld [vmem:[#allocation16_spill] sm:$0xff] }
 0x387   : > { %v7661_v8 = vpop.f32.mrf.mxu0  ;;  %v7550_v42 = vpop.f32.mrf.mxu1 }
 0x388   : > { %v7551_v11 = vadd.f32 %v7550_v42, %v7549_v59  ;;  %v10876_v57 = vadd.f32 %v7660_v17, %v6202_v21 }
 0x389   : > { %v7662_v6 = vpop.f32.mrf.mxu0  ;;  %v7552_v16 = vpop.f32.mrf.mxu1 }
 0x38a   : > { %v6207_v45 = vadd.f32 %v7551_v11, %v10539_v37  ;;  %v7663_v47 = vadd.f32 %v7662_v6, %v7661_v8 }
 0x38b   : > { %v7664_v31 = vpop.f32.mrf.mxu0  ;;  %v7553_v12 = vpop.f32.mrf.mxu1 }
 0x38c   : > { %v7554_v15 = vadd.f32 %v7553_v12, %v7552_v16  ;;  %v10879_v20 = vadd.f32 %v7663_v47, %v6207_v45 }
 0x38d   : > { %v7665_v38 = vpop.f32.mrf.mxu0  ;;  %v7555_v54 = vpop.f32.mrf.mxu1 }
 0x38e   : > { %v6210_v32 = vadd.f32 %v7554_v15, %v10564_v14  ;;  %v7666_v58 = vadd.f32 %v7665_v38, %v7664_v31  ;;  %v11130_v15 = vld [vmem:[#allocation17_spill] sm:$0xff] }
 0x38f   : > { %v7667_v29 = vpop.f32.mrf.mxu0  ;;  %v7556_v18 = vpop.f32.mrf.mxu1 }
 0x390   : > { %v7557_v25 = vadd.f32 %v7556_v18, %v7555_v54  ;;  %v10882_v34 = vadd.f32 %v7666_v58, %v6210_v32 }
 0x391   : > { %v7668_v9 = vpop.f32.mrf.mxu0  ;;  %v7558_v26 = vpop.f32.mrf.mxu1 }
 0x392   : > { %v6215_v37 = vadd.f32 %v7557_v25, %v10612_v10  ;;  %v7669_v2 = vadd.f32 %v7668_v9, %v7667_v29 }
 0x393   : > { %v7670_v27 = vpop.f32.mrf.mxu0  ;;  %v7559_v1 = vpop.f32.mrf.mxu1 }
 0x394   : > { %v7560_v41 = vadd.f32 %v7559_v1, %v7558_v26  ;;  %v10885_v35 = vadd.f32 %v7669_v2, %v6215_v37 }
 0x395   : > { %v7671_v48 = vpop.f32.mrf.mxu0  ;;  %v7561_v30 = vpop.f32.mrf.mxu1 }
 0x396   : > { %v6218_v14 = vadd.f32 %v7560_v41, %v11129_v51  ;;  %v7672_v46 = vadd.f32 %v7671_v48, %v7670_v27 }
 0x397   : > { %v7673_v59 = vpop.f32.mrf.mxu0  ;;  %v7562_v3 = vpop.f32.mrf.mxu1 }
 0x398   : > { %v7563_v21 = vadd.f32 %v7562_v3, %v7561_v30  ;;  %v10888_v17 = vadd.f32 %v7672_v46, %v6218_v14 }
 0x399   : > { %v7674_v8 = vpop.f32.mrf.mxu0  ;;  %v7564_v42 = vpop.f32.mrf.mxu1 }
 0x39a   : > { %v6223_v10 = vadd.f32 %v7563_v21, %v10636_v40  ;;  %v7675_v11 = vadd.f32 %v7674_v8, %v7673_v59 }
 0x39b   : > { %v7676_v6 = vpop.f32.mrf.mxu0  ;;  %v7565_v16 = vpop.f32.mrf.mxu1 }
 0x39c   : > { %v7566_v45 = vadd.f32 %v7565_v16, %v7564_v42  ;;  %v10891_v47 = vadd.f32 %v7675_v11, %v6223_v10 }
 0x39d   : > { %v7677_v31 = vpop.f32.mrf.mxu0  ;;  %v7567_v12 = vpop.f32.mrf.mxu1 }
 0x39e   : > { %v6226_v38 = vadd.f32 %v7566_v45, %v11130_v15  ;;  %v7678_v54 = vadd.f32 %v7677_v31, %v7676_v6 }
 0x39f   : > { %v7679_v32 = vpop.f32.mrf.mxu0  ;;  %v7568_v58 = vpop.f32.mrf.mxu1 }
 0x3a0   : > { %v7569_v29 = vadd.f32 %v7568_v58, %v7567_v12  ;;  %v10894_v18 = vadd.f32 %v7678_v54, %v6226_v38 }
 0x3a1   : > { %v7680_v25 = vpop.f32.mrf.mxu0  ;;  %v7570_v9 = vpop.f32.mrf.mxu1 }
 0x3a2   : > { %v6231_v40 = vadd.f32 %v7569_v29, %v10691_v63  ;;  %v7681_v26 = vadd.f32 %v7680_v25, %v7679_v32 }
 0x3a3   : > { %v7682_v37 = vpop.f32.mrf.mxu0  ;;  %v7571_v2 = vpop.f32.mrf.mxu1 }
 0x3a4   : > { %v7572_v27 = vadd.f32 %v7571_v2, %v7570_v9  ;;  %v10897_v1 = vadd.f32 %v7681_v26, %v6231_v40 }
 0x3a5   : > { %v7683_v41 = vpop.f32.mrf.mxu0  ;;  %v7573_v48 = vpop.f32.mrf.mxu1 }
 0x3a6   : > { %v6234_v30 = vadd.f32 %v7572_v27, %v10701_v19  ;;  %v7684_v51 = vadd.f32 %v7683_v41, %v7682_v37 }
 0x3a7   : > { %v7685_v14 = vpop.f32.mrf.mxu0  ;;  %v7574_v46 = vpop.f32.mrf.mxu1 }
 0x3a8   : > { %v7575_v59 = vadd.f32 %v7574_v46, %v7573_v48  ;;  %v10900_v3 = vadd.f32 %v7684_v51, %v6234_v30 }
 0x3a9   : > { %v7686_v21 = vpop.f32.mrf.mxu0  ;;  %v7576_v8 = vpop.f32.mrf.mxu1 }
 0x3aa   : > { %v6239_v63 = vadd.f32 %v7575_v59, %v10712_v44  ;;  %v7687_v42 = vadd.f32 %v7686_v21, %v7685_v14 }
 0x3ab   : > { %v7688_v10 = vpop.f32.mrf.mxu0  ;;  %v7577_v11 = vpop.f32.mrf.mxu1 }
 0x3ac   : > { %v7578_v6 = vadd.f32 %v7577_v11, %v7576_v8  ;;  %v10903_v16 = vadd.f32 %v7687_v42, %v6239_v63 }
 0x3ad   : > { %v7689_v45 = vpop.f32.mrf.mxu0  ;;  %v7579_v31 = vpop.f32.mrf.mxu1 }
 0x3ae   : > { %v6242_v19 = vadd.f32 %v7578_v6, %v10730_v36  ;;  %v7690_v12 = vadd.f32 %v7689_v45, %v7688_v10 }
 0x3af   : > { %v7691_v15 = vpop.f32.mrf.mxu0  ;;  %v7580_v38 = vpop.f32.mrf.mxu1 }
 0x3b0   : > { %v7581_v54 = vadd.f32 %v7580_v38, %v7579_v31  ;;  %v10906_v32 = vadd.f32 %v7690_v12, %v6242_v19 }
 0x3b1   : > { %v7692_v58 = vpop.f32.mrf.mxu0  ;;  %v7582_v29 = vpop.f32.mrf.mxu1 }
 0x3b2   : > { %v6247_v44 = vadd.f32 %v7581_v54, %v10757_v5  ;;  %v7693_v25 = vadd.f32 %v7692_v58, %v7691_v15 }
 0x3b3   : > { %v7694_v9 = vpop.f32.mrf.mxu0  ;;  %v7583_v40 = vpop.f32.mrf.mxu1 }
 0x3b4   : > { %v7584_v26 = vadd.f32 %v7583_v40, %v7582_v29  ;;  %v10909_v37 = vadd.f32 %v7693_v25, %v6247_v44 }
 0x3b5   : > { %v7695_v2 = vpop.f32.mrf.mxu0  ;;  %v7585_v27 = vpop.f32.mrf.mxu1 }
 0x3b6   : > { %v6250_v36 = vadd.f32 %v7584_v26, %v10764_v24  ;;  %v7696_v41 = vadd.f32 %v7695_v2, %v7694_v9 }
 0x3b7   : > { %v7697_v48 = vpop.f32.mrf.mxu0  ;;  %v7586_v30 = vpop.f32.mrf.mxu1 }
 0x3b8   : > { %v7587_v51 = vadd.f32 %v7586_v30, %v7585_v27  ;;  %v10912_v14 = vadd.f32 %v7696_v41, %v6250_v36 }
 0x3b9   : > { %v7698_v46 = vpop.f32.mrf.mxu0  ;;  %v7588_v59 = vpop.f32.mrf.mxu1 }
 0x3ba   : > { %v6255_v5 = vadd.f32 %v7587_v51, %v10775_v33  ;;  %v7699_v21 = vadd.f32 %v7698_v46, %v7697_v48 }
 0x3bb   : > { %v7700_v8 = vpop.f32.mrf.mxu0  ;;  %v7589_v63 = vpop.f32.mrf.mxu1 }
 0x3bc   : > { %v7590_v42 = vadd.f32 %v7589_v63, %v7588_v59  ;;  %v10915_v10 = vadd.f32 %v7699_v21, %v6255_v5 }
 0x3bd   : > { %v7701_v11 = vpop.f32.mrf.mxu0  ;;  %v7591_v6 = vpop.f32.mrf.mxu1 }
 0x3be   : > { %v6258_v24 = vadd.f32 %v7590_v42, %v10785_v39  ;;  %v7702_v45 = vadd.f32 %v7701_v11, %v7700_v8 }
 0x3bf   : > { %v7703_v31 = vpop.f32.mrf.mxu0  ;;  %v7592_v19 = vpop.f32.mrf.mxu1 }
 0x3c0   : > { %v7593_v12 = vadd.f32 %v7592_v19, %v7591_v6  ;;  %v10918_v15 = vadd.f32 %v7702_v45, %v6258_v24 }
 0x3c1   : > { %v7704_v38 = vpop.f32.mrf.mxu0  ;;  %v7594_v54 = vpop.f32.mrf.mxu1 }
 0x3c2   : > { %v6263_v33 = vadd.f32 %v7593_v12, %v10807_v4  ;;  %v7705_v58 = vadd.f32 %v7704_v38, %v7703_v31 }
 0x3c3   : > { %v7706_v29 = vpop.f32.mrf.mxu0  ;;  %v7595_v44 = vpop.f32.mrf.mxu1 }
 0x3c4   : > { %v7596_v25 = vadd.f32 %v7595_v44, %v7594_v54  ;;  %v10921_v9 = vadd.f32 %v7705_v58, %v6263_v33 }
 0x3c5   : > { %v7707_v40 = vpop.f32.mrf.mxu0  ;;  %v7597_v26 = vpop.f32.mrf.mxu1 }
 0x3c6   : > { %v6266_v39 = vadd.f32 %v7596_v25, %v10811_v43  ;;  %v7708_v2 = vadd.f32 %v7707_v40, %v7706_v29 }
 0x3c7   : > { %v7709_v27 = vpop.f32.mrf.mxu0  ;;  %v7598_v36 = vpop.f32.mrf.mxu1 }
 0x3c8   : > { %v7599_v41 = vadd.f32 %v7598_v36, %v7597_v26  ;;  %v10924_v48 = vadd.f32 %v7708_v2, %v6266_v39 }
 0x3c9   : > { %v7710_v30 = vpop.f32.mrf.mxu0  ;;  %v7600_v51 = vpop.f32.mrf.mxu1 }
 0x3ca   : > { %v6271_v4 = vadd.f32 %v7599_v41, %v10817_v53  ;;  %v7711_v46 = vadd.f32 %v7710_v30, %v7709_v27 }
 0x3cb   : > { %v7712_v59 = vpop.f32.mrf.mxu0  ;;  %v7601_v5 = vpop.f32.mrf.mxu1 }
 0x3cc   : > { %v7602_v21 = vadd.f32 %v7601_v5, %v7600_v51  ;;  %v10927_v8 = vadd.f32 %v7711_v46, %v6271_v4 }
 0x3cd   : > { %v7713_v63 = vpop.f32.mrf.mxu0  ;;  %v7603_v42 = vpop.f32.mrf.mxu1 }
 0x3ce   : > { %v6274_v43 = vadd.f32 %v7602_v21, %v10822_v61  ;;  %v7714_v11 = vadd.f32 %v7713_v63, %v7712_v59 }
 0x3cf   : > { %v7715_v6 = vpop.f32.mrf.mxu0  ;;  %v7604_v24 = vpop.f32.mrf.mxu1 }
 0x3d0   : > { %v7605_v45 = vadd.f32 %v7604_v24, %v7603_v42  ;;  %v10930_v31 = vadd.f32 %v7714_v11, %v6274_v43 }
 0x3d1   : > { %v7716_v19 = vpop.f32.mrf.mxu0  ;;  %v7606_v12 = vpop.f32.mrf.mxu1 }
 0x3d2   : > { %v6279_v53 = vadd.f32 %v7605_v45, %v10830_v55  ;;  %v7717_v38 = vadd.f32 %v7716_v19, %v7715_v6 }
 0x3d3   : > { %v7718_v54 = vpop.f32.mrf.mxu0  ;;  %v7607_v33 = vpop.f32.mrf.mxu1 }
 0x3d4   : > { %v7608_v58 = vadd.f32 %v7607_v33, %v7606_v12  ;;  %v10933_v29 = vadd.f32 %v7717_v38, %v6279_v53 }
 0x3d5   : > { %v7719_v44 = vpop.f32.mrf.mxu0  ;;  %v10935_v25 = vpop.f32.mrf.mxu1 }
 0x3d6   : > { %v6282_v61 = vadd.f32 %v7608_v58, %v10834_v49  ;;  %v7720_v40 = vadd.f32 %v7719_v44, %v7718_v54 }
 0x3d7   : > { %v10938_v26 = vpop.f32.mrf.mxu0  ;;  %v10940_v39 = vpop.f32.mrf.mxu1 }
 0x3d8   : > { %v10942_v2 = vadd.f32 %v7720_v40, %v6282_v61 }
 0x3d9   : > { %v10944_v27 = vpop.f32.mrf.mxu0  ;;  %v10946_v55 = vpop.f32.mrf.mxu1 }
 0x3da   : > { %11131 = vst [vmem:[#allocation5_spill] sm:$0xff] %v10942_v2 }
 0x3db   : > { %v10948_v36 = vpop.f32.mrf.mxu0  ;;  %v10950_v41 = vpop.f32.mrf.mxu1 }
 0x3dd   : > { %v10952_v30 = vpop.f32.mrf.mxu0  ;;  %v10954_v51 = vpop.f32.mrf.mxu1 }
 0x3df   : > { %v10956_v49 = vpop.f32.mrf.mxu0  ;;  %v10958_v4 = vpop.f32.mrf.mxu1 }
 0x3e1   : > { %v10960_v46 = vpop.f32.mrf.mxu0  ;;  %v10962_v59 = vpop.f32.mrf.mxu1 }
 0x3e3   : > { %v10964_v5 = vpop.f32.mrf.mxu0  ;;  %v10966_v21 = vpop.f32.mrf.mxu1 }
 0x3e4   : > { %11132 = vst [vmem:[#allocation6_spill] sm:$0xff] %v10964_v5 }
 0x3e5   : > { %v10968_v63 = vpop.f32.mrf.mxu0  ;;  %v10970_v42 = vpop.f32.mrf.mxu1 }
 0x3e6   : > { %11133 = vst [vmem:[#allocation7_spill] sm:$0xff] %v10968_v63 }
 0x3e7   : > { %v10972_v43 = vpop.f32.mrf.mxu0  ;;  %v10974_v11 = vpop.f32.mrf.mxu1 }
 0x3e9   : > { %v10976_v6 = vpop.f32.mrf.mxu0  ;;  %v10978_v24 = vpop.f32.mrf.mxu1 }
 0x3eb   : > { %v10980_v45 = vpop.f32.mrf.mxu0  ;;  %v10982_v19 = vpop.f32.mrf.mxu1 }
 0x3ed   : > { %v10984_v12 = vpop.f32.mrf.mxu0  ;;  %v7823_v53 = vpop.f32.mrf.mxu1 }
 0x3ee   : > { %11134 = vst [vmem:[#allocation12_spill] sm:$0xff] %v10984_v12  ;;  %v6529_v38 = vadd.f32 %v7823_v53, %v10879_v20 }
 0x3ef   : > { %v7819_v54 = vpop.f32.mrf.mxu0  ;;  %v6520_v33 = vpop.f32.mrf.mxu1 }
 0x3f0   : > { %v6637_v58 = vmax.f32 %v6529_v38, 0.0  ;;  %v6513_v44 = vadd.f32 %v7819_v54, %v10867_v60  ;;  %v6521_v61 = vadd.f32 %v6520_v33, %v10873_v0 }
 0x3f1   : > { %v6504_v40 = vpop.f32.mrf.mxu0  ;;  %v7824_v63 = vpop.f32.mrf.mxu1 }
 0x3f2   : > { %6669 = vst [vmem:[%s10992_s26 + $0x30] sm:$0xff] %v6637_v58  ;;  %v6633_v20 = vmax.f32 %v6513_v44, 0.0  ;;  %v6635_v53 = vmax.f32 %v6521_v61, 0.0  ;;  %v6505_v5 = vadd.f32 %v6504_v40, %v10861_v56  ;;  %v6532_v28 = vadd.f32 %v7824_v63, %v10882_v34 }
 0x3f3   : > { %v7820_v2 = vpop.f32.mrf.mxu0  ;;  %v6523_v12 = vpop.f32.mrf.mxu1 }
 0x3f4   : > { %6665 = vst [vmem:[%s10992_s26 + $0x10] sm:$0xff] %v6633_v20  ;;  %6667 = vst [vmem:[%s10992_s26 + $0x20] sm:$0xff] %v6635_v53  ;;  %v6631_v60 = vmax.f32 %v6505_v5, 0.0  ;;  %v6638_v38 = vmax.f32 %v6532_v28, 0.0  ;;  %v6516_v0 = vadd.f32 %v7820_v2, %v10870_v50  ;;  %v6524_v54 = vadd.f32 %v6523_v12, %v10876_v57 }
 0x3f5   : > { %v6507_v33 = vpop.f32.mrf.mxu0  ;;  %v7827_v58 = vpop.f32.mrf.mxu1 }
 0x3f6   : > { %6663 = vst [vmem:[%s10992_s26] sm:$0xff] %v6631_v60  ;;  %6670 = vst [vmem:[%s10992_s26 + $0x38] sm:$0xff] %v6638_v38  ;;  %v6634_v56 = vmax.f32 %v6516_v0, 0.0  ;;  %v6636_v34 = vmax.f32 %v6524_v54, 0.0  ;;  %v6508_v63 = vadd.f32 %v6507_v33, %v10864_v7  ;;  %v6545_v44 = vadd.f32 %v7827_v58, %v10891_v47 }
 0x3f7   : > { %v6536_v61 = vpop.f32.mrf.mxu1 }
 0x3f8   : > { %6666 = vst [vmem:[%s10992_s26 + $0x18] sm:$0xff] %v6634_v56  ;;  %6668 = vst [vmem:[%s10992_s26 + $0x28] sm:$0xff] %v6636_v34  ;;  %v6632_v28 = vmax.f32 %v6508_v63, 0.0  ;;  %v6641_v50 = vmax.f32 %v6545_v44, 0.0  ;;  %v6537_v57 = vadd.f32 %v6536_v61, %v10885_v35 }
 0x3f9   : > { %v7828_v2 = vpop.f32.mrf.mxu1 }
 0x3fa   : > { %6664 = vst [vmem:[%s10992_s26 + $0x8] sm:$0xff] %v6632_v28  ;;  %6673 = vst [vmem:[%s10992_s26 + $0x50] sm:$0xff] %v6641_v50  ;;  %v6639_v5 = vmax.f32 %v6537_v57, 0.0  ;;  %v6548_v12 = vadd.f32 %v7828_v2, %v10894_v18 }
 0x3fb   : > { %v6539_v40 = vpop.f32.mrf.mxu1 }
 0x3fc   : > { %6671 = vst [vmem:[%s10992_s26 + $0x40] sm:$0xff] %v6639_v5  ;;  %v6642_v7 = vmax.f32 %v6548_v12, 0.0  ;;  %v6540_v47 = vadd.f32 %v6539_v40, %v10888_v17 }
 0x3fd   : > { %v7831_v20 = vpop.f32.mrf.mxu1 }
 0x3fe   : > { %6674 = vst [vmem:[%s10992_s26 + $0x58] sm:$0xff] %v6642_v7  ;;  %v6640_v53 = vmax.f32 %v6540_v47, 0.0  ;;  %v6561_v60 = vadd.f32 %v7831_v20, %v10903_v16 }
 0x3ff   : > { %v6552_v35 = vpop.f32.mrf.mxu1 }
 0x400   : > { %6672 = vst [vmem:[%s10992_s26 + $0x48] sm:$0xff] %v6640_v53  ;;  %v6645_v38 = vmax.f32 %v6561_v60, 0.0  ;;  %v6553_v0 = vadd.f32 %v6552_v35, %v10897_v1  ;;  %v7617_v60 = vadd.f32 %v10958_v4, %v10954_v51 }
 0x401   : > { %v7832_v54 = vpop.f32.mrf.mxu1 }
 0x402   : > { %6677 = vst [vmem:[%s10992_s26 + $0x70] sm:$0xff] %v6645_v38  ;;  %v6643_v18 = vmax.f32 %v6553_v0, 0.0  ;;  %v6564_v33 = vadd.f32 %v7832_v54, %v10906_v32  ;;  %v6295_v4 = vadd.f32 %v7617_v60, %v10849_v23  ;;  %v7729_v0 = vadd.f32 %v10960_v46, %v10956_v49  ;;  %v11136_v49 = vld [vmem:[#allocation5_spill] sm:$0xff] }
 0x403   : > { %v6555_v58 = vpop.f32.mrf.mxu1 }
 0x404   : > { %6675 = vst [vmem:[%s10992_s26 + $0x60] sm:$0xff] %v6643_v18  ;;  %v6646_v17 = vmax.f32 %v6564_v33, 0.0  ;;  %v6556_v56 = vadd.f32 %v6555_v58, %v10900_v3  ;;  %v7611_v3 = vadd.f32 %v10940_v39, %v10935_v25  ;;  %v7614_v25 = vadd.f32 %v10950_v41, %v10946_v55 }
 0x405   : > { %v7835_v34 = vpop.f32.mrf.mxu1  ;;  %v7726_v55 = vadd.f32 %v10952_v30, %v10948_v36  ;;  %v7626_v36 = vadd.f32 %v10982_v19, %v10978_v24 }
 0x406   : > { %6678 = vst [vmem:[%s10992_s26 + $0x78] sm:$0xff] %v6646_v17  ;;  %v6644_v16 = vmax.f32 %v6556_v56, 0.0  ;;  %v6577_v63 = vadd.f32 %v7835_v34, %v10915_v10  ;;  %v6287_v40 = vadd.f32 %v7611_v3, %v10838_v52  ;;  %v7623_v52 = vadd.f32 %v10974_v11, %v10970_v42  ;;  %v11137_v56 = vld [vmem:[#allocation4_spill] sm:$0xff]  ;;  %v11139_v34 = vld [vmem:[#allocation7_spill] sm:$0xff] }
 0x407   : > { %v6568_v44 = vpop.f32.mrf.mxu1  ;;  %v6306_v18 = vadd.f32 %v7626_v36, %v10858_v62  ;;  %v6456_v17 = vadd.f32 %v7729_v0, %v6295_v4 }
 0x408   : > { %6676 = vst [vmem:[%s10992_s26 + $0x68] sm:$0xff] %v6644_v16  ;;  %v6649_v1 = vmax.f32 %v6577_v63, 0.0  ;;  %v6569_v61 = vadd.f32 %v6568_v44, %v10909_v37  ;;  %v6303_v11 = vadd.f32 %v7623_v52, %v10855_v22  ;;  %v7620_v22 = vadd.f32 %v10966_v21, %v10962_v59  ;;  %v11138_v21 = vld [vmem:[#allocation6_spill] sm:$0xff] }
 0x409   : > { %v7836_v28 = vpop.f32.mrf.mxu1  ;;  %v7732_v16 = vadd.f32 %v11139_v34, %v11138_v21 }
 0x40a   : > { %6681 = vst [vmem:[%s10992_s26 + $0x90] sm:$0xff] %v6649_v1  ;;  %v6647_v32 = vmax.f32 %v6569_v61, 0.0  ;;  %v6580_v50 = vadd.f32 %v7836_v28, %v10918_v15  ;;  %v7723_v15 = vadd.f32 %v10944_v27, %v10938_v26  ;;  %v6290_v27 = vadd.f32 %v7614_v25, %v10843_v13 }
 0x40b   : > { %v6571_v57 = vpop.f32.mrf.mxu1  ;;  %v7735_v13 = vadd.f32 %v10976_v6, %v10972_v43  ;;  %v6298_v59 = vadd.f32 %v7620_v22, %v11137_v56 }
 0x40c   : > { %6679 = vst [vmem:[%s10992_s26 + $0x80] sm:$0xff] %v6647_v32  ;;  %v6650_v2 = vmax.f32 %v6580_v50, 0.0  ;;  %v6572_v10 = vadd.f32 %v6571_v57, %v10912_v14  ;;  %v6448_v26 = vadd.f32 %v7723_v15, %v6287_v40  ;;  %v6451_v51 = vadd.f32 %v7726_v55, %v6290_v27 }
 0x40d   : > { %v7839_v5 = vpop.f32.mrf.mxu1  ;;  %v6464_v19 = vadd.f32 %v7735_v13, %v6303_v11  ;;  %v6459_v3 = vadd.f32 %v7732_v16, %v6298_v59 }
 0x40e   : > { %6682 = vst [vmem:[%s10992_s26 + $0x98] sm:$0xff] %v6650_v2  ;;  %v6648_v12 = vmax.f32 %v6572_v10, 0.0  ;;  %v6593_v37 = vadd.f32 %v7839_v5, %v10927_v8 }
 0x40f   : > { %v6584_v7 = vpop.f32.mrf.mxu1 }
 0x410   : > { %6680 = vst [vmem:[%s10992_s26 + $0x88] sm:$0xff] %v6648_v12  ;;  %v6653_v39 = vmax.f32 %v6593_v37, 0.0  ;;  %v6585_v14 = vadd.f32 %v6584_v7, %v10921_v9 }
 0x411   : > { %v7840_v47 = vpop.f32.mrf.mxu1 }
 0x412   : > { %6685 = vst [vmem:[%s10992_s26 + $0xb0] sm:$0xff] %v6653_v39  ;;  %v6651_v20 = vmax.f32 %v6585_v14, 0.0  ;;  %v6596_v8 = vadd.f32 %v7840_v47, %v10930_v31 }
 0x413   : > { %v6587_v53 = vpop.f32.mrf.mxu1 }
 0x414   : > { %6683 = vst [vmem:[%s10992_s26 + $0xa0] sm:$0xff] %v6651_v20  ;;  %v6654_v41 = vmax.f32 %v6596_v8, 0.0  ;;  %v6588_v9 = vadd.f32 %v6587_v53, %v10924_v48 }
 0x415   : > { %v7843_v35 = vpop.f32.mrf.mxu1 }
 0x416   : > { %6686 = vst [vmem:[%s10992_s26 + $0xb8] sm:$0xff] %v6654_v41  ;;  %v6652_v31 = vmax.f32 %v6588_v9, 0.0  ;;  %v6609_v42 = vadd.f32 %v7843_v35, %v6448_v26 }
 0x417   : > { %v6600_v38 = vpop.f32.mrf.mxu1 }
 0x418   : > { %6684 = vst [vmem:[%s10992_s26 + $0xa8] sm:$0xff] %v6652_v31  ;;  %v6657_v48 = vmax.f32 %v6609_v42, 0.0  ;;  %v6601_v30 = vadd.f32 %v6600_v38, %v10933_v29  ;;  %v11135_v29 = vld [vmem:[#allocation12_spill] sm:$0xff] }
 0x419   : > { %v7844_v54 = vpop.f32.mrf.mxu1  ;;  %v7738_v33 = vadd.f32 %v11135_v29, %v10980_v45 }
 0x41a   : > { %6689 = vst [vmem:[%s10992_s26 + $0xd0] sm:$0xff] %v6657_v48  ;;  %v6655_v43 = vmax.f32 %v6601_v30, 0.0  ;;  %v6612_v6 = vadd.f32 %v7844_v54, %v6451_v51 }
 0x41b   : > { %v6603_v24 = vpop.f32.mrf.mxu1  ;;  %v6467_v61 = vadd.f32 %v7738_v33, %v6306_v18 }
 0x41c   : > { %6687 = vst [vmem:[%s10992_s26 + $0xc0] sm:$0xff] %v6655_v43  ;;  %v6658_v23 = vmax.f32 %v6612_v6, 0.0  ;;  %v6604_v46 = vadd.f32 %v6603_v24, %v11136_v49 }
 0x41d   : > { %v7847_v58 = vpop.f32.mrf.mxu1 }
 0x41e   : > { %6690 = vst [vmem:[%s10992_s26 + $0xd8] sm:$0xff] %v6658_v23  ;;  %v6656_v63 = vmax.f32 %v6604_v46, 0.0  ;;  %v6625_v62 = vadd.f32 %v7847_v58, %v6464_v19 }
 0x41f   : > { %v6616_v44 = vpop.f32.mrf.mxu1 }
 0x420   : > { %6688 = vst [vmem:[%s10992_s26 + $0xc8] sm:$0xff] %v6656_v63  ;;  %v6661_v45 = vmax.f32 %v6625_v62, 0.0  ;;  %v6617_v1 = vadd.f32 %v6616_v44, %v6456_v17 }
 0x421   : > { %v7848_v28 = vpop.f32.mrf.mxu1 }
 0x422   : > { %6693 = vst [vmem:[%s10992_s26 + $0xf0] sm:$0xff] %v6661_v45  ;;  %v6659_v32 = vmax.f32 %v6617_v1, 0.0  ;;  %v6628_v50 = vadd.f32 %v7848_v28, %v6467_v61 }
 0x423   : > { %v6619_v57 = vpop.f32.mrf.mxu1 }
 0x424   : > { %6691 = vst [vmem:[%s10992_s26 + $0xe0] sm:$0xff] %v6659_v32  ;;  %v6662_v2 = vmax.f32 %v6628_v50, 0.0  ;;  %v6620_v10 = vadd.f32 %v6619_v57, %v6459_v3 }
 0x426   : > { %6694 = vst [vmem:[%s10992_s26 + $0xf8] sm:$0xff] %v6662_v2  ;;  %v6660_v5 = vmax.f32 %v6620_v10, 0.0 }
 0x428   : > { %6692 = vst [vmem:[%s10992_s26 + $0xe8] sm:$0xff] %v6660_v5 }
 0x429 PF: > { %s15_s18 = sadd.s32 1, %s8293_s18  }
 0x42a   : > { %p12_p4 = scmp.ge.s32.totalorder %s15_s18, 4  }
 0x42c   :  { %14 = sbr.rel (!%p12_p4) target bundleno = 1 (0x1), region = 74 }

</bundles_post_ra>
